<compile_context>
chip_gen: v7x
topology: tpu7x:2x2x1
jax: 0.10.0
libtpu: 0.0.40
codegen_flags: <defaults>
</compile_context>

<pallas_src>
import jax
import jax.numpy as jnp
from jax.experimental import pallas as pl
from jax.experimental.pallas import tpu as pltpu


# --------------------------- fused forward kernel ---------------------------

def _make_fused_kernel(B_pad, T, H, L, D):
    """Fused LSTM(+ReLU+FC) kernel for a static config (B_pad, T, H, L, D)."""
    H4 = 4 * H

    def kernel(*refs):
        # Ref layout: [x2d, (w_ih_cat, w_hh_blockdiag, b_cat) * L,
        #              w_fc_pad, b_fc_pad, out_pad]
        idx = 0
        x_ref = refs[idx]; idx += 1
        layer_refs = []
        for _l in range(L):
            layer_refs.append((refs[idx], refs[idx + 1], refs[idx + 2]))
            idx += 3
        wfc_ref = refs[idx]
        bfc_ref = refs[idx + 1]
        out_ref = refs[idx + 2]

        # Layer-0 input: time-major rows, batch padded to a full sublane tile.
        layer_in = x_ref[...]                               # (T*B_pad, in_sz)

        for l in range(L):
            wih_ref, whh_ref, b_ref = layer_refs[l]

            # ---- hoisted input projection, BOTH directions in one matmul ----
            xg = jnp.dot(layer_in, wih_ref[...],
                         preferred_element_type=jnp.float32) + b_ref[...]

            h = [jnp.zeros((B_pad, H), jnp.float32) for _ in range(D)]
            c = [jnp.zeros((B_pad, H), jnp.float32) for _ in range(D)]
            hs = [[None] * T for _ in range(D)]   # natural-time ordered outputs

            # ---- recurrence: fully unrolled, only h @ W_hh on the chain ----
            # TODO(synk): for larger T, switch to lax.fori_loop(unroll=4..8)
            # over sublane-aligned timestep blocks to bound vreg live ranges.
            for t in range(T):
                # Per-direction precomputed gates for this step.  Direction 0
                # reads natural time t, direction 1 reads T-1-t.  Row offsets
                # are multiples of B_pad=8, column blocks multiples of 4H=128.
                blocks = []
                for d in range(D):
                    tt = t if d == 0 else T - 1 - t
                    blocks.append(xg[tt * B_pad:(tt + 1) * B_pad,
                                     d * H4:(d + 1) * H4])
                gx = blocks[0] if D == 1 else jnp.concatenate(blocks, axis=1)

                # Merged-direction recurrent matmul (block-diagonal W_hh):
                # one 256-lane MXU result per step on v6e/v7x.
                h_cat = h[0] if D == 1 else jnp.concatenate(h, axis=1)
                gates = gx + jnp.dot(h_cat, whh_ref[...],
                                     preferred_element_type=jnp.float32)

                # Single full-width transcendental per step.  g-gate columns
                # were pre-scaled by 2, so tanh(pre_g) = 2*sigmoid(2*pre_g)-1.
                sg = jax.nn.sigmoid(gates)

                for d in range(D):
                    tt = t if d == 0 else T - 1 - t
                    base = d * H4
                    i_g = sg[:, base + 0 * H: base + 1 * H]
                    f_g = sg[:, base + 1 * H: base + 2 * H]
                    g_g = 2.0 * sg[:, base + 2 * H: base + 3 * H] - 1.0
                    o_g = sg[:, base + 3 * H: base + 4 * H]
                    c[d] = f_g * c[d] + i_g * g_g
                    h[d] = o_g * jnp.tanh(c[d])
                    hs[d][tt] = h[d]

            if l < L - 1:
                # Next layer's input as a value: natural time order,
                # [fwd | bwd] features.  No VMEM stores needed.
                rows = []
                for tt in range(T):
                    if D == 1:
                        rows.append(hs[0][tt])
                    else:
                        rows.append(jnp.concatenate(
                            [hs[d][tt] for d in range(D)], axis=1))
                layer_in = jnp.concatenate(rows, axis=0)    # (T*B_pad, D*H)
            else:
                # Deferred fused ReLU + Linear, off the recurrence tail:
                # hi in PyTorch reshape order (t, d, h), one lane-dense matmul
                # into the 128-padded output.
                feats = []
                for tt in range(T):
                    for d in range(D):
                        feats.append(hs[d][tt])
                hi = jnp.concatenate(feats, axis=1)         # (B_pad, T*D*H)
                out_ref[...] = (jnp.dot(jnp.maximum(hi, 0.0), wfc_ref[...],
                                        preferred_element_type=jnp.float32)
                                + bfc_ref[...])

    return kernel


# ---------------------- kernel-side weight preparation ----------------------

def _prep_kernel_params(params, num_layers, D, H):
    """Assemble per-layer merged/scaled weights for the fused kernel.

    - W_ih for both directions concatenated along the gate axis: (in, D*4H)
    - W_hh block-diagonal across directions:                     (D*H, D*4H)
    - bias concatenated:                                         (1, D*4H)
    - g-gate columns pre-scaled by 2 (tanh via 2*sigmoid(2x)-1)
    - FC weights/bias zero-padded to 128 output lanes (lane-dense stores)
    """
    H4 = 4 * H
    col_scale = jnp.ones((H4,), jnp.float32).at[2 * H:3 * H].set(2.0)
    wih_l, whh_l, b_l = [], [], []
    for l in range(num_layers):
        in_sz = params["lstm"][(l, 0)][0].shape[0]
        wih = jnp.zeros((in_sz, D * H4), jnp.float32)
        whh = jnp.zeros((D * H, D * H4), jnp.float32)
        b = jnp.zeros((1, D * H4), jnp.float32)
        for d in range(D):
            w_ih_t, w_hh_t, bias = params["lstm"][(l, d)]
            wih = wih.at[:, d * H4:(d + 1) * H4].set(w_ih_t * col_scale[None, :])
            whh = whh.at[d * H:(d + 1) * H, d * H4:(d + 1) * H4].set(
                w_hh_t * col_scale[None, :])
            b = b.at[:, d * H4:(d + 1) * H4].set(bias * col_scale)
        wih_l.append(wih)
        whh_l.append(whh)
        b_l.append(b)
    w_fc_t, b_fc = params["fc"]          # (fc_in, out), (1, out)
    fc_in, out_sz = w_fc_t.shape
    opad = ((out_sz + 127) // 128) * 128
    w_fc_pad = jnp.zeros((fc_in, opad), jnp.float32).at[:, :out_sz].set(w_fc_t)
    b_fc_pad = jnp.zeros((1, opad), jnp.float32).at[:, :out_sz].set(b_fc)
    return wih_l, whh_l, b_l, w_fc_pad, b_fc_pad


# ------------------------------- entry point --------------------------------

def lstm_net_bc_forward(x, params, *, bidirectional, num_layers, hidden_size,
                        output_size):
    """Equivalent of LSTMNet_BC.forward.  x: (B, T, input_size)."""
    B, T, IN = x.shape
    D = 2 if bidirectional else 1
    H = hidden_size
    B_pad = ((B + 7) // 8) * 8            # one full sublane tile minimum

    wih_l, whh_l, b_l, w_fc_pad, b_fc_pad = _prep_kernel_params(
        params, num_layers, D, H)
    OPAD = w_fc_pad.shape[1]

    # Time-major, batch-padded rows: row t*B_pad + b == x[b, t].
    x_pad = jnp.zeros((B_pad, T, IN), jnp.float32).at[:B].set(x)
    x2d = jnp.transpose(x_pad, (1, 0, 2)).reshape(T * B_pad, IN)

    inputs = [x2d]
    for l in range(num_layers):
        inputs += [wih_l[l], whh_l[l], b_l[l]]
    inputs += [w_fc_pad, b_fc_pad]

    # Fully VMEM-resident fused kernel: guard the footprint for portability
    # (v7x has only 64 MiB physical VMEM per TensorCore).
    # TODO(synk): if H/L/T scale up, stream per-layer weights with a grid axis
    # + BlockSpecs instead of keeping everything resident.
    footprint = sum(int(a.size) * 4 for a in inputs) + B_pad * OPAD * 4
    assert footprint < 24 * 1024 * 1024, "config too large for fused VMEM kernel"

    out_pad = pl.pallas_call(
        _make_fused_kernel(B_pad, T, H, num_layers, D),
        out_shape=jax.ShapeDtypeStruct((B_pad, OPAD), jnp.float32),
        compiler_params=pltpu.CompilerParams(vmem_limit_bytes=32 * 1024 * 1024),
    )(*inputs)
    return out_pad[:B, :output_size]


# ------------------------- params / reference / main ------------------------

def init_params(key, input_size, hidden_size, num_layers, output_size,
                seq_length, bidirectional):
    dirs = 2 if bidirectional else 1
    k = 1.0 / float(hidden_size) ** 0.5
    params = {"lstm": {}}
    for l in range(num_layers):
        in_sz = input_size if l == 0 else dirs * hidden_size
        for d in range(dirs):
            key, k1, k2, k3, k4 = jax.random.split(key, 5)
            w_ih = jax.random.uniform(k1, (4 * hidden_size, in_sz),
                                      minval=-k, maxval=k, dtype=jnp.float32)
            w_hh = jax.random.uniform(k2, (4 * hidden_size, hidden_size),
                                      minval=-k, maxval=k, dtype=jnp.float32)
            b_ih = jax.random.uniform(k3, (4 * hidden_size,),
                                      minval=-k, maxval=k, dtype=jnp.float32)
            b_hh = jax.random.uniform(k4, (4 * hidden_size,),
                                      minval=-k, maxval=k, dtype=jnp.float32)
            params["lstm"][(l, d)] = (w_ih.T, w_hh.T, (b_ih + b_hh)[None, :])
    fc_in = dirs * hidden_size * seq_length
    kf = 1.0 / float(fc_in) ** 0.5
    key, k1, k2 = jax.random.split(key, 3)
    w_fc = jax.random.uniform(k1, (output_size, fc_in),
                              minval=-kf, maxval=kf, dtype=jnp.float32)
    b_fc = jax.random.uniform(k2, (output_size,),
                              minval=-kf, maxval=kf, dtype=jnp.float32)
    params["fc"] = (w_fc.T, b_fc[None, :])
    return params


def reference_forward(x_btf, params, *, bidirectional, num_layers, hidden_size):
    """Pure-JAX reference matching PyTorch nn.LSTM + ReLU + Linear semantics."""
    B, T, _ = x_btf.shape
    dirs = 2 if bidirectional else 1
    H = hidden_size
    layer_in = x_btf
    for l in range(num_layers):
        dir_outs = []
        for d in range(dirs):
            w_ih, w_hh, b = params["lstm"][(l, d)]
            seq = layer_in if d == 0 else layer_in[:, ::-1]
            h = jnp.zeros((B, H), jnp.float32)
            c = jnp.zeros((B, H), jnp.float32)
            hs = []
            for t in range(T):
                gates = seq[:, t] @ w_ih + h @ w_hh + b
                i_g = jax.nn.sigmoid(gates[:, 0 * H:1 * H])
                f_g = jax.nn.sigmoid(gates[:, 1 * H:2 * H])
                g_g = jnp.tanh(gates[:, 2 * H:3 * H])
                o_g = jax.nn.sigmoid(gates[:, 3 * H:4 * H])
                c = f_g * c + i_g * g_g
                h = o_g * jnp.tanh(c)
                hs.append(h)
            out = jnp.stack(hs, axis=1)  # (B, T, H)
            if d == 1:
                out = out[:, ::-1]
            dir_outs.append(out)
        layer_in = jnp.concatenate(dir_outs, axis=-1)
    hi_flat = layer_in.reshape(B, -1)
    w_fc_t, b_fc = params["fc"]
    return jnp.maximum(hi_flat, 0.0) @ w_fc_t + b_fc


if __name__ == "__main__":
    # Small shapes consistent with the module's forward.
    batch = 2
    input_size = 8
    hidden_size = 32
    num_layers = 2
    seq_length = 8
    output_size = 4
    bidirectional = True

    key = jax.random.PRNGKey(0)
    key, kx = jax.random.split(key)
    x = jax.random.normal(kx, (batch, seq_length, input_size), dtype=jnp.float32)

    params = init_params(key, input_size, hidden_size, num_layers,
                         output_size, seq_length, bidirectional)

    out = lstm_net_bc_forward(x, params,
                              bidirectional=bidirectional,
                              num_layers=num_layers,
                              hidden_size=hidden_size,
                              output_size=output_size)
    out = jax.block_until_ready(out)
    assert out.shape == (batch, output_size)

    ref = reference_forward(x, params,
                            bidirectional=bidirectional,
                            num_layers=num_layers,
                            hidden_size=hidden_size)
    ref = jax.block_until_ready(ref)
    assert jnp.allclose(out, ref, rtol=1e-4, atol=1e-4)

    print("KERNEL_OK")
</pallas_src>

<mosaic_0001>
module attributes {stable_mosaic.version = 11 : i64} {
  func.func @kernel(%arg0: memref<64x8xf32, #tpu.memory_space<vmem>>, %arg1: memref<8x256xf32, #tpu.memory_space<vmem>>, %arg2: memref<64x256xf32, #tpu.memory_space<vmem>>, %arg3: memref<1x256xf32, #tpu.memory_space<vmem>>, %arg4: memref<64x256xf32, #tpu.memory_space<vmem>>, %arg5: memref<64x256xf32, #tpu.memory_space<vmem>>, %arg6: memref<1x256xf32, #tpu.memory_space<vmem>>, %arg7: memref<512x128xf32, #tpu.memory_space<vmem>>, %arg8: memref<1x128xf32, #tpu.memory_space<vmem>>, %arg9: memref<8x128xf32, #tpu.memory_space<vmem>>) attributes {dimension_semantics = [], scalar_prefetch = 0 : i64, scratch_operands = 0 : i64, tpu.core_type = #tpu.core_type<tc>} {
    %c0 = arith.constant 0 : index
    %c0_0 = arith.constant 0 : index
    %0 = vector.load %arg0[%c0, %c0_0] : memref<64x8xf32, #tpu.memory_space<vmem>>, vector<64x8xf32>
    %c0_1 = arith.constant 0 : index
    %c0_2 = arith.constant 0 : index
    %1 = vector.load %arg1[%c0_1, %c0_2] : memref<8x256xf32, #tpu.memory_space<vmem>>, vector<8x256xf32>
    %cst = arith.constant dense<0.000000e+00> : vector<64x256xf32>
    %2 = tpu.matmul %0, %1, %cst {dimension_numbers = #tpu.dot_dimension_numbers<[1], [0], [0], [1], [0, 0, 1, 1], [], []>} : vector<64x8xf32>, vector<8x256xf32>, vector<64x256xf32> -> vector<64x256xf32>
    %c0_3 = arith.constant 0 : index
    %c0_4 = arith.constant 0 : index
    %3 = vector.load %arg3[%c0_3, %c0_4] : memref<1x256xf32, #tpu.memory_space<vmem>>, vector<1x256xf32>
    %4 = vector.broadcast %3 : vector<1x256xf32> to vector<64x256xf32>
    %5 = arith.addf %2, %4 : vector<64x256xf32>
    %cst_5 = arith.constant 0.000000e+00 : f32
    %6 = vector.broadcast %cst_5 : f32 to vector<8x32xf32>
    %cst_6 = arith.constant 0.000000e+00 : f32
    %7 = vector.broadcast %cst_6 : f32 to vector<8x32xf32>
    %cst_7 = arith.constant 0.000000e+00 : f32
    %8 = vector.broadcast %cst_7 : f32 to vector<8x32xf32>
    %cst_8 = arith.constant 0.000000e+00 : f32
    %9 = vector.broadcast %cst_8 : f32 to vector<8x32xf32>
    %10 = vector.extract_strided_slice %5 {offsets = [0, 0], sizes = [8, 128], strides = [1, 1]} : vector<64x256xf32> to vector<8x128xf32>
    %11 = vector.extract_strided_slice %5 {offsets = [56, 128], sizes = [8, 128], strides = [1, 1]} : vector<64x256xf32> to vector<8x128xf32>
    %12 = tpu.concatenate %10, %11 in 1 : vector<8x128xf32>, vector<8x128xf32> -> vector<8x256xf32>
    %13 = tpu.concatenate %6, %7 in 1 : vector<8x32xf32>, vector<8x32xf32> -> vector<8x64xf32>
    %c0_9 = arith.constant 0 : index
    %c0_10 = arith.constant 0 : index
    %14 = vector.load %arg2[%c0_9, %c0_10] : memref<64x256xf32, #tpu.memory_space<vmem>>, vector<64x256xf32>
    %cst_11 = arith.constant dense<0.000000e+00> : vector<8x256xf32>
    %15 = tpu.matmul %13, %14, %cst_11 {dimension_numbers = #tpu.dot_dimension_numbers<[1], [0], [0], [1], [0, 0, 1, 1], [], []>} : vector<8x64xf32>, vector<64x256xf32>, vector<8x256xf32> -> vector<8x256xf32>
    %16 = arith.addf %12, %15 : vector<8x256xf32>
    %17 = arith.negf %16 : vector<8x256xf32>
    %18 = math.exp %17 : vector<8x256xf32>
    %cst_12 = arith.constant 1.000000e+00 : f32
    %19 = vector.broadcast %cst_12 : f32 to vector<8x256xf32>
    %20 = arith.addf %19, %18 : vector<8x256xf32>
    %21 = arith.divf %19, %20 : vector<8x256xf32>
    %22 = vector.extract_strided_slice %21 {offsets = [0, 0], sizes = [8, 32], strides = [1, 1]} : vector<8x256xf32> to vector<8x32xf32>
    %23 = vector.extract_strided_slice %21 {offsets = [0, 32], sizes = [8, 32], strides = [1, 1]} : vector<8x256xf32> to vector<8x32xf32>
    %24 = vector.extract_strided_slice %21 {offsets = [0, 64], sizes = [8, 32], strides = [1, 1]} : vector<8x256xf32> to vector<8x32xf32>
    %cst_13 = arith.constant 2.000000e+00 : f32
    %25 = vector.broadcast %cst_13 : f32 to vector<8x32xf32>
    %26 = arith.mulf %25, %24 : vector<8x32xf32>
    %cst_14 = arith.constant 1.000000e+00 : f32
    %27 = vector.broadcast %cst_14 : f32 to vector<8x32xf32>
    %28 = arith.subf %26, %27 : vector<8x32xf32>
    %29 = vector.extract_strided_slice %21 {offsets = [0, 96], sizes = [8, 32], strides = [1, 1]} : vector<8x256xf32> to vector<8x32xf32>
    %30 = arith.mulf %23, %8 : vector<8x32xf32>
    %31 = arith.mulf %22, %28 : vector<8x32xf32>
    %32 = arith.addf %30, %31 : vector<8x32xf32>
    %33 = math.tanh %32 : vector<8x32xf32>
    %34 = arith.mulf %29, %33 : vector<8x32xf32>
    %35 = vector.extract_strided_slice %21 {offsets = [0, 128], sizes = [8, 32], strides = [1, 1]} : vector<8x256xf32> to vector<8x32xf32>
    %36 = vector.extract_strided_slice %21 {offsets = [0, 160], sizes = [8, 32], strides = [1, 1]} : vector<8x256xf32> to vector<8x32xf32>
    %37 = vector.extract_strided_slice %21 {offsets = [0, 192], sizes = [8, 32], strides = [1, 1]} : vector<8x256xf32> to vector<8x32xf32>
    %cst_15 = arith.constant 2.000000e+00 : f32
    %38 = vector.broadcast %cst_15 : f32 to vector<8x32xf32>
    %39 = arith.mulf %38, %37 : vector<8x32xf32>
    %cst_16 = arith.constant 1.000000e+00 : f32
    %40 = vector.broadcast %cst_16 : f32 to vector<8x32xf32>
    %41 = arith.subf %39, %40 : vector<8x32xf32>
    %42 = vector.extract_strided_slice %21 {offsets = [0, 224], sizes = [8, 32], strides = [1, 1]} : vector<8x256xf32> to vector<8x32xf32>
    %43 = arith.mulf %36, %9 : vector<8x32xf32>
    %44 = arith.mulf %35, %41 : vector<8x32xf32>
    %45 = arith.addf %43, %44 : vector<8x32xf32>
    %46 = math.tanh %45 : vector<8x32xf32>
    %47 = arith.mulf %42, %46 : vector<8x32xf32>
    %48 = vector.extract_strided_slice %5 {offsets = [8, 0], sizes = [8, 128], strides = [1, 1]} : vector<64x256xf32> to vector<8x128xf32>
    %49 = vector.extract_strided_slice %5 {offsets = [48, 128], sizes = [8, 128], strides = [1, 1]} : vector<64x256xf32> to vector<8x128xf32>
    %50 = tpu.concatenate %48, %49 in 1 : vector<8x128xf32>, vector<8x128xf32> -> vector<8x256xf32>
    %51 = tpu.concatenate %34, %47 in 1 : vector<8x32xf32>, vector<8x32xf32> -> vector<8x64xf32>
    %c0_17 = arith.constant 0 : index
    %c0_18 = arith.constant 0 : index
    %52 = vector.load %arg2[%c0_17, %c0_18] : memref<64x256xf32, #tpu.memory_space<vmem>>, vector<64x256xf32>
    %cst_19 = arith.constant dense<0.000000e+00> : vector<8x256xf32>
    %53 = tpu.matmul %51, %52, %cst_19 {dimension_numbers = #tpu.dot_dimension_numbers<[1], [0], [0], [1], [0, 0, 1, 1], [], []>} : vector<8x64xf32>, vector<64x256xf32>, vector<8x256xf32> -> vector<8x256xf32>
    %54 = arith.addf %50, %53 : vector<8x256xf32>
    %55 = arith.negf %54 : vector<8x256xf32>
    %56 = math.exp %55 : vector<8x256xf32>
    %cst_20 = arith.constant 1.000000e+00 : f32
    %57 = vector.broadcast %cst_20 : f32 to vector<8x256xf32>
    %58 = arith.addf %57, %56 : vector<8x256xf32>
    %59 = arith.divf %57, %58 : vector<8x256xf32>
    %60 = vector.extract_strided_slice %59 {offsets = [0, 0], sizes = [8, 32], strides = [1, 1]} : vector<8x256xf32> to vector<8x32xf32>
    %61 = vector.extract_strided_slice %59 {offsets = [0, 32], sizes = [8, 32], strides = [1, 1]} : vector<8x256xf32> to vector<8x32xf32>
    %62 = vector.extract_strided_slice %59 {offsets = [0, 64], sizes = [8, 32], strides = [1, 1]} : vector<8x256xf32> to vector<8x32xf32>
    %cst_21 = arith.constant 2.000000e+00 : f32
    %63 = vector.broadcast %cst_21 : f32 to vector<8x32xf32>
    %64 = arith.mulf %63, %62 : vector<8x32xf32>
    %cst_22 = arith.constant 1.000000e+00 : f32
    %65 = vector.broadcast %cst_22 : f32 to vector<8x32xf32>
    %66 = arith.subf %64, %65 : vector<8x32xf32>
    %67 = vector.extract_strided_slice %59 {offsets = [0, 96], sizes = [8, 32], strides = [1, 1]} : vector<8x256xf32> to vector<8x32xf32>
    %68 = arith.mulf %61, %32 : vector<8x32xf32>
    %69 = arith.mulf %60, %66 : vector<8x32xf32>
    %70 = arith.addf %68, %69 : vector<8x32xf32>
    %71 = math.tanh %70 : vector<8x32xf32>
    %72 = arith.mulf %67, %71 : vector<8x32xf32>
    %73 = vector.extract_strided_slice %59 {offsets = [0, 128], sizes = [8, 32], strides = [1, 1]} : vector<8x256xf32> to vector<8x32xf32>
    %74 = vector.extract_strided_slice %59 {offsets = [0, 160], sizes = [8, 32], strides = [1, 1]} : vector<8x256xf32> to vector<8x32xf32>
    %75 = vector.extract_strided_slice %59 {offsets = [0, 192], sizes = [8, 32], strides = [1, 1]} : vector<8x256xf32> to vector<8x32xf32>
    %cst_23 = arith.constant 2.000000e+00 : f32
    %76 = vector.broadcast %cst_23 : f32 to vector<8x32xf32>
    %77 = arith.mulf %76, %75 : vector<8x32xf32>
    %cst_24 = arith.constant 1.000000e+00 : f32
    %78 = vector.broadcast %cst_24 : f32 to vector<8x32xf32>
    %79 = arith.subf %77, %78 : vector<8x32xf32>
    %80 = vector.extract_strided_slice %59 {offsets = [0, 224], sizes = [8, 32], strides = [1, 1]} : vector<8x256xf32> to vector<8x32xf32>
    %81 = arith.mulf %74, %45 : vector<8x32xf32>
    %82 = arith.mulf %73, %79 : vector<8x32xf32>
    %83 = arith.addf %81, %82 : vector<8x32xf32>
    %84 = math.tanh %83 : vector<8x32xf32>
    %85 = arith.mulf %80, %84 : vector<8x32xf32>
    %86 = vector.extract_strided_slice %5 {offsets = [16, 0], sizes = [8, 128], strides = [1, 1]} : vector<64x256xf32> to vector<8x128xf32>
    %87 = vector.extract_strided_slice %5 {offsets = [40, 128], sizes = [8, 128], strides = [1, 1]} : vector<64x256xf32> to vector<8x128xf32>
    %88 = tpu.concatenate %86, %87 in 1 : vector<8x128xf32>, vector<8x128xf32> -> vector<8x256xf32>
    %89 = tpu.concatenate %72, %85 in 1 : vector<8x32xf32>, vector<8x32xf32> -> vector<8x64xf32>
    %c0_25 = arith.constant 0 : index
    %c0_26 = arith.constant 0 : index
    %90 = vector.load %arg2[%c0_25, %c0_26] : memref<64x256xf32, #tpu.memory_space<vmem>>, vector<64x256xf32>
    %cst_27 = arith.constant dense<0.000000e+00> : vector<8x256xf32>
    %91 = tpu.matmul %89, %90, %cst_27 {dimension_numbers = #tpu.dot_dimension_numbers<[1], [0], [0], [1], [0, 0, 1, 1], [], []>} : vector<8x64xf32>, vector<64x256xf32>, vector<8x256xf32> -> vector<8x256xf32>
    %92 = arith.addf %88, %91 : vector<8x256xf32>
    %93 = arith.negf %92 : vector<8x256xf32>
    %94 = math.exp %93 : vector<8x256xf32>
    %cst_28 = arith.constant 1.000000e+00 : f32
    %95 = vector.broadcast %cst_28 : f32 to vector<8x256xf32>
    %96 = arith.addf %95, %94 : vector<8x256xf32>
    %97 = arith.divf %95, %96 : vector<8x256xf32>
    %98 = vector.extract_strided_slice %97 {offsets = [0, 0], sizes = [8, 32], strides = [1, 1]} : vector<8x256xf32> to vector<8x32xf32>
    %99 = vector.extract_strided_slice %97 {offsets = [0, 32], sizes = [8, 32], strides = [1, 1]} : vector<8x256xf32> to vector<8x32xf32>
    %100 = vector.extract_strided_slice %97 {offsets = [0, 64], sizes = [8, 32], strides = [1, 1]} : vector<8x256xf32> to vector<8x32xf32>
    %cst_29 = arith.constant 2.000000e+00 : f32
    %101 = vector.broadcast %cst_29 : f32 to vector<8x32xf32>
    %102 = arith.mulf %101, %100 : vector<8x32xf32>
    %cst_30 = arith.constant 1.000000e+00 : f32
    %103 = vector.broadcast %cst_30 : f32 to vector<8x32xf32>
    %104 = arith.subf %102, %103 : vector<8x32xf32>
    %105 = vector.extract_strided_slice %97 {offsets = [0, 96], sizes = [8, 32], strides = [1, 1]} : vector<8x256xf32> to vector<8x32xf32>
    %106 = arith.mulf %99, %70 : vector<8x32xf32>
    %107 = arith.mulf %98, %104 : vector<8x32xf32>
    %108 = arith.addf %106, %107 : vector<8x32xf32>
    %109 = math.tanh %108 : vector<8x32xf32>
    %110 = arith.mulf %105, %109 : vector<8x32xf32>
    %111 = vector.extract_strided_slice %97 {offsets = [0, 128], sizes = [8, 32], strides = [1, 1]} : vector<8x256xf32> to vector<8x32xf32>
    %112 = vector.extract_strided_slice %97 {offsets = [0, 160], sizes = [8, 32], strides = [1, 1]} : vector<8x256xf32> to vector<8x32xf32>
    %113 = vector.extract_strided_slice %97 {offsets = [0, 192], sizes = [8, 32], strides = [1, 1]} : vector<8x256xf32> to vector<8x32xf32>
    %cst_31 = arith.constant 2.000000e+00 : f32
    %114 = vector.broadcast %cst_31 : f32 to vector<8x32xf32>
    %115 = arith.mulf %114, %113 : vector<8x32xf32>
    %cst_32 = arith.constant 1.000000e+00 : f32
    %116 = vector.broadcast %cst_32 : f32 to vector<8x32xf32>
    %117 = arith.subf %115, %116 : vector<8x32xf32>
    %118 = vector.extract_strided_slice %97 {offsets = [0, 224], sizes = [8, 32], strides = [1, 1]} : vector<8x256xf32> to vector<8x32xf32>
    %119 = arith.mulf %112, %83 : vector<8x32xf32>
    %120 = arith.mulf %111, %117 : vector<8x32xf32>
    %121 = arith.addf %119, %120 : vector<8x32xf32>
    %122 = math.tanh %121 : vector<8x32xf32>
    %123 = arith.mulf %118, %122 : vector<8x32xf32>
    %124 = vector.extract_strided_slice %5 {offsets = [24, 0], sizes = [8, 128], strides = [1, 1]} : vector<64x256xf32> to vector<8x128xf32>
    %125 = vector.extract_strided_slice %5 {offsets = [32, 128], sizes = [8, 128], strides = [1, 1]} : vector<64x256xf32> to vector<8x128xf32>
    %126 = tpu.concatenate %124, %125 in 1 : vector<8x128xf32>, vector<8x128xf32> -> vector<8x256xf32>
    %127 = tpu.concatenate %110, %123 in 1 : vector<8x32xf32>, vector<8x32xf32> -> vector<8x64xf32>
    %c0_33 = arith.constant 0 : index
    %c0_34 = arith.constant 0 : index
    %128 = vector.load %arg2[%c0_33, %c0_34] : memref<64x256xf32, #tpu.memory_space<vmem>>, vector<64x256xf32>
    %cst_35 = arith.constant dense<0.000000e+00> : vector<8x256xf32>
    %129 = tpu.matmul %127, %128, %cst_35 {dimension_numbers = #tpu.dot_dimension_numbers<[1], [0], [0], [1], [0, 0, 1, 1], [], []>} : vector<8x64xf32>, vector<64x256xf32>, vector<8x256xf32> -> vector<8x256xf32>
    %130 = arith.addf %126, %129 : vector<8x256xf32>
    %131 = arith.negf %130 : vector<8x256xf32>
    %132 = math.exp %131 : vector<8x256xf32>
    %cst_36 = arith.constant 1.000000e+00 : f32
    %133 = vector.broadcast %cst_36 : f32 to vector<8x256xf32>
    %134 = arith.addf %133, %132 : vector<8x256xf32>
    %135 = arith.divf %133, %134 : vector<8x256xf32>
    %136 = vector.extract_strided_slice %135 {offsets = [0, 0], sizes = [8, 32], strides = [1, 1]} : vector<8x256xf32> to vector<8x32xf32>
    %137 = vector.extract_strided_slice %135 {offsets = [0, 32], sizes = [8, 32], strides = [1, 1]} : vector<8x256xf32> to vector<8x32xf32>
    %138 = vector.extract_strided_slice %135 {offsets = [0, 64], sizes = [8, 32], strides = [1, 1]} : vector<8x256xf32> to vector<8x32xf32>
    %cst_37 = arith.constant 2.000000e+00 : f32
    %139 = vector.broadcast %cst_37 : f32 to vector<8x32xf32>
    %140 = arith.mulf %139, %138 : vector<8x32xf32>
    %cst_38 = arith.constant 1.000000e+00 : f32
    %141 = vector.broadcast %cst_38 : f32 to vector<8x32xf32>
    %142 = arith.subf %140, %141 : vector<8x32xf32>
    %143 = vector.extract_strided_slice %135 {offsets = [0, 96], sizes = [8, 32], strides = [1, 1]} : vector<8x256xf32> to vector<8x32xf32>
    %144 = arith.mulf %137, %108 : vector<8x32xf32>
    %145 = arith.mulf %136, %142 : vector<8x32xf32>
    %146 = arith.addf %144, %145 : vector<8x32xf32>
    %147 = math.tanh %146 : vector<8x32xf32>
    %148 = arith.mulf %143, %147 : vector<8x32xf32>
    %149 = vector.extract_strided_slice %135 {offsets = [0, 128], sizes = [8, 32], strides = [1, 1]} : vector<8x256xf32> to vector<8x32xf32>
    %150 = vector.extract_strided_slice %135 {offsets = [0, 160], sizes = [8, 32], strides = [1, 1]} : vector<8x256xf32> to vector<8x32xf32>
    %151 = vector.extract_strided_slice %135 {offsets = [0, 192], sizes = [8, 32], strides = [1, 1]} : vector<8x256xf32> to vector<8x32xf32>
    %cst_39 = arith.constant 2.000000e+00 : f32
    %152 = vector.broadcast %cst_39 : f32 to vector<8x32xf32>
    %153 = arith.mulf %152, %151 : vector<8x32xf32>
    %cst_40 = arith.constant 1.000000e+00 : f32
    %154 = vector.broadcast %cst_40 : f32 to vector<8x32xf32>
    %155 = arith.subf %153, %154 : vector<8x32xf32>
    %156 = vector.extract_strided_slice %135 {offsets = [0, 224], sizes = [8, 32], strides = [1, 1]} : vector<8x256xf32> to vector<8x32xf32>
    %157 = arith.mulf %150, %121 : vector<8x32xf32>
    %158 = arith.mulf %149, %155 : vector<8x32xf32>
    %159 = arith.addf %157, %158 : vector<8x32xf32>
    %160 = math.tanh %159 : vector<8x32xf32>
    %161 = arith.mulf %156, %160 : vector<8x32xf32>
    %162 = vector.extract_strided_slice %5 {offsets = [32, 0], sizes = [8, 128], strides = [1, 1]} : vector<64x256xf32> to vector<8x128xf32>
    %163 = vector.extract_strided_slice %5 {offsets = [24, 128], sizes = [8, 128], strides = [1, 1]} : vector<64x256xf32> to vector<8x128xf32>
    %164 = tpu.concatenate %162, %163 in 1 : vector<8x128xf32>, vector<8x128xf32> -> vector<8x256xf32>
    %165 = tpu.concatenate %148, %161 in 1 : vector<8x32xf32>, vector<8x32xf32> -> vector<8x64xf32>
    %c0_41 = arith.constant 0 : index
    %c0_42 = arith.constant 0 : index
    %166 = vector.load %arg2[%c0_41, %c0_42] : memref<64x256xf32, #tpu.memory_space<vmem>>, vector<64x256xf32>
    %cst_43 = arith.constant dense<0.000000e+00> : vector<8x256xf32>
    %167 = tpu.matmul %165, %166, %cst_43 {dimension_numbers = #tpu.dot_dimension_numbers<[1], [0], [0], [1], [0, 0, 1, 1], [], []>} : vector<8x64xf32>, vector<64x256xf32>, vector<8x256xf32> -> vector<8x256xf32>
    %168 = arith.addf %164, %167 : vector<8x256xf32>
    %169 = arith.negf %168 : vector<8x256xf32>
    %170 = math.exp %169 : vector<8x256xf32>
    %cst_44 = arith.constant 1.000000e+00 : f32
    %171 = vector.broadcast %cst_44 : f32 to vector<8x256xf32>
    %172 = arith.addf %171, %170 : vector<8x256xf32>
    %173 = arith.divf %171, %172 : vector<8x256xf32>
    %174 = vector.extract_strided_slice %173 {offsets = [0, 0], sizes = [8, 32], strides = [1, 1]} : vector<8x256xf32> to vector<8x32xf32>
    %175 = vector.extract_strided_slice %173 {offsets = [0, 32], sizes = [8, 32], strides = [1, 1]} : vector<8x256xf32> to vector<8x32xf32>
    %176 = vector.extract_strided_slice %173 {offsets = [0, 64], sizes = [8, 32], strides = [1, 1]} : vector<8x256xf32> to vector<8x32xf32>
    %cst_45 = arith.constant 2.000000e+00 : f32
    %177 = vector.broadcast %cst_45 : f32 to vector<8x32xf32>
    %178 = arith.mulf %177, %176 : vector<8x32xf32>
    %cst_46 = arith.constant 1.000000e+00 : f32
    %179 = vector.broadcast %cst_46 : f32 to vector<8x32xf32>
    %180 = arith.subf %178, %179 : vector<8x32xf32>
    %181 = vector.extract_strided_slice %173 {offsets = [0, 96], sizes = [8, 32], strides = [1, 1]} : vector<8x256xf32> to vector<8x32xf32>
    %182 = arith.mulf %175, %146 : vector<8x32xf32>
    %183 = arith.mulf %174, %180 : vector<8x32xf32>
    %184 = arith.addf %182, %183 : vector<8x32xf32>
    %185 = math.tanh %184 : vector<8x32xf32>
    %186 = arith.mulf %181, %185 : vector<8x32xf32>
    %187 = vector.extract_strided_slice %173 {offsets = [0, 128], sizes = [8, 32], strides = [1, 1]} : vector<8x256xf32> to vector<8x32xf32>
    %188 = vector.extract_strided_slice %173 {offsets = [0, 160], sizes = [8, 32], strides = [1, 1]} : vector<8x256xf32> to vector<8x32xf32>
    %189 = vector.extract_strided_slice %173 {offsets = [0, 192], sizes = [8, 32], strides = [1, 1]} : vector<8x256xf32> to vector<8x32xf32>
    %cst_47 = arith.constant 2.000000e+00 : f32
    %190 = vector.broadcast %cst_47 : f32 to vector<8x32xf32>
    %191 = arith.mulf %190, %189 : vector<8x32xf32>
    %cst_48 = arith.constant 1.000000e+00 : f32
    %192 = vector.broadcast %cst_48 : f32 to vector<8x32xf32>
    %193 = arith.subf %191, %192 : vector<8x32xf32>
    %194 = vector.extract_strided_slice %173 {offsets = [0, 224], sizes = [8, 32], strides = [1, 1]} : vector<8x256xf32> to vector<8x32xf32>
    %195 = arith.mulf %188, %159 : vector<8x32xf32>
    %196 = arith.mulf %187, %193 : vector<8x32xf32>
    %197 = arith.addf %195, %196 : vector<8x32xf32>
    %198 = math.tanh %197 : vector<8x32xf32>
    %199 = arith.mulf %194, %198 : vector<8x32xf32>
    %200 = vector.extract_strided_slice %5 {offsets = [40, 0], sizes = [8, 128], strides = [1, 1]} : vector<64x256xf32> to vector<8x128xf32>
    %201 = vector.extract_strided_slice %5 {offsets = [16, 128], sizes = [8, 128], strides = [1, 1]} : vector<64x256xf32> to vector<8x128xf32>
    %202 = tpu.concatenate %200, %201 in 1 : vector<8x128xf32>, vector<8x128xf32> -> vector<8x256xf32>
    %203 = tpu.concatenate %186, %199 in 1 : vector<8x32xf32>, vector<8x32xf32> -> vector<8x64xf32>
    %c0_49 = arith.constant 0 : index
    %c0_50 = arith.constant 0 : index
    %204 = vector.load %arg2[%c0_49, %c0_50] : memref<64x256xf32, #tpu.memory_space<vmem>>, vector<64x256xf32>
    %cst_51 = arith.constant dense<0.000000e+00> : vector<8x256xf32>
    %205 = tpu.matmul %203, %204, %cst_51 {dimension_numbers = #tpu.dot_dimension_numbers<[1], [0], [0], [1], [0, 0, 1, 1], [], []>} : vector<8x64xf32>, vector<64x256xf32>, vector<8x256xf32> -> vector<8x256xf32>
    %206 = arith.addf %202, %205 : vector<8x256xf32>
    %207 = arith.negf %206 : vector<8x256xf32>
    %208 = math.exp %207 : vector<8x256xf32>
    %cst_52 = arith.constant 1.000000e+00 : f32
    %209 = vector.broadcast %cst_52 : f32 to vector<8x256xf32>
    %210 = arith.addf %209, %208 : vector<8x256xf32>
    %211 = arith.divf %209, %210 : vector<8x256xf32>
    %212 = vector.extract_strided_slice %211 {offsets = [0, 0], sizes = [8, 32], strides = [1, 1]} : vector<8x256xf32> to vector<8x32xf32>
    %213 = vector.extract_strided_slice %211 {offsets = [0, 32], sizes = [8, 32], strides = [1, 1]} : vector<8x256xf32> to vector<8x32xf32>
    %214 = vector.extract_strided_slice %211 {offsets = [0, 64], sizes = [8, 32], strides = [1, 1]} : vector<8x256xf32> to vector<8x32xf32>
    %cst_53 = arith.constant 2.000000e+00 : f32
    %215 = vector.broadcast %cst_53 : f32 to vector<8x32xf32>
    %216 = arith.mulf %215, %214 : vector<8x32xf32>
    %cst_54 = arith.constant 1.000000e+00 : f32
    %217 = vector.broadcast %cst_54 : f32 to vector<8x32xf32>
    %218 = arith.subf %216, %217 : vector<8x32xf32>
    %219 = vector.extract_strided_slice %211 {offsets = [0, 96], sizes = [8, 32], strides = [1, 1]} : vector<8x256xf32> to vector<8x32xf32>
    %220 = arith.mulf %213, %184 : vector<8x32xf32>
    %221 = arith.mulf %212, %218 : vector<8x32xf32>
    %222 = arith.addf %220, %221 : vector<8x32xf32>
    %223 = math.tanh %222 : vector<8x32xf32>
    %224 = arith.mulf %219, %223 : vector<8x32xf32>
    %225 = vector.extract_strided_slice %211 {offsets = [0, 128], sizes = [8, 32], strides = [1, 1]} : vector<8x256xf32> to vector<8x32xf32>
    %226 = vector.extract_strided_slice %211 {offsets = [0, 160], sizes = [8, 32], strides = [1, 1]} : vector<8x256xf32> to vector<8x32xf32>
    %227 = vector.extract_strided_slice %211 {offsets = [0, 192], sizes = [8, 32], strides = [1, 1]} : vector<8x256xf32> to vector<8x32xf32>
    %cst_55 = arith.constant 2.000000e+00 : f32
    %228 = vector.broadcast %cst_55 : f32 to vector<8x32xf32>
    %229 = arith.mulf %228, %227 : vector<8x32xf32>
    %cst_56 = arith.constant 1.000000e+00 : f32
    %230 = vector.broadcast %cst_56 : f32 to vector<8x32xf32>
    %231 = arith.subf %229, %230 : vector<8x32xf32>
    %232 = vector.extract_strided_slice %211 {offsets = [0, 224], sizes = [8, 32], strides = [1, 1]} : vector<8x256xf32> to vector<8x32xf32>
    %233 = arith.mulf %226, %197 : vector<8x32xf32>
    %234 = arith.mulf %225, %231 : vector<8x32xf32>
    %235 = arith.addf %233, %234 : vector<8x32xf32>
    %236 = math.tanh %235 : vector<8x32xf32>
    %237 = arith.mulf %232, %236 : vector<8x32xf32>
    %238 = vector.extract_strided_slice %5 {offsets = [48, 0], sizes = [8, 128], strides = [1, 1]} : vector<64x256xf32> to vector<8x128xf32>
    %239 = vector.extract_strided_slice %5 {offsets = [8, 128], sizes = [8, 128], strides = [1, 1]} : vector<64x256xf32> to vector<8x128xf32>
    %240 = tpu.concatenate %238, %239 in 1 : vector<8x128xf32>, vector<8x128xf32> -> vector<8x256xf32>
    %241 = tpu.concatenate %224, %237 in 1 : vector<8x32xf32>, vector<8x32xf32> -> vector<8x64xf32>
    %c0_57 = arith.constant 0 : index
    %c0_58 = arith.constant 0 : index
    %242 = vector.load %arg2[%c0_57, %c0_58] : memref<64x256xf32, #tpu.memory_space<vmem>>, vector<64x256xf32>
    %cst_59 = arith.constant dense<0.000000e+00> : vector<8x256xf32>
    %243 = tpu.matmul %241, %242, %cst_59 {dimension_numbers = #tpu.dot_dimension_numbers<[1], [0], [0], [1], [0, 0, 1, 1], [], []>} : vector<8x64xf32>, vector<64x256xf32>, vector<8x256xf32> -> vector<8x256xf32>
    %244 = arith.addf %240, %243 : vector<8x256xf32>
    %245 = arith.negf %244 : vector<8x256xf32>
    %246 = math.exp %245 : vector<8x256xf32>
    %cst_60 = arith.constant 1.000000e+00 : f32
    %247 = vector.broadcast %cst_60 : f32 to vector<8x256xf32>
    %248 = arith.addf %247, %246 : vector<8x256xf32>
    %249 = arith.divf %247, %248 : vector<8x256xf32>
    %250 = vector.extract_strided_slice %249 {offsets = [0, 0], sizes = [8, 32], strides = [1, 1]} : vector<8x256xf32> to vector<8x32xf32>
    %251 = vector.extract_strided_slice %249 {offsets = [0, 32], sizes = [8, 32], strides = [1, 1]} : vector<8x256xf32> to vector<8x32xf32>
    %252 = vector.extract_strided_slice %249 {offsets = [0, 64], sizes = [8, 32], strides = [1, 1]} : vector<8x256xf32> to vector<8x32xf32>
    %cst_61 = arith.constant 2.000000e+00 : f32
    %253 = vector.broadcast %cst_61 : f32 to vector<8x32xf32>
    %254 = arith.mulf %253, %252 : vector<8x32xf32>
    %cst_62 = arith.constant 1.000000e+00 : f32
    %255 = vector.broadcast %cst_62 : f32 to vector<8x32xf32>
    %256 = arith.subf %254, %255 : vector<8x32xf32>
    %257 = vector.extract_strided_slice %249 {offsets = [0, 96], sizes = [8, 32], strides = [1, 1]} : vector<8x256xf32> to vector<8x32xf32>
    %258 = arith.mulf %251, %222 : vector<8x32xf32>
    %259 = arith.mulf %250, %256 : vector<8x32xf32>
    %260 = arith.addf %258, %259 : vector<8x32xf32>
    %261 = math.tanh %260 : vector<8x32xf32>
    %262 = arith.mulf %257, %261 : vector<8x32xf32>
    %263 = vector.extract_strided_slice %249 {offsets = [0, 128], sizes = [8, 32], strides = [1, 1]} : vector<8x256xf32> to vector<8x32xf32>
    %264 = vector.extract_strided_slice %249 {offsets = [0, 160], sizes = [8, 32], strides = [1, 1]} : vector<8x256xf32> to vector<8x32xf32>
    %265 = vector.extract_strided_slice %249 {offsets = [0, 192], sizes = [8, 32], strides = [1, 1]} : vector<8x256xf32> to vector<8x32xf32>
    %cst_63 = arith.constant 2.000000e+00 : f32
    %266 = vector.broadcast %cst_63 : f32 to vector<8x32xf32>
    %267 = arith.mulf %266, %265 : vector<8x32xf32>
    %cst_64 = arith.constant 1.000000e+00 : f32
    %268 = vector.broadcast %cst_64 : f32 to vector<8x32xf32>
    %269 = arith.subf %267, %268 : vector<8x32xf32>
    %270 = vector.extract_strided_slice %249 {offsets = [0, 224], sizes = [8, 32], strides = [1, 1]} : vector<8x256xf32> to vector<8x32xf32>
    %271 = arith.mulf %264, %235 : vector<8x32xf32>
    %272 = arith.mulf %263, %269 : vector<8x32xf32>
    %273 = arith.addf %271, %272 : vector<8x32xf32>
    %274 = math.tanh %273 : vector<8x32xf32>
    %275 = arith.mulf %270, %274 : vector<8x32xf32>
    %276 = vector.extract_strided_slice %5 {offsets = [56, 0], sizes = [8, 128], strides = [1, 1]} : vector<64x256xf32> to vector<8x128xf32>
    %277 = vector.extract_strided_slice %5 {offsets = [0, 128], sizes = [8, 128], strides = [1, 1]} : vector<64x256xf32> to vector<8x128xf32>
    %278 = tpu.concatenate %276, %277 in 1 : vector<8x128xf32>, vector<8x128xf32> -> vector<8x256xf32>
    %279 = tpu.concatenate %262, %275 in 1 : vector<8x32xf32>, vector<8x32xf32> -> vector<8x64xf32>
    %c0_65 = arith.constant 0 : index
    %c0_66 = arith.constant 0 : index
    %280 = vector.load %arg2[%c0_65, %c0_66] : memref<64x256xf32, #tpu.memory_space<vmem>>, vector<64x256xf32>
    %cst_67 = arith.constant dense<0.000000e+00> : vector<8x256xf32>
    %281 = tpu.matmul %279, %280, %cst_67 {dimension_numbers = #tpu.dot_dimension_numbers<[1], [0], [0], [1], [0, 0, 1, 1], [], []>} : vector<8x64xf32>, vector<64x256xf32>, vector<8x256xf32> -> vector<8x256xf32>
    %282 = arith.addf %278, %281 : vector<8x256xf32>
    %283 = arith.negf %282 : vector<8x256xf32>
    %284 = math.exp %283 : vector<8x256xf32>
    %cst_68 = arith.constant 1.000000e+00 : f32
    %285 = vector.broadcast %cst_68 : f32 to vector<8x256xf32>
    %286 = arith.addf %285, %284 : vector<8x256xf32>
    %287 = arith.divf %285, %286 : vector<8x256xf32>
    %288 = vector.extract_strided_slice %287 {offsets = [0, 0], sizes = [8, 32], strides = [1, 1]} : vector<8x256xf32> to vector<8x32xf32>
    %289 = vector.extract_strided_slice %287 {offsets = [0, 32], sizes = [8, 32], strides = [1, 1]} : vector<8x256xf32> to vector<8x32xf32>
    %290 = vector.extract_strided_slice %287 {offsets = [0, 64], sizes = [8, 32], strides = [1, 1]} : vector<8x256xf32> to vector<8x32xf32>
    %cst_69 = arith.constant 2.000000e+00 : f32
    %291 = vector.broadcast %cst_69 : f32 to vector<8x32xf32>
    %292 = arith.mulf %291, %290 : vector<8x32xf32>
    %cst_70 = arith.constant 1.000000e+00 : f32
    %293 = vector.broadcast %cst_70 : f32 to vector<8x32xf32>
    %294 = arith.subf %292, %293 : vector<8x32xf32>
    %295 = vector.extract_strided_slice %287 {offsets = [0, 96], sizes = [8, 32], strides = [1, 1]} : vector<8x256xf32> to vector<8x32xf32>
    %296 = arith.mulf %289, %260 : vector<8x32xf32>
    %297 = arith.mulf %288, %294 : vector<8x32xf32>
    %298 = arith.addf %296, %297 : vector<8x32xf32>
    %299 = math.tanh %298 : vector<8x32xf32>
    %300 = arith.mulf %295, %299 : vector<8x32xf32>
    %301 = vector.extract_strided_slice %287 {offsets = [0, 128], sizes = [8, 32], strides = [1, 1]} : vector<8x256xf32> to vector<8x32xf32>
    %302 = vector.extract_strided_slice %287 {offsets = [0, 160], sizes = [8, 32], strides = [1, 1]} : vector<8x256xf32> to vector<8x32xf32>
    %303 = vector.extract_strided_slice %287 {offsets = [0, 192], sizes = [8, 32], strides = [1, 1]} : vector<8x256xf32> to vector<8x32xf32>
    %cst_71 = arith.constant 2.000000e+00 : f32
    %304 = vector.broadcast %cst_71 : f32 to vector<8x32xf32>
    %305 = arith.mulf %304, %303 : vector<8x32xf32>
    %cst_72 = arith.constant 1.000000e+00 : f32
    %306 = vector.broadcast %cst_72 : f32 to vector<8x32xf32>
    %307 = arith.subf %305, %306 : vector<8x32xf32>
    %308 = vector.extract_strided_slice %287 {offsets = [0, 224], sizes = [8, 32], strides = [1, 1]} : vector<8x256xf32> to vector<8x32xf32>
    %309 = arith.mulf %302, %273 : vector<8x32xf32>
    %310 = arith.mulf %301, %307 : vector<8x32xf32>
    %311 = arith.addf %309, %310 : vector<8x32xf32>
    %312 = math.tanh %311 : vector<8x32xf32>
    %313 = arith.mulf %308, %312 : vector<8x32xf32>
    %314 = tpu.concatenate %34, %313 in 1 : vector<8x32xf32>, vector<8x32xf32> -> vector<8x64xf32>
    %315 = tpu.concatenate %72, %275 in 1 : vector<8x32xf32>, vector<8x32xf32> -> vector<8x64xf32>
    %316 = tpu.concatenate %110, %237 in 1 : vector<8x32xf32>, vector<8x32xf32> -> vector<8x64xf32>
    %317 = tpu.concatenate %148, %199 in 1 : vector<8x32xf32>, vector<8x32xf32> -> vector<8x64xf32>
    %318 = tpu.concatenate %186, %161 in 1 : vector<8x32xf32>, vector<8x32xf32> -> vector<8x64xf32>
    %319 = tpu.concatenate %224, %123 in 1 : vector<8x32xf32>, vector<8x32xf32> -> vector<8x64xf32>
    %320 = tpu.concatenate %262, %85 in 1 : vector<8x32xf32>, vector<8x32xf32> -> vector<8x64xf32>
    %321 = tpu.concatenate %300, %47 in 1 : vector<8x32xf32>, vector<8x32xf32> -> vector<8x64xf32>
    %322 = tpu.concatenate %314, %315, %316, %317, %318, %319, %320, %321 in 0 : vector<8x64xf32>, vector<8x64xf32>, vector<8x64xf32>, vector<8x64xf32>, vector<8x64xf32>, vector<8x64xf32>, vector<8x64xf32>, vector<8x64xf32> -> vector<64x64xf32>
    %c0_73 = arith.constant 0 : index
    %c0_74 = arith.constant 0 : index
    %323 = vector.load %arg4[%c0_73, %c0_74] : memref<64x256xf32, #tpu.memory_space<vmem>>, vector<64x256xf32>
    %cst_75 = arith.constant dense<0.000000e+00> : vector<64x256xf32>
    %324 = tpu.matmul %322, %323, %cst_75 {dimension_numbers = #tpu.dot_dimension_numbers<[1], [0], [0], [1], [0, 0, 1, 1], [], []>} : vector<64x64xf32>, vector<64x256xf32>, vector<64x256xf32> -> vector<64x256xf32>
    %c0_76 = arith.constant 0 : index
    %c0_77 = arith.constant 0 : index
    %325 = vector.load %arg6[%c0_76, %c0_77] : memref<1x256xf32, #tpu.memory_space<vmem>>, vector<1x256xf32>
    %326 = vector.broadcast %325 : vector<1x256xf32> to vector<64x256xf32>
    %327 = arith.addf %324, %326 : vector<64x256xf32>
    %cst_78 = arith.constant 0.000000e+00 : f32
    %328 = vector.broadcast %cst_78 : f32 to vector<8x32xf32>
    %cst_79 = arith.constant 0.000000e+00 : f32
    %329 = vector.broadcast %cst_79 : f32 to vector<8x32xf32>
    %cst_80 = arith.constant 0.000000e+00 : f32
    %330 = vector.broadcast %cst_80 : f32 to vector<8x32xf32>
    %cst_81 = arith.constant 0.000000e+00 : f32
    %331 = vector.broadcast %cst_81 : f32 to vector<8x32xf32>
    %332 = vector.extract_strided_slice %327 {offsets = [0, 0], sizes = [8, 128], strides = [1, 1]} : vector<64x256xf32> to vector<8x128xf32>
    %333 = vector.extract_strided_slice %327 {offsets = [56, 128], sizes = [8, 128], strides = [1, 1]} : vector<64x256xf32> to vector<8x128xf32>
    %334 = tpu.concatenate %332, %333 in 1 : vector<8x128xf32>, vector<8x128xf32> -> vector<8x256xf32>
    %335 = tpu.concatenate %328, %329 in 1 : vector<8x32xf32>, vector<8x32xf32> -> vector<8x64xf32>
    %c0_82 = arith.constant 0 : index
    %c0_83 = arith.constant 0 : index
    %336 = vector.load %arg5[%c0_82, %c0_83] : memref<64x256xf32, #tpu.memory_space<vmem>>, vector<64x256xf32>
    %cst_84 = arith.constant dense<0.000000e+00> : vector<8x256xf32>
    %337 = tpu.matmul %335, %336, %cst_84 {dimension_numbers = #tpu.dot_dimension_numbers<[1], [0], [0], [1], [0, 0, 1, 1], [], []>} : vector<8x64xf32>, vector<64x256xf32>, vector<8x256xf32> -> vector<8x256xf32>
    %338 = arith.addf %334, %337 : vector<8x256xf32>
    %339 = arith.negf %338 : vector<8x256xf32>
    %340 = math.exp %339 : vector<8x256xf32>
    %cst_85 = arith.constant 1.000000e+00 : f32
    %341 = vector.broadcast %cst_85 : f32 to vector<8x256xf32>
    %342 = arith.addf %341, %340 : vector<8x256xf32>
    %343 = arith.divf %341, %342 : vector<8x256xf32>
    %344 = vector.extract_strided_slice %343 {offsets = [0, 0], sizes = [8, 32], strides = [1, 1]} : vector<8x256xf32> to vector<8x32xf32>
    %345 = vector.extract_strided_slice %343 {offsets = [0, 32], sizes = [8, 32], strides = [1, 1]} : vector<8x256xf32> to vector<8x32xf32>
    %346 = vector.extract_strided_slice %343 {offsets = [0, 64], sizes = [8, 32], strides = [1, 1]} : vector<8x256xf32> to vector<8x32xf32>
    %cst_86 = arith.constant 2.000000e+00 : f32
    %347 = vector.broadcast %cst_86 : f32 to vector<8x32xf32>
    %348 = arith.mulf %347, %346 : vector<8x32xf32>
    %cst_87 = arith.constant 1.000000e+00 : f32
    %349 = vector.broadcast %cst_87 : f32 to vector<8x32xf32>
    %350 = arith.subf %348, %349 : vector<8x32xf32>
    %351 = vector.extract_strided_slice %343 {offsets = [0, 96], sizes = [8, 32], strides = [1, 1]} : vector<8x256xf32> to vector<8x32xf32>
    %352 = arith.mulf %345, %330 : vector<8x32xf32>
    %353 = arith.mulf %344, %350 : vector<8x32xf32>
    %354 = arith.addf %352, %353 : vector<8x32xf32>
    %355 = math.tanh %354 : vector<8x32xf32>
    %356 = arith.mulf %351, %355 : vector<8x32xf32>
    %357 = vector.extract_strided_slice %343 {offsets = [0, 128], sizes = [8, 32], strides = [1, 1]} : vector<8x256xf32> to vector<8x32xf32>
    %358 = vector.extract_strided_slice %343 {offsets = [0, 160], sizes = [8, 32], strides = [1, 1]} : vector<8x256xf32> to vector<8x32xf32>
    %359 = vector.extract_strided_slice %343 {offsets = [0, 192], sizes = [8, 32], strides = [1, 1]} : vector<8x256xf32> to vector<8x32xf32>
    %cst_88 = arith.constant 2.000000e+00 : f32
    %360 = vector.broadcast %cst_88 : f32 to vector<8x32xf32>
    %361 = arith.mulf %360, %359 : vector<8x32xf32>
    %cst_89 = arith.constant 1.000000e+00 : f32
    %362 = vector.broadcast %cst_89 : f32 to vector<8x32xf32>
    %363 = arith.subf %361, %362 : vector<8x32xf32>
    %364 = vector.extract_strided_slice %343 {offsets = [0, 224], sizes = [8, 32], strides = [1, 1]} : vector<8x256xf32> to vector<8x32xf32>
    %365 = arith.mulf %358, %331 : vector<8x32xf32>
    %366 = arith.mulf %357, %363 : vector<8x32xf32>
    %367 = arith.addf %365, %366 : vector<8x32xf32>
    %368 = math.tanh %367 : vector<8x32xf32>
    %369 = arith.mulf %364, %368 : vector<8x32xf32>
    %370 = vector.extract_strided_slice %327 {offsets = [8, 0], sizes = [8, 128], strides = [1, 1]} : vector<64x256xf32> to vector<8x128xf32>
    %371 = vector.extract_strided_slice %327 {offsets = [48, 128], sizes = [8, 128], strides = [1, 1]} : vector<64x256xf32> to vector<8x128xf32>
    %372 = tpu.concatenate %370, %371 in 1 : vector<8x128xf32>, vector<8x128xf32> -> vector<8x256xf32>
    %373 = tpu.concatenate %356, %369 in 1 : vector<8x32xf32>, vector<8x32xf32> -> vector<8x64xf32>
    %c0_90 = arith.constant 0 : index
    %c0_91 = arith.constant 0 : index
    %374 = vector.load %arg5[%c0_90, %c0_91] : memref<64x256xf32, #tpu.memory_space<vmem>>, vector<64x256xf32>
    %cst_92 = arith.constant dense<0.000000e+00> : vector<8x256xf32>
    %375 = tpu.matmul %373, %374, %cst_92 {dimension_numbers = #tpu.dot_dimension_numbers<[1], [0], [0], [1], [0, 0, 1, 1], [], []>} : vector<8x64xf32>, vector<64x256xf32>, vector<8x256xf32> -> vector<8x256xf32>
    %376 = arith.addf %372, %375 : vector<8x256xf32>
    %377 = arith.negf %376 : vector<8x256xf32>
    %378 = math.exp %377 : vector<8x256xf32>
    %cst_93 = arith.constant 1.000000e+00 : f32
    %379 = vector.broadcast %cst_93 : f32 to vector<8x256xf32>
    %380 = arith.addf %379, %378 : vector<8x256xf32>
    %381 = arith.divf %379, %380 : vector<8x256xf32>
    %382 = vector.extract_strided_slice %381 {offsets = [0, 0], sizes = [8, 32], strides = [1, 1]} : vector<8x256xf32> to vector<8x32xf32>
    %383 = vector.extract_strided_slice %381 {offsets = [0, 32], sizes = [8, 32], strides = [1, 1]} : vector<8x256xf32> to vector<8x32xf32>
    %384 = vector.extract_strided_slice %381 {offsets = [0, 64], sizes = [8, 32], strides = [1, 1]} : vector<8x256xf32> to vector<8x32xf32>
    %cst_94 = arith.constant 2.000000e+00 : f32
    %385 = vector.broadcast %cst_94 : f32 to vector<8x32xf32>
    %386 = arith.mulf %385, %384 : vector<8x32xf32>
    %cst_95 = arith.constant 1.000000e+00 : f32
    %387 = vector.broadcast %cst_95 : f32 to vector<8x32xf32>
    %388 = arith.subf %386, %387 : vector<8x32xf32>
    %389 = vector.extract_strided_slice %381 {offsets = [0, 96], sizes = [8, 32], strides = [1, 1]} : vector<8x256xf32> to vector<8x32xf32>
    %390 = arith.mulf %383, %354 : vector<8x32xf32>
    %391 = arith.mulf %382, %388 : vector<8x32xf32>
    %392 = arith.addf %390, %391 : vector<8x32xf32>
    %393 = math.tanh %392 : vector<8x32xf32>
    %394 = arith.mulf %389, %393 : vector<8x32xf32>
    %395 = vector.extract_strided_slice %381 {offsets = [0, 128], sizes = [8, 32], strides = [1, 1]} : vector<8x256xf32> to vector<8x32xf32>
    %396 = vector.extract_strided_slice %381 {offsets = [0, 160], sizes = [8, 32], strides = [1, 1]} : vector<8x256xf32> to vector<8x32xf32>
    %397 = vector.extract_strided_slice %381 {offsets = [0, 192], sizes = [8, 32], strides = [1, 1]} : vector<8x256xf32> to vector<8x32xf32>
    %cst_96 = arith.constant 2.000000e+00 : f32
    %398 = vector.broadcast %cst_96 : f32 to vector<8x32xf32>
    %399 = arith.mulf %398, %397 : vector<8x32xf32>
    %cst_97 = arith.constant 1.000000e+00 : f32
    %400 = vector.broadcast %cst_97 : f32 to vector<8x32xf32>
    %401 = arith.subf %399, %400 : vector<8x32xf32>
    %402 = vector.extract_strided_slice %381 {offsets = [0, 224], sizes = [8, 32], strides = [1, 1]} : vector<8x256xf32> to vector<8x32xf32>
    %403 = arith.mulf %396, %367 : vector<8x32xf32>
    %404 = arith.mulf %395, %401 : vector<8x32xf32>
    %405 = arith.addf %403, %404 : vector<8x32xf32>
    %406 = math.tanh %405 : vector<8x32xf32>
    %407 = arith.mulf %402, %406 : vector<8x32xf32>
    %408 = vector.extract_strided_slice %327 {offsets = [16, 0], sizes = [8, 128], strides = [1, 1]} : vector<64x256xf32> to vector<8x128xf32>
    %409 = vector.extract_strided_slice %327 {offsets = [40, 128], sizes = [8, 128], strides = [1, 1]} : vector<64x256xf32> to vector<8x128xf32>
    %410 = tpu.concatenate %408, %409 in 1 : vector<8x128xf32>, vector<8x128xf32> -> vector<8x256xf32>
    %411 = tpu.concatenate %394, %407 in 1 : vector<8x32xf32>, vector<8x32xf32> -> vector<8x64xf32>
    %c0_98 = arith.constant 0 : index
    %c0_99 = arith.constant 0 : index
    %412 = vector.load %arg5[%c0_98, %c0_99] : memref<64x256xf32, #tpu.memory_space<vmem>>, vector<64x256xf32>
    %cst_100 = arith.constant dense<0.000000e+00> : vector<8x256xf32>
    %413 = tpu.matmul %411, %412, %cst_100 {dimension_numbers = #tpu.dot_dimension_numbers<[1], [0], [0], [1], [0, 0, 1, 1], [], []>} : vector<8x64xf32>, vector<64x256xf32>, vector<8x256xf32> -> vector<8x256xf32>
    %414 = arith.addf %410, %413 : vector<8x256xf32>
    %415 = arith.negf %414 : vector<8x256xf32>
    %416 = math.exp %415 : vector<8x256xf32>
    %cst_101 = arith.constant 1.000000e+00 : f32
    %417 = vector.broadcast %cst_101 : f32 to vector<8x256xf32>
    %418 = arith.addf %417, %416 : vector<8x256xf32>
    %419 = arith.divf %417, %418 : vector<8x256xf32>
    %420 = vector.extract_strided_slice %419 {offsets = [0, 0], sizes = [8, 32], strides = [1, 1]} : vector<8x256xf32> to vector<8x32xf32>
    %421 = vector.extract_strided_slice %419 {offsets = [0, 32], sizes = [8, 32], strides = [1, 1]} : vector<8x256xf32> to vector<8x32xf32>
    %422 = vector.extract_strided_slice %419 {offsets = [0, 64], sizes = [8, 32], strides = [1, 1]} : vector<8x256xf32> to vector<8x32xf32>
    %cst_102 = arith.constant 2.000000e+00 : f32
    %423 = vector.broadcast %cst_102 : f32 to vector<8x32xf32>
    %424 = arith.mulf %423, %422 : vector<8x32xf32>
    %cst_103 = arith.constant 1.000000e+00 : f32
    %425 = vector.broadcast %cst_103 : f32 to vector<8x32xf32>
    %426 = arith.subf %424, %425 : vector<8x32xf32>
    %427 = vector.extract_strided_slice %419 {offsets = [0, 96], sizes = [8, 32], strides = [1, 1]} : vector<8x256xf32> to vector<8x32xf32>
    %428 = arith.mulf %421, %392 : vector<8x32xf32>
    %429 = arith.mulf %420, %426 : vector<8x32xf32>
    %430 = arith.addf %428, %429 : vector<8x32xf32>
    %431 = math.tanh %430 : vector<8x32xf32>
    %432 = arith.mulf %427, %431 : vector<8x32xf32>
    %433 = vector.extract_strided_slice %419 {offsets = [0, 128], sizes = [8, 32], strides = [1, 1]} : vector<8x256xf32> to vector<8x32xf32>
    %434 = vector.extract_strided_slice %419 {offsets = [0, 160], sizes = [8, 32], strides = [1, 1]} : vector<8x256xf32> to vector<8x32xf32>
    %435 = vector.extract_strided_slice %419 {offsets = [0, 192], sizes = [8, 32], strides = [1, 1]} : vector<8x256xf32> to vector<8x32xf32>
    %cst_104 = arith.constant 2.000000e+00 : f32
    %436 = vector.broadcast %cst_104 : f32 to vector<8x32xf32>
    %437 = arith.mulf %436, %435 : vector<8x32xf32>
    %cst_105 = arith.constant 1.000000e+00 : f32
    %438 = vector.broadcast %cst_105 : f32 to vector<8x32xf32>
    %439 = arith.subf %437, %438 : vector<8x32xf32>
    %440 = vector.extract_strided_slice %419 {offsets = [0, 224], sizes = [8, 32], strides = [1, 1]} : vector<8x256xf32> to vector<8x32xf32>
    %441 = arith.mulf %434, %405 : vector<8x32xf32>
    %442 = arith.mulf %433, %439 : vector<8x32xf32>
    %443 = arith.addf %441, %442 : vector<8x32xf32>
    %444 = math.tanh %443 : vector<8x32xf32>
    %445 = arith.mulf %440, %444 : vector<8x32xf32>
    %446 = vector.extract_strided_slice %327 {offsets = [24, 0], sizes = [8, 128], strides = [1, 1]} : vector<64x256xf32> to vector<8x128xf32>
    %447 = vector.extract_strided_slice %327 {offsets = [32, 128], sizes = [8, 128], strides = [1, 1]} : vector<64x256xf32> to vector<8x128xf32>
    %448 = tpu.concatenate %446, %447 in 1 : vector<8x128xf32>, vector<8x128xf32> -> vector<8x256xf32>
    %449 = tpu.concatenate %432, %445 in 1 : vector<8x32xf32>, vector<8x32xf32> -> vector<8x64xf32>
    %c0_106 = arith.constant 0 : index
    %c0_107 = arith.constant 0 : index
    %450 = vector.load %arg5[%c0_106, %c0_107] : memref<64x256xf32, #tpu.memory_space<vmem>>, vector<64x256xf32>
    %cst_108 = arith.constant dense<0.000000e+00> : vector<8x256xf32>
    %451 = tpu.matmul %449, %450, %cst_108 {dimension_numbers = #tpu.dot_dimension_numbers<[1], [0], [0], [1], [0, 0, 1, 1], [], []>} : vector<8x64xf32>, vector<64x256xf32>, vector<8x256xf32> -> vector<8x256xf32>
    %452 = arith.addf %448, %451 : vector<8x256xf32>
    %453 = arith.negf %452 : vector<8x256xf32>
    %454 = math.exp %453 : vector<8x256xf32>
    %cst_109 = arith.constant 1.000000e+00 : f32
    %455 = vector.broadcast %cst_109 : f32 to vector<8x256xf32>
    %456 = arith.addf %455, %454 : vector<8x256xf32>
    %457 = arith.divf %455, %456 : vector<8x256xf32>
    %458 = vector.extract_strided_slice %457 {offsets = [0, 0], sizes = [8, 32], strides = [1, 1]} : vector<8x256xf32> to vector<8x32xf32>
    %459 = vector.extract_strided_slice %457 {offsets = [0, 32], sizes = [8, 32], strides = [1, 1]} : vector<8x256xf32> to vector<8x32xf32>
    %460 = vector.extract_strided_slice %457 {offsets = [0, 64], sizes = [8, 32], strides = [1, 1]} : vector<8x256xf32> to vector<8x32xf32>
    %cst_110 = arith.constant 2.000000e+00 : f32
    %461 = vector.broadcast %cst_110 : f32 to vector<8x32xf32>
    %462 = arith.mulf %461, %460 : vector<8x32xf32>
    %cst_111 = arith.constant 1.000000e+00 : f32
    %463 = vector.broadcast %cst_111 : f32 to vector<8x32xf32>
    %464 = arith.subf %462, %463 : vector<8x32xf32>
    %465 = vector.extract_strided_slice %457 {offsets = [0, 96], sizes = [8, 32], strides = [1, 1]} : vector<8x256xf32> to vector<8x32xf32>
    %466 = arith.mulf %459, %430 : vector<8x32xf32>
    %467 = arith.mulf %458, %464 : vector<8x32xf32>
    %468 = arith.addf %466, %467 : vector<8x32xf32>
    %469 = math.tanh %468 : vector<8x32xf32>
    %470 = arith.mulf %465, %469 : vector<8x32xf32>
    %471 = vector.extract_strided_slice %457 {offsets = [0, 128], sizes = [8, 32], strides = [1, 1]} : vector<8x256xf32> to vector<8x32xf32>
    %472 = vector.extract_strided_slice %457 {offsets = [0, 160], sizes = [8, 32], strides = [1, 1]} : vector<8x256xf32> to vector<8x32xf32>
    %473 = vector.extract_strided_slice %457 {offsets = [0, 192], sizes = [8, 32], strides = [1, 1]} : vector<8x256xf32> to vector<8x32xf32>
    %cst_112 = arith.constant 2.000000e+00 : f32
    %474 = vector.broadcast %cst_112 : f32 to vector<8x32xf32>
    %475 = arith.mulf %474, %473 : vector<8x32xf32>
    %cst_113 = arith.constant 1.000000e+00 : f32
    %476 = vector.broadcast %cst_113 : f32 to vector<8x32xf32>
    %477 = arith.subf %475, %476 : vector<8x32xf32>
    %478 = vector.extract_strided_slice %457 {offsets = [0, 224], sizes = [8, 32], strides = [1, 1]} : vector<8x256xf32> to vector<8x32xf32>
    %479 = arith.mulf %472, %443 : vector<8x32xf32>
    %480 = arith.mulf %471, %477 : vector<8x32xf32>
    %481 = arith.addf %479, %480 : vector<8x32xf32>
    %482 = math.tanh %481 : vector<8x32xf32>
    %483 = arith.mulf %478, %482 : vector<8x32xf32>
    %484 = vector.extract_strided_slice %327 {offsets = [32, 0], sizes = [8, 128], strides = [1, 1]} : vector<64x256xf32> to vector<8x128xf32>
    %485 = vector.extract_strided_slice %327 {offsets = [24, 128], sizes = [8, 128], strides = [1, 1]} : vector<64x256xf32> to vector<8x128xf32>
    %486 = tpu.concatenate %484, %485 in 1 : vector<8x128xf32>, vector<8x128xf32> -> vector<8x256xf32>
    %487 = tpu.concatenate %470, %483 in 1 : vector<8x32xf32>, vector<8x32xf32> -> vector<8x64xf32>
    %c0_114 = arith.constant 0 : index
    %c0_115 = arith.constant 0 : index
    %488 = vector.load %arg5[%c0_114, %c0_115] : memref<64x256xf32, #tpu.memory_space<vmem>>, vector<64x256xf32>
    %cst_116 = arith.constant dense<0.000000e+00> : vector<8x256xf32>
    %489 = tpu.matmul %487, %488, %cst_116 {dimension_numbers = #tpu.dot_dimension_numbers<[1], [0], [0], [1], [0, 0, 1, 1], [], []>} : vector<8x64xf32>, vector<64x256xf32>, vector<8x256xf32> -> vector<8x256xf32>
    %490 = arith.addf %486, %489 : vector<8x256xf32>
    %491 = arith.negf %490 : vector<8x256xf32>
    %492 = math.exp %491 : vector<8x256xf32>
    %cst_117 = arith.constant 1.000000e+00 : f32
    %493 = vector.broadcast %cst_117 : f32 to vector<8x256xf32>
    %494 = arith.addf %493, %492 : vector<8x256xf32>
    %495 = arith.divf %493, %494 : vector<8x256xf32>
    %496 = vector.extract_strided_slice %495 {offsets = [0, 0], sizes = [8, 32], strides = [1, 1]} : vector<8x256xf32> to vector<8x32xf32>
    %497 = vector.extract_strided_slice %495 {offsets = [0, 32], sizes = [8, 32], strides = [1, 1]} : vector<8x256xf32> to vector<8x32xf32>
    %498 = vector.extract_strided_slice %495 {offsets = [0, 64], sizes = [8, 32], strides = [1, 1]} : vector<8x256xf32> to vector<8x32xf32>
    %cst_118 = arith.constant 2.000000e+00 : f32
    %499 = vector.broadcast %cst_118 : f32 to vector<8x32xf32>
    %500 = arith.mulf %499, %498 : vector<8x32xf32>
    %cst_119 = arith.constant 1.000000e+00 : f32
    %501 = vector.broadcast %cst_119 : f32 to vector<8x32xf32>
    %502 = arith.subf %500, %501 : vector<8x32xf32>
    %503 = vector.extract_strided_slice %495 {offsets = [0, 96], sizes = [8, 32], strides = [1, 1]} : vector<8x256xf32> to vector<8x32xf32>
    %504 = arith.mulf %497, %468 : vector<8x32xf32>
    %505 = arith.mulf %496, %502 : vector<8x32xf32>
    %506 = arith.addf %504, %505 : vector<8x32xf32>
    %507 = math.tanh %506 : vector<8x32xf32>
    %508 = arith.mulf %503, %507 : vector<8x32xf32>
    %509 = vector.extract_strided_slice %495 {offsets = [0, 128], sizes = [8, 32], strides = [1, 1]} : vector<8x256xf32> to vector<8x32xf32>
    %510 = vector.extract_strided_slice %495 {offsets = [0, 160], sizes = [8, 32], strides = [1, 1]} : vector<8x256xf32> to vector<8x32xf32>
    %511 = vector.extract_strided_slice %495 {offsets = [0, 192], sizes = [8, 32], strides = [1, 1]} : vector<8x256xf32> to vector<8x32xf32>
    %cst_120 = arith.constant 2.000000e+00 : f32
    %512 = vector.broadcast %cst_120 : f32 to vector<8x32xf32>
    %513 = arith.mulf %512, %511 : vector<8x32xf32>
    %cst_121 = arith.constant 1.000000e+00 : f32
    %514 = vector.broadcast %cst_121 : f32 to vector<8x32xf32>
    %515 = arith.subf %513, %514 : vector<8x32xf32>
    %516 = vector.extract_strided_slice %495 {offsets = [0, 224], sizes = [8, 32], strides = [1, 1]} : vector<8x256xf32> to vector<8x32xf32>
    %517 = arith.mulf %510, %481 : vector<8x32xf32>
    %518 = arith.mulf %509, %515 : vector<8x32xf32>
    %519 = arith.addf %517, %518 : vector<8x32xf32>
    %520 = math.tanh %519 : vector<8x32xf32>
    %521 = arith.mulf %516, %520 : vector<8x32xf32>
    %522 = vector.extract_strided_slice %327 {offsets = [40, 0], sizes = [8, 128], strides = [1, 1]} : vector<64x256xf32> to vector<8x128xf32>
    %523 = vector.extract_strided_slice %327 {offsets = [16, 128], sizes = [8, 128], strides = [1, 1]} : vector<64x256xf32> to vector<8x128xf32>
    %524 = tpu.concatenate %522, %523 in 1 : vector<8x128xf32>, vector<8x128xf32> -> vector<8x256xf32>
    %525 = tpu.concatenate %508, %521 in 1 : vector<8x32xf32>, vector<8x32xf32> -> vector<8x64xf32>
    %c0_122 = arith.constant 0 : index
    %c0_123 = arith.constant 0 : index
    %526 = vector.load %arg5[%c0_122, %c0_123] : memref<64x256xf32, #tpu.memory_space<vmem>>, vector<64x256xf32>
    %cst_124 = arith.constant dense<0.000000e+00> : vector<8x256xf32>
    %527 = tpu.matmul %525, %526, %cst_124 {dimension_numbers = #tpu.dot_dimension_numbers<[1], [0], [0], [1], [0, 0, 1, 1], [], []>} : vector<8x64xf32>, vector<64x256xf32>, vector<8x256xf32> -> vector<8x256xf32>
    %528 = arith.addf %524, %527 : vector<8x256xf32>
    %529 = arith.negf %528 : vector<8x256xf32>
    %530 = math.exp %529 : vector<8x256xf32>
    %cst_125 = arith.constant 1.000000e+00 : f32
    %531 = vector.broadcast %cst_125 : f32 to vector<8x256xf32>
    %532 = arith.addf %531, %530 : vector<8x256xf32>
    %533 = arith.divf %531, %532 : vector<8x256xf32>
    %534 = vector.extract_strided_slice %533 {offsets = [0, 0], sizes = [8, 32], strides = [1, 1]} : vector<8x256xf32> to vector<8x32xf32>
    %535 = vector.extract_strided_slice %533 {offsets = [0, 32], sizes = [8, 32], strides = [1, 1]} : vector<8x256xf32> to vector<8x32xf32>
    %536 = vector.extract_strided_slice %533 {offsets = [0, 64], sizes = [8, 32], strides = [1, 1]} : vector<8x256xf32> to vector<8x32xf32>
    %cst_126 = arith.constant 2.000000e+00 : f32
    %537 = vector.broadcast %cst_126 : f32 to vector<8x32xf32>
    %538 = arith.mulf %537, %536 : vector<8x32xf32>
    %cst_127 = arith.constant 1.000000e+00 : f32
    %539 = vector.broadcast %cst_127 : f32 to vector<8x32xf32>
    %540 = arith.subf %538, %539 : vector<8x32xf32>
    %541 = vector.extract_strided_slice %533 {offsets = [0, 96], sizes = [8, 32], strides = [1, 1]} : vector<8x256xf32> to vector<8x32xf32>
    %542 = arith.mulf %535, %506 : vector<8x32xf32>
    %543 = arith.mulf %534, %540 : vector<8x32xf32>
    %544 = arith.addf %542, %543 : vector<8x32xf32>
    %545 = math.tanh %544 : vector<8x32xf32>
    %546 = arith.mulf %541, %545 : vector<8x32xf32>
    %547 = vector.extract_strided_slice %533 {offsets = [0, 128], sizes = [8, 32], strides = [1, 1]} : vector<8x256xf32> to vector<8x32xf32>
    %548 = vector.extract_strided_slice %533 {offsets = [0, 160], sizes = [8, 32], strides = [1, 1]} : vector<8x256xf32> to vector<8x32xf32>
    %549 = vector.extract_strided_slice %533 {offsets = [0, 192], sizes = [8, 32], strides = [1, 1]} : vector<8x256xf32> to vector<8x32xf32>
    %cst_128 = arith.constant 2.000000e+00 : f32
    %550 = vector.broadcast %cst_128 : f32 to vector<8x32xf32>
    %551 = arith.mulf %550, %549 : vector<8x32xf32>
    %cst_129 = arith.constant 1.000000e+00 : f32
    %552 = vector.broadcast %cst_129 : f32 to vector<8x32xf32>
    %553 = arith.subf %551, %552 : vector<8x32xf32>
    %554 = vector.extract_strided_slice %533 {offsets = [0, 224], sizes = [8, 32], strides = [1, 1]} : vector<8x256xf32> to vector<8x32xf32>
    %555 = arith.mulf %548, %519 : vector<8x32xf32>
    %556 = arith.mulf %547, %553 : vector<8x32xf32>
    %557 = arith.addf %555, %556 : vector<8x32xf32>
    %558 = math.tanh %557 : vector<8x32xf32>
    %559 = arith.mulf %554, %558 : vector<8x32xf32>
    %560 = vector.extract_strided_slice %327 {offsets = [48, 0], sizes = [8, 128], strides = [1, 1]} : vector<64x256xf32> to vector<8x128xf32>
    %561 = vector.extract_strided_slice %327 {offsets = [8, 128], sizes = [8, 128], strides = [1, 1]} : vector<64x256xf32> to vector<8x128xf32>
    %562 = tpu.concatenate %560, %561 in 1 : vector<8x128xf32>, vector<8x128xf32> -> vector<8x256xf32>
    %563 = tpu.concatenate %546, %559 in 1 : vector<8x32xf32>, vector<8x32xf32> -> vector<8x64xf32>
    %c0_130 = arith.constant 0 : index
    %c0_131 = arith.constant 0 : index
    %564 = vector.load %arg5[%c0_130, %c0_131] : memref<64x256xf32, #tpu.memory_space<vmem>>, vector<64x256xf32>
    %cst_132 = arith.constant dense<0.000000e+00> : vector<8x256xf32>
    %565 = tpu.matmul %563, %564, %cst_132 {dimension_numbers = #tpu.dot_dimension_numbers<[1], [0], [0], [1], [0, 0, 1, 1], [], []>} : vector<8x64xf32>, vector<64x256xf32>, vector<8x256xf32> -> vector<8x256xf32>
    %566 = arith.addf %562, %565 : vector<8x256xf32>
    %567 = arith.negf %566 : vector<8x256xf32>
    %568 = math.exp %567 : vector<8x256xf32>
    %cst_133 = arith.constant 1.000000e+00 : f32
    %569 = vector.broadcast %cst_133 : f32 to vector<8x256xf32>
    %570 = arith.addf %569, %568 : vector<8x256xf32>
    %571 = arith.divf %569, %570 : vector<8x256xf32>
    %572 = vector.extract_strided_slice %571 {offsets = [0, 0], sizes = [8, 32], strides = [1, 1]} : vector<8x256xf32> to vector<8x32xf32>
    %573 = vector.extract_strided_slice %571 {offsets = [0, 32], sizes = [8, 32], strides = [1, 1]} : vector<8x256xf32> to vector<8x32xf32>
    %574 = vector.extract_strided_slice %571 {offsets = [0, 64], sizes = [8, 32], strides = [1, 1]} : vector<8x256xf32> to vector<8x32xf32>
    %cst_134 = arith.constant 2.000000e+00 : f32
    %575 = vector.broadcast %cst_134 : f32 to vector<8x32xf32>
    %576 = arith.mulf %575, %574 : vector<8x32xf32>
    %cst_135 = arith.constant 1.000000e+00 : f32
    %577 = vector.broadcast %cst_135 : f32 to vector<8x32xf32>
    %578 = arith.subf %576, %577 : vector<8x32xf32>
    %579 = vector.extract_strided_slice %571 {offsets = [0, 96], sizes = [8, 32], strides = [1, 1]} : vector<8x256xf32> to vector<8x32xf32>
    %580 = arith.mulf %573, %544 : vector<8x32xf32>
    %581 = arith.mulf %572, %578 : vector<8x32xf32>
    %582 = arith.addf %580, %581 : vector<8x32xf32>
    %583 = math.tanh %582 : vector<8x32xf32>
    %584 = arith.mulf %579, %583 : vector<8x32xf32>
    %585 = vector.extract_strided_slice %571 {offsets = [0, 128], sizes = [8, 32], strides = [1, 1]} : vector<8x256xf32> to vector<8x32xf32>
    %586 = vector.extract_strided_slice %571 {offsets = [0, 160], sizes = [8, 32], strides = [1, 1]} : vector<8x256xf32> to vector<8x32xf32>
    %587 = vector.extract_strided_slice %571 {offsets = [0, 192], sizes = [8, 32], strides = [1, 1]} : vector<8x256xf32> to vector<8x32xf32>
    %cst_136 = arith.constant 2.000000e+00 : f32
    %588 = vector.broadcast %cst_136 : f32 to vector<8x32xf32>
    %589 = arith.mulf %588, %587 : vector<8x32xf32>
    %cst_137 = arith.constant 1.000000e+00 : f32
    %590 = vector.broadcast %cst_137 : f32 to vector<8x32xf32>
    %591 = arith.subf %589, %590 : vector<8x32xf32>
    %592 = vector.extract_strided_slice %571 {offsets = [0, 224], sizes = [8, 32], strides = [1, 1]} : vector<8x256xf32> to vector<8x32xf32>
    %593 = arith.mulf %586, %557 : vector<8x32xf32>
    %594 = arith.mulf %585, %591 : vector<8x32xf32>
    %595 = arith.addf %593, %594 : vector<8x32xf32>
    %596 = math.tanh %595 : vector<8x32xf32>
    %597 = arith.mulf %592, %596 : vector<8x32xf32>
    %598 = vector.extract_strided_slice %327 {offsets = [56, 0], sizes = [8, 128], strides = [1, 1]} : vector<64x256xf32> to vector<8x128xf32>
    %599 = vector.extract_strided_slice %327 {offsets = [0, 128], sizes = [8, 128], strides = [1, 1]} : vector<64x256xf32> to vector<8x128xf32>
    %600 = tpu.concatenate %598, %599 in 1 : vector<8x128xf32>, vector<8x128xf32> -> vector<8x256xf32>
    %601 = tpu.concatenate %584, %597 in 1 : vector<8x32xf32>, vector<8x32xf32> -> vector<8x64xf32>
    %c0_138 = arith.constant 0 : index
    %c0_139 = arith.constant 0 : index
    %602 = vector.load %arg5[%c0_138, %c0_139] : memref<64x256xf32, #tpu.memory_space<vmem>>, vector<64x256xf32>
    %cst_140 = arith.constant dense<0.000000e+00> : vector<8x256xf32>
    %603 = tpu.matmul %601, %602, %cst_140 {dimension_numbers = #tpu.dot_dimension_numbers<[1], [0], [0], [1], [0, 0, 1, 1], [], []>} : vector<8x64xf32>, vector<64x256xf32>, vector<8x256xf32> -> vector<8x256xf32>
    %604 = arith.addf %600, %603 : vector<8x256xf32>
    %605 = arith.negf %604 : vector<8x256xf32>
    %606 = math.exp %605 : vector<8x256xf32>
    %cst_141 = arith.constant 1.000000e+00 : f32
    %607 = vector.broadcast %cst_141 : f32 to vector<8x256xf32>
    %608 = arith.addf %607, %606 : vector<8x256xf32>
    %609 = arith.divf %607, %608 : vector<8x256xf32>
    %610 = vector.extract_strided_slice %609 {offsets = [0, 0], sizes = [8, 32], strides = [1, 1]} : vector<8x256xf32> to vector<8x32xf32>
    %611 = vector.extract_strided_slice %609 {offsets = [0, 32], sizes = [8, 32], strides = [1, 1]} : vector<8x256xf32> to vector<8x32xf32>
    %612 = vector.extract_strided_slice %609 {offsets = [0, 64], sizes = [8, 32], strides = [1, 1]} : vector<8x256xf32> to vector<8x32xf32>
    %cst_142 = arith.constant 2.000000e+00 : f32
    %613 = vector.broadcast %cst_142 : f32 to vector<8x32xf32>
    %614 = arith.mulf %613, %612 : vector<8x32xf32>
    %cst_143 = arith.constant 1.000000e+00 : f32
    %615 = vector.broadcast %cst_143 : f32 to vector<8x32xf32>
    %616 = arith.subf %614, %615 : vector<8x32xf32>
    %617 = vector.extract_strided_slice %609 {offsets = [0, 96], sizes = [8, 32], strides = [1, 1]} : vector<8x256xf32> to vector<8x32xf32>
    %618 = arith.mulf %611, %582 : vector<8x32xf32>
    %619 = arith.mulf %610, %616 : vector<8x32xf32>
    %620 = arith.addf %618, %619 : vector<8x32xf32>
    %621 = math.tanh %620 : vector<8x32xf32>
    %622 = arith.mulf %617, %621 : vector<8x32xf32>
    %623 = vector.extract_strided_slice %609 {offsets = [0, 128], sizes = [8, 32], strides = [1, 1]} : vector<8x256xf32> to vector<8x32xf32>
    %624 = vector.extract_strided_slice %609 {offsets = [0, 160], sizes = [8, 32], strides = [1, 1]} : vector<8x256xf32> to vector<8x32xf32>
    %625 = vector.extract_strided_slice %609 {offsets = [0, 192], sizes = [8, 32], strides = [1, 1]} : vector<8x256xf32> to vector<8x32xf32>
    %cst_144 = arith.constant 2.000000e+00 : f32
    %626 = vector.broadcast %cst_144 : f32 to vector<8x32xf32>
    %627 = arith.mulf %626, %625 : vector<8x32xf32>
    %cst_145 = arith.constant 1.000000e+00 : f32
    %628 = vector.broadcast %cst_145 : f32 to vector<8x32xf32>
    %629 = arith.subf %627, %628 : vector<8x32xf32>
    %630 = vector.extract_strided_slice %609 {offsets = [0, 224], sizes = [8, 32], strides = [1, 1]} : vector<8x256xf32> to vector<8x32xf32>
    %631 = arith.mulf %624, %595 : vector<8x32xf32>
    %632 = arith.mulf %623, %629 : vector<8x32xf32>
    %633 = arith.addf %631, %632 : vector<8x32xf32>
    %634 = math.tanh %633 : vector<8x32xf32>
    %635 = arith.mulf %630, %634 : vector<8x32xf32>
    %636 = tpu.concatenate %356, %635, %394, %597, %432, %559, %470, %521, %508, %483, %546, %445, %584, %407, %622, %369 in 1 : vector<8x32xf32>, vector<8x32xf32>, vector<8x32xf32>, vector<8x32xf32>, vector<8x32xf32>, vector<8x32xf32>, vector<8x32xf32>, vector<8x32xf32>, vector<8x32xf32>, vector<8x32xf32>, vector<8x32xf32>, vector<8x32xf32>, vector<8x32xf32>, vector<8x32xf32>, vector<8x32xf32>, vector<8x32xf32> -> vector<8x512xf32>
    %cst_146 = arith.constant 0.000000e+00 : f32
    %637 = vector.broadcast %cst_146 : f32 to vector<8x512xf32>
    %638 = arith.maximumf %636, %637 : vector<8x512xf32>
    %c0_147 = arith.constant 0 : index
    %c0_148 = arith.constant 0 : index
    %639 = vector.load %arg7[%c0_147, %c0_148] : memref<512x128xf32, #tpu.memory_space<vmem>>, vector<512x128xf32>
    %cst_149 = arith.constant dense<0.000000e+00> : vector<8x128xf32>
    %640 = tpu.matmul %638, %639, %cst_149 {dimension_numbers = #tpu.dot_dimension_numbers<[1], [0], [0], [1], [0, 0, 1, 1], [], []>} : vector<8x512xf32>, vector<512x128xf32>, vector<8x128xf32> -> vector<8x128xf32>
    %c0_150 = arith.constant 0 : index
    %c0_151 = arith.constant 0 : index
    %641 = vector.load %arg8[%c0_150, %c0_151] : memref<1x128xf32, #tpu.memory_space<vmem>>, vector<1x128xf32>
    %642 = vector.broadcast %641 : vector<1x128xf32> to vector<8x128xf32>
    %643 = arith.addf %640, %642 : vector<8x128xf32>
    %c0_152 = arith.constant 0 : index
    %c0_153 = arith.constant 0 : index
    %644 = vector.load %arg9[%c0_152, %c0_153] : memref<8x128xf32, #tpu.memory_space<vmem>>, vector<8x128xf32>
    tpu.vector_store %arg9[%c0_152, %c0_153], %643 {strides = array<i32>} : memref<8x128xf32, #tpu.memory_space<vmem>>, vector<8x128xf32>,
    return
  }
}

</mosaic_0001>

<bundles_post_ra>
// kernel: tpu_custom_call.1
= control target key start
LH: loop header
LB: loop body
LE: loop exit
PB: predicated region body
PF: predicated region fallthrough
CT: control target
= control target key end

     0   :  { %14 = vsyncpa [#allocation3], 0  ;;  %s4500_s0 = inlined_call_operand.vmem [shape: f32[64,8], index: 0, kind: input, shape index: {}]   ;;  %s4501_s1 = inlined_call_operand.vmem [shape: f32[8,256], index: 1, kind: input, shape index: {}]   ;;  %s4502_s2 = inlined_call_operand.hbm [shape: f32[64,256], index: 2, kind: input, shape index: {}]   ;;  %s4503_s3 = inlined_call_operand.vmem [shape: f32[1,256], index: 3, kind: input, shape index: {}]   ;;  %s4504_s4 = inlined_call_operand.hbm [shape: f32[64,256], index: 4, kind: input, shape index: {}]   ;;  %s4505_s5 = inlined_call_operand.hbm [shape: f32[64,256], index: 5, kind: input, shape index: {}]   ;;  %s4506_s6 = inlined_call_operand.vmem [shape: f32[1,256], index: 6, kind: input, shape index: {}]   ;;  %s4507_s7 = inlined_call_operand.hbm [shape: f32[512,128], index: 7, kind: input, shape index: {}]   ;;  %s4508_s8 = inlined_call_operand.vmem [shape: f32[1,128], index: 8, kind: input, shape index: {}]   ;;  %s4509_s9 = inlined_call_operand.hbm [shape: f32[8,128], index: 9, kind: output, shape index: {}]  }
   0x1   :  { %15 = vsyncpa [#allocation6], 0 }
   0x2   :  { %16 = vsyncpa [#allocation9], 0 }
   0x3   :  { %17 = vsyncpa [#allocation4], 0  ;;  %s3699_s30 = smov [#allocation5]   ;;  %s3700_s11 = smov [#allocation2]  }
   0x4   :  { %s41_s10 = sshll.u32 %s3699_s30, 4  ;;  %s27_s12 = sshll.u32 %s3700_s11, 4  ;;  %s42_s10 = int_to_ptr.vmem [resolvable:$true] %s41_s10  ;;  %s3762_s12 = int_to_ptr.vmem [resolvable:$true] %s27_s12 }
   0x5   :  { %s3581_s15 = scalar_lea.hbm %s4504_s4, 2048 }
   0x6   :  { %p3582_p0 = scmp.ne.s32.totalorder %s4504_s4, %s3581_s15  ;;  %p3585_p1 = scmp.lt.u32.totalorder %s3581_s15, %s4504_s4 }
   0x8   :  { %p3587_p2 = pnand %p3585_p1, %p3582_p0 }
   0xa   :  { %3590 = shalt.err (!%p3587_p2)
}
   0xb   :  { %s3591_s20 = scalar_lea.vmem %s42_s10, 2048  ;;  %p3596_p4 = scmp.lt.s32.totalorder %s42_s10, %s42_s10 }
   0xc   :  { %p3592_p3 = scmp.ne.s32.totalorder %s42_s10, %s3591_s20  ;;  %p3597_p5 = scmp.lt.s32.totalorder %s3591_s20, %s3591_s20 }
   0xe   :  { %p3598_p6 = por %p3597_p5, %p3596_p4 }
  0x10   :  { %p3599_p7 = pnand %p3598_p6, %p3592_p3 }
  0x12   :  { %3602 = shalt.err (!%p3599_p7)
}
  0x13   :  { %s3701_s21 = smov 256   ;;  %s3702_s22 = smov 16  }
  0x14   :  { %47 = dma.hbm_to_vmem [thread:$0]  %s4504_s4, 2048, %s42_s10, [#allocation6], %s3701_s21, %s3701_s21, %s3702_s22  }
  0x15   :  { %s3603_s27 = scalar_lea.hbm %s4502_s2, 2048 }
  0x16   :  { %p3604_p8 = scmp.ne.s32.totalorder %s4502_s2, %s3603_s27  ;;  %p3607_p9 = scmp.lt.u32.totalorder %s3603_s27, %s4502_s2 }
  0x18   :  { %p3609_p10 = pnand %p3607_p9, %p3604_p8 }
  0x1a   :  { %3612 = shalt.err (!%p3609_p10)
}
  0x1b   :  { %s3613_s13 = scalar_lea.vmem %s3762_s12, 2048  ;;  %p3618_p12 = scmp.lt.s32.totalorder %s3762_s12, %s3762_s12 }
  0x1c   :  { %p3614_p11 = scmp.ne.s32.totalorder %s3762_s12, %s3613_s13  ;;  %p3619_p13 = scmp.lt.s32.totalorder %s3613_s13, %s3613_s13 }
  0x1e   :  { %p3620_p0 = por %p3619_p13, %p3618_p12 }
  0x20   :  { %p3621_p1 = pnand %p3620_p0, %p3614_p11 }
  0x22   :  { %3624 = shalt.err (!%p3621_p1)
}
  0x23   :  { %33 = dma.hbm_to_vmem [thread:$0]  %s4502_s2, 2048, %s3762_s12, [#allocation3], %s3701_s21, %s3701_s21, %s3702_s22  }
  0x24   :  { %s3703_s14 = smov [#allocation7]   ;;  %s3704_s16 = smov [#allocation8]  }
  0x25   :  { %s53_s15 = sshll.u32 %s3703_s14, 4  ;;  %s67_s17 = sshll.u32 %s3704_s16, 4  ;;  %s54_s15 = int_to_ptr.vmem [resolvable:$true] %s53_s15  ;;  %s3799_s17 = int_to_ptr.vmem [resolvable:$true] %s67_s17 }
  0x26   :  { %s3625_s20 = scalar_lea.hbm %s4505_s5, 2048 }
  0x27   :  { %p3626_p2 = scmp.ne.s32.totalorder %s4505_s5, %s3625_s20  ;;  %p3629_p3 = scmp.lt.u32.totalorder %s3625_s20, %s4505_s5 }
  0x29   :  { %p3631_p4 = pnand %p3629_p3, %p3626_p2 }
  0x2b   :  { %3634 = shalt.err (!%p3631_p4)
}
  0x2c   :  { %s3635_s2 = scalar_lea.vmem %s54_s15, 2048  ;;  %p3640_p6 = scmp.lt.s32.totalorder %s54_s15, %s54_s15 }
  0x2d   :  { %p3636_p5 = scmp.ne.s32.totalorder %s54_s15, %s3635_s2  ;;  %p3641_p7 = scmp.lt.s32.totalorder %s3635_s2, %s3635_s2 }
  0x2f   :  { %p3642_p8 = por %p3641_p7, %p3640_p6 }
  0x31   :  { %p3643_p9 = pnand %p3642_p8, %p3636_p5 }
  0x33   :  { %3646 = shalt.err (!%p3643_p9)
}
  0x34   :  { %59 = dma.hbm_to_vmem [thread:$0]  %s4505_s5, 2048, %s54_s15, [#allocation6], %s3701_s21, %s3701_s21, %s3702_s22  }
  0x35   :  { %s3647_s30 = scalar_lea.hbm %s4507_s7, 8192 }
  0x36   :  { %p3648_p10 = scmp.ne.s32.totalorder %s4507_s7, %s3647_s30  ;;  %p3651_p11 = scmp.lt.u32.totalorder %s3647_s30, %s4507_s7 }
  0x38   :  { %p3653_p12 = pnand %p3651_p11, %p3648_p10 }
  0x3a   :  { %3656 = shalt.err (!%p3653_p12)
}
  0x3b   :  { %s3657_s14 = scalar_lea.vmem %s3799_s17, 8192  ;;  %p3662_p0 = scmp.lt.s32.totalorder %s3799_s17, %s3799_s17 }
  0x3c   :  { %p3658_p13 = scmp.ne.s32.totalorder %s3799_s17, %s3657_s14  ;;  %p3663_p1 = scmp.lt.s32.totalorder %s3657_s14, %s3657_s14 }
  0x3e   :  { %p3664_p2 = por %p3663_p1, %p3662_p0 }
  0x40   :  { %p3665_p3 = pnand %p3664_p2, %p3658_p13 }
  0x42   :  { %3668 = shalt.err (!%p3665_p3)
}
  0x43   :  { %s3705_s5 = smov 128   ;;  %s3706_s21 = smov 8  }
  0x44   :  { %73 = dma.hbm_to_vmem [thread:$0]  %s4507_s7, 8192, %s3799_s17, [#allocation9], %s3705_s5, %s3705_s5, %s3706_s21  }
  0x45   :  { %3691 = dma.done.wait [#allocation3], 2048  }
  0x46   :  { %3692 = vsyncadd [#allocation3], 4294965248 }
  0x47   :  { %3693 = dma.done.wait [#allocation6], 4096  }
  0x48   :  { %3694 = vsyncadd [#allocation6], 4294963200 }
  0x49   :  { %3695 = dma.done.wait [#allocation9], 8192  }
  0x4a   :  { %3696 = vsyncadd [#allocation9], 4294959104  ;;  %v3707_v0 = vmov 0.0   ;;  %v97_v1 = vld [vmem:[%s4501_s1 + $0x8] sm:$0xff]  ;;  %v96_v2 = vld [vmem:[%s4501_s1] sm:$0xff]  ;;  %vm110_vm0 = vcmask 64512   ;;  %v100_v35 = vlaneseq }
  0x4b   :  { %199 = vmatprep.mubr.f32.mxu0 %v3707_v0  ;;  %332 = vmatprep.mubr.f32.mxu1 %v3707_v0  ;;  %v88_v3 = vld [vmem:[%s4500_s0] sm:$0xff]  ;;  %v249_v4 = vld [vmem:[#allocation2 + $0x8] sm:$0xff]  ;;  %v251_v5 = vld [vmem:[#allocation2 + $0x18] sm:$0xff]  ;;  %vm399_vm1 = vcmask 261120   ;;  %vm264_vm2 = vcmask 523264   ;;  %vm2621_vm3 = vcmask 785408  }
  0x4c   :  { %135 = vmatprep.subr.mxu0 %v97_v1  ;;  %v248_v6 = vld [vmem:[#allocation2] sm:$0xff]  ;;  %v3844_v7 = vpack.c.bf16 %v251_v5, %v249_v4  ;;  %v250_v8 = vld [vmem:[#allocation2 + $0x10] sm:$0xff]  ;;  %v253_v9 = vld [vmem:[#allocation2 + $0x28] sm:$0xff]  ;;  %v3925_v36 = vshrl.u32 %v100_v35, 7  ;;  %s3711_s16 = smov [#allocation10]  }
  0x4d   :  { %136 = vmatpush1.msra.mxu0 %v96_v2  ;;  %v3847_v10 = vpack.c.bf16 %v250_v8, %v248_v6  ;;  %v255_v11 = vld [vmem:[#allocation2 + $0x38] sm:$0xff]  ;;  %v252_v12 = vld [vmem:[#allocation2 + $0x20] sm:$0xff]  ;;  %v254_v13 = vld [vmem:[#allocation2 + $0x30] sm:$0xff]  ;;  %s2854_s18 = sshll.u32 %s3711_s16, 4  ;;  %s2855_s18 = int_to_ptr.vmem [resolvable:$true] %s2854_s18 }
  0x4e   :  { %2865 = vmatmul.mubr.msk.f32.vlgmr.msra.gmra.mrb[0].mxu0 %vm110_vm0, %v88_v3  ;;  %3031 = vmatprep.subr.bf16.mxu1 %v3844_v7  ;;  %v89_v14 = vld [vmem:[%s4500_s0 + $0x8] sm:$0xff]  ;;  %v3854_v15 = vpack.c.bf16 %v255_v11, %v253_v9  ;;  %v257_v16 = vld [vmem:[#allocation2 + $0x48] sm:$0xff]  ;;  %v3857_v18 = vpack.c.bf16 %v254_v13, %v252_v12  ;;  %v256_v20 = vld [vmem:[#allocation2 + $0x40] sm:$0xff]  ;;  %v106_v37 = vsub.s32 1, %v3925_v36  ;;  %v102_v40 = vsub.s32 0, %v3925_v36  ;;  %s3669_s19 = scalar_lea.vmem %s2855_s18, 128  ;;  %p3674_p5 = scmp.lt.s32.totalorder %s2855_s18, %s2855_s18 }
  0x4f   :  { %205 = vmatprep.mubr.f32.mxu0 %v3707_v0  ;;  %v259_v17 = vld [vmem:[#allocation2 + $0x58] sm:$0xff]  ;;  %3033 = vmatpush1.bf16.msra.mxu1 %v3847_v10  ;;  %v258_v21 = vld [vmem:[#allocation2 + $0x50] sm:$0xff]  ;;  %v261_v22 = vld [vmem:[#allocation2 + $0x68] sm:$0xff]  ;;  %p3670_p4 = scmp.ne.s32.totalorder %s2855_s18, %s3669_s19  ;;  %p3675_p6 = scmp.lt.s32.totalorder %s3669_s19, %s3669_s19 }
  0x50   :  { %3063 = vmatprep.subr.bf16.mxu0 %v3844_v7  ;;  %3035 = vmatprep.subr.bf16.mxu1 %v3854_v15  ;;  %v3861_v19 = vpack.c.bf16 %v259_v17, %v257_v16  ;;  %v263_v23 = vld [vmem:[#allocation2 + $0x78] sm:$0xff]  ;;  %v90_v24 = vld [vmem:[%s4500_s0 + $0x10] sm:$0xff]  ;;  %v3871_v25 = vpack.c.bf16 %v258_v21, %v256_v20  ;;  %v262_v28 = vld [vmem:[#allocation2 + $0x70] sm:$0xff] }
  0x51   :  { %3065 = vmatpush1.bf16.msra.mxu0 %v3847_v10  ;;  %v3874_v26 = vpack.c.bf16 %v263_v23, %v261_v22  ;;  %v260_v27 = vld [vmem:[#allocation2 + $0x60] sm:$0xff]  ;;  %v91_v29 = vld [vmem:[%s4500_s0 + $0x18] sm:$0xff]  ;;  %v92_v31 = vld [vmem:[%s4500_s0 + $0x20] sm:$0xff]  ;;  %p3676_p7 = por %p3675_p6, %p3674_p5 }
  0x52   :  { %2866 = vmatmul.mubr.msk.f32.gmra.mrb[2].mxu0 %vm110_vm0, %v89_v14  ;;  %3067 = vmatprep.subr.bf16.mxu0 %v3854_v15  ;;  %v3884_v30 = vpack.c.bf16 %v262_v28, %v260_v27  ;;  %v93_v32 = vld [vmem:[%s4500_s0 + $0x28] sm:$0xff]  ;;  %v94_v33 = vld [vmem:[%s4500_s0 + $0x30] sm:$0xff]  ;;  %v95_v34 = vld [vmem:[%s4500_s0 + $0x38] sm:$0xff]  ;;  %s3708_s0 = smov 64  }
  0x53   :  { %211 = vmatprep.mubr.f32.mxu0 %v3707_v0  ;;  %3037 = vmatpush1.bf16.msra.mxu1 %v3857_v18  ;;  %v98_v38 = vld [vmem:[%s4503_s3] sm:$0x3]  ;;  %s3709_s3 = smov 32   ;;  %p3677_p8 = pnand %p3676_p7, %p3670_p4 }
  0x54   :  { %3039 = vmatprep.subr.bf16.mxu1 %v3861_v19  ;;  %v107_v39 = vrot.slane %v98_v38, %v106_v37  ;;  %v103_v44 = vrot.slane %v98_v38, %v102_v40 }
  0x55   :  { %3069 = vmatpush1.bf16.msra.mxu0 %v3857_v18 }
  0x56   :  { %2867 = vmatmul.mubr.msk.f32.gmra.mrb[4].mxu0 %vm110_vm0, %v90_v24  ;;  %3071 = vmatprep.subr.bf16.mxu0 %v3861_v19 }
  0x57   :  { %217 = vmatprep.mubr.f32.mxu0 %v3707_v0  ;;  %3041 = vmatpush1.bf16.msra.mxu1 %v3871_v25 }
  0x58   :  { %3043 = vmatprep.subr.bf16.mxu1 %v3874_v26 }
  0x59   :  { %3073 = vmatpush1.bf16.msra.mxu0 %v3871_v25 }
  0x5a   :  { %2868 = vmatmul.mubr.msk.f32.gmra.mrb[6].mxu0 %vm110_vm0, %v91_v29  ;;  %3075 = vmatprep.subr.bf16.mxu0 %v3874_v26 }
  0x5b   :  { %223 = vmatprep.mubr.f32.mxu0 %v3707_v0  ;;  %3045 = vmatpush1.bf16.msra.mxu1 %v3884_v30 }
  0x5c   :  { %3047 = vmatprep.subr.bf16.mxu1 %v3844_v7 }
  0x5d   :  { %3077 = vmatpush1.bf16.msra.mxu0 %v3884_v30 }
  0x5e   :  { %2869 = vmatmul.mubr.msk.f32.gmra.mrb[8].mxu0 %vm110_vm0, %v92_v31  ;;  %3095 = vmatprep.subr.bf16.mxu0 %v3844_v7 }
  0x5f   :  { %333 = vmatmul.mubr.f32.vlgmr.msra.gmra.mrb[0].mxu1 %v3707_v0  ;;  %229 = vmatprep.mubr.f32.mxu0 %v3707_v0 }
  0x60   :  { %3049 = vmatpush1.bf16.msra.mxu1 %v3847_v10  ;;  %468 = vmatprep.mubr.f32.mxu1 %v3707_v0 }
  0x61   :  { %3051 = vmatprep.subr.bf16.mxu1 %v3854_v15 }
  0x62   :  { %2870 = vmatmul.mubr.msk.f32.gmra.mrb[10].mxu0 %vm110_vm0, %v93_v32 }
  0x63   :  { %235 = vmatprep.mubr.f32.mxu0 %v3707_v0 }
  0x64   :  { %3053 = vmatpush1.bf16.msra.mxu1 %v3857_v18 }
  0x65   :  { %3055 = vmatprep.subr.bf16.mxu1 %v3861_v19 }
  0x66   :  { %2871 = vmatmul.mubr.msk.f32.gmra.mrb[12].mxu0 %vm110_vm0, %v94_v33 }
  0x67   :  { %241 = vmatprep.mubr.f32.mxu0 %v3707_v0 }
  0x68   :  { %3057 = vmatpush1.bf16.msra.mxu1 %v3871_v25 }
  0x69   :  { %3059 = vmatprep.subr.bf16.mxu1 %v3874_v26 }
  0x6a   :  { %2872 = vmatmul.mubr.msk.f32.gmra.mrb[14].mxu0 %vm110_vm0, %v95_v34 }
  0x6b   :  { %603 = vmatprep.mubr.f32.mxu0 %v3707_v0 }
  0x6c   :  { %3061 = vmatpush1.bf16.msra.mxu1 %v3884_v30 }
  0x6d   :  { %3079 = vmatprep.subr.bf16.mxu1 %v3844_v7 }
 0x121   :  { %v201_v41 = vpop.f32.mrb[0].mxu0 }
 0x122   :  { %v203_v42 = vpop.f32.mrb[1].mxu0  ;;  %v202_v57 = vadd.f32 %v201_v41, %v103_v44 }
 0x123   :  { %v3934_v43 = vadd.f32 %v203_v42, %v107_v39 }
 0x125   :  { %v207_v45 = vpop.f32.mrb[2].mxu0 }
 0x126   :  { %v3938_v46 = vadd.f32 %v207_v45, %v103_v44  ;;  %v209_v47 = vpop.f32.mrb[3].mxu0 }
 0x127   :  { %v3940_v48 = vadd.f32 %v209_v47, %v107_v39 }
 0x129   :  { %v213_v49 = vpop.f32.mrb[4].mxu0 }
 0x12a   :  { %v3942_v50 = vadd.f32 %v213_v49, %v103_v44  ;;  %v215_v51 = vpop.f32.mrb[5].mxu0 }
 0x12b   :  { %v3944_v52 = vadd.f32 %v215_v51, %v107_v39 }
 0x12d   :  { %v219_v53 = vpop.f32.mrb[6].mxu0 }
 0x12e   :  { %v3946_v54 = vadd.f32 %v219_v53, %v103_v44  ;;  %v221_v55 = vpop.f32.mrb[7].mxu0 }
 0x12f   :  { %v3948_v56 = vadd.f32 %v221_v55, %v107_v39 }
 0x131   :  { %v225_v58 = vpop.f32.mrb[8].mxu0 }
 0x132   :  { %v3950_v59 = vadd.f32 %v225_v58, %v103_v44  ;;  %v334_v60 = vpop.f32.mrb[0].mxu1  ;;  %v227_v61 = vpop.f32.mrb[9].mxu0 }
 0x133   :  { %v339_v62 = vadd.f32 %v334_v60, %v202_v57  ;;  %v3952_v63 = vadd.f32 %v227_v61, %v107_v39  ;;  %v336_v1 = vpop.f32.mrb[1].mxu1 }
 0x135   :  { %v2873_v2 = vmul.f32 -1.442695, %v339_v62  ;;  %v231_v3 = vpop.f32.mrb[10].mxu0 }
 0x136   :  { %v3954_v4 = vadd.f32 %v231_v3, %v103_v44  ;;  %v233_v5 = vpop.f32.mrb[11].mxu0 }
 0x137   :  { %3389 = vpow2.f32 %v2873_v2  ;;  %v3956_v6 = vadd.f32 %v233_v5, %v107_v39 }
 0x139   :  { %v237_v8 = vpop.f32.mrb[12].mxu0 }
 0x13a   :  { %v3958_v9 = vadd.f32 %v237_v8, %v103_v44  ;;  %v239_v11 = vpop.f32.mrb[13].mxu0 }
 0x13b   :  { %v3960_v12 = vadd.f32 %v239_v11, %v107_v39 }
 0x13d   :  { %v243_v13 = vpop.f32.mrb[14].mxu0 }
 0x13e   :  { %v3962_v14 = vadd.f32 %v243_v13, %v103_v44  ;;  %v245_v16 = vpop.f32.mrb[15].mxu0 }
 0x13f   :  { %v246_v17 = vadd.f32 %v245_v16, %v107_v39 }
 0x141   :  { %v3390_v20 = vpop.eup %3389  ;;  %v340_v21 = vadd.f32 %v336_v1, %v246_v17 }
 0x142   :  { %v347_v22 = vadd.f32 1.0, %v3390_v20 }
 0x143   :  { %v2874_v23 = vmul.f32 -1.442695, %v340_v21 }
 0x144   :  { %3391 = vrcp.f32 %v347_v22 }
 0x145   :  { %3393 = vpow2.f32 %v2874_v23 }
 0x14e   :  { %v3392_v24 = vpop.eup %3391 }
 0x14f   :  { %v3394_v27 = vpop.eup %3393  ;;  %v353_v28 = vmul.f32 2.0, %v3392_v24  ;;  %v355_v42 = vmul.f32 0.0, %v3392_v24 }
 0x150   :  { %v348_v29 = vadd.f32 1.0, %v3394_v27 }
 0x151   :  { %v2875_v31 = vadd.f32 -1.0, %v353_v28 }
 0x152   :  { %3395 = vrcp.f32 %v348_v29 }
 0x153   :  { %357 = vrot.lane.b32.xlu0 %v2875_v31, %s3708_s0 }
 0x15c   :  { %v3396_v32 = vpop.eup %3395 }
 0x15d   :  { %v372_v33 = vmul.f32 2.0, %v3396_v32  ;;  %v374_v49 = vmul.f32 0.0, %v3396_v32 }
 0x15f   :  { %v2876_v34 = vadd.f32 -1.0, %v372_v33 }
 0x161   :  { %376 = vrot.lane.b32.xlu0 %v2876_v34, %s3708_s0 }
 0x1c5   :  { %v358_v35 = vpop.permute.xlu0 %357 }
 0x1c6   :  { %v360_v38 = vmul.f32 %v3392_v24, %v358_v35 }
 0x1c8   :  { %362 = vrot.lane.b32.xlu1 %v360_v38, %s3709_s3 }
 0x1d3   :  { %v377_v39 = vpop.permute.xlu0 %376 }
 0x1d4   :  { %v379_v41 = vmul.f32 %v3396_v32, %v377_v39 }
 0x1d6   :  { %381 = vrot.lane.b32.xlu1 %v379_v41, %s3709_s3 }
 0x23a   :  { %v363_v44 = vpop.permute.xlu1 %362 }
 0x23b   :  { %v365_v45 = vadd.f32 %v363_v44, %v355_v42 }
 0x23d   :  { %3397 = vtanh.f32 %v365_v45 }
 0x247   :  { %v3398_v47 = vpop.eup %3397 }
 0x248   :  { %368 = vrot.lane.b32.xlu0 %v3398_v47, %s3708_s0  ;;  %v382_v51 = vpop.permute.xlu1 %381 }
 0x249   :  { %v384_v53 = vadd.f32 %v382_v51, %v374_v49 }
 0x24b   :  { %3399 = vtanh.f32 %v384_v53 }
 0x255   :  { %v3400_v55 = vpop.eup %3399 }
 0x256   :  { %387 = vrot.lane.b32.xlu1 %v3400_v55, %s3708_s0 }
 0x2ba   :  { %v369_v57 = vpop.permute.xlu0 %368 }
 0x2bb   :  { %v371_v58 = vmul.f32 %v3392_v24, %v369_v57 }
 0x2bd   :  { %392 = vrot.lane.b32.xlu0 %v371_v58, %s3709_s3 }
 0x2c8   :  { %v388_v60 = vpop.permute.xlu1 %387 }
 0x2c9   :  { %v390_v61 = vmul.f32 %v3396_v32, %v388_v60 }
 0x2cb   :  { %396 = vrot.lane.b32.xlu1 %v390_v61, %s3708_s0 }
 0x32f   :  { %v3972_v62 = vpop.permute.xlu0 %392 }
 0x33d   :  { %v3974_v1 = vpop.permute.xlu1 %396 }
 0x33e   :  { %v400_v2 = vsel %vm399_vm1, %v3972_v62, %v3974_v1 }
 0x33f   :  { %2877 = vmatmul.mubr.msk.f32.vlgmr.msra.gmra.mrb[2].mxu1 %vm264_vm2, %v400_v2 }
 0x340   :  { %3081 = vmatpush1.bf16.msra.mxu1 %v3847_v10  ;;  %738 = vmatprep.mubr.f32.mxu1 %v3707_v0 }
 0x341   :  { %3083 = vmatprep.subr.bf16.mxu1 %v3854_v15 }
 0x344   :  { %3085 = vmatpush1.bf16.msra.mxu1 %v3857_v18 }
 0x345   :  { %3087 = vmatprep.subr.bf16.mxu1 %v3861_v19 }
 0x348   :  { %3089 = vmatpush1.bf16.msra.mxu1 %v3871_v25 }
 0x349   :  { %3091 = vmatprep.subr.bf16.mxu1 %v3874_v26 }
 0x34c   :  { %3093 = vmatpush1.bf16.msra.mxu1 %v3884_v30 }
 0x34d   :  { %3111 = vmatprep.subr.bf16.mxu1 %v3844_v7 }
 0x412   :  { %v470_v3 = vpop.f32.mrb[2].mxu1 }
 0x413   :  { %v475_v5 = vadd.f32 %v470_v3, %v3938_v46  ;;  %v472_v8 = vpop.f32.mrb[3].mxu1 }
 0x414   :  { %v476_v11 = vadd.f32 %v472_v8, %v3960_v12 }
 0x415   :  { %v2878_v13 = vmul.f32 -1.442695, %v475_v5 }
 0x416   :  { %v2879_v16 = vmul.f32 -1.442695, %v476_v11 }
 0x417   :  { %3401 = vpow2.f32 %v2878_v13 }
 0x418   :  { %3403 = vpow2.f32 %v2879_v16 }
 0x421   :  { %v3402_v17 = vpop.eup %3401 }
 0x422   :  { %v3404_v20 = vpop.eup %3403  ;;  %v483_v21 = vadd.f32 1.0, %v3402_v17 }
 0x423   :  { %v484_v22 = vadd.f32 1.0, %v3404_v20 }
 0x424   :  { %3405 = vrcp.f32 %v483_v21 }
 0x425   :  { %3407 = vrcp.f32 %v484_v22 }
 0x42e   :  { %v3406_v23 = vpop.eup %3405 }
 0x42f   :  { %v3408_v24 = vpop.eup %3407  ;;  %v489_v27 = vmul.f32 2.0, %v3406_v23  ;;  %v491_v34 = vmul.f32 %v3406_v23, %v365_v45 }
 0x430   :  { %v508_v28 = vmul.f32 2.0, %v3408_v24  ;;  %v510_v38 = vmul.f32 %v3408_v24, %v384_v53 }
 0x431   :  { %v2880_v29 = vadd.f32 -1.0, %v489_v27 }
 0x432   :  { %v2881_v31 = vadd.f32 -1.0, %v508_v28 }
 0x433   :  { %493 = vrot.lane.b32.xlu0 %v2880_v29, %s3708_s0 }
 0x434   :  { %512 = vrot.lane.b32.xlu1 %v2881_v31, %s3708_s0 }
 0x4a5   :  { %v494_v46 = vpop.permute.xlu0 %493 }
 0x4a6   :  { %v496_v12 = vmul.f32 %v3406_v23, %v494_v46  ;;  %v513_v32 = vpop.permute.xlu1 %512 }
 0x4a7   :  { %v515_v33 = vmul.f32 %v3408_v24, %v513_v32 }
 0x4a8   :  { %498 = vrot.lane.b32.xlu0 %v496_v12, %s3709_s3 }
 0x4a9   :  { %517 = vrot.lane.b32.xlu1 %v515_v33, %s3709_s3 }
 0x51a   :  { %v499_v35 = vpop.permute.xlu0 %498 }
 0x51b   :  { %v501_v39 = vadd.f32 %v499_v35, %v491_v34  ;;  %v518_v41 = vpop.permute.xlu1 %517 }
 0x51c   :  { %v520_v42 = vadd.f32 %v518_v41, %v510_v38 }
 0x51d   :  { %3409 = vtanh.f32 %v501_v39 }
 0x51e   :  { %3411 = vtanh.f32 %v520_v42 }
 0x527   :  { %v3410_v44 = vpop.eup %3409 }
 0x528   :  { %v3412_v47 = vpop.eup %3411  ;;  %504 = vrot.lane.b32.xlu0 %v3410_v44, %s3708_s0 }
 0x529   :  { %523 = vrot.lane.b32.xlu1 %v3412_v47, %s3708_s0 }
 0x59a   :  { %v505_v49 = vpop.permute.xlu0 %504 }
 0x59b   :  { %v507_v51 = vmul.f32 %v3406_v23, %v505_v49  ;;  %v524_v55 = vpop.permute.xlu1 %523 }
 0x59c   :  { %v526_v57 = vmul.f32 %v3408_v24, %v524_v55 }
 0x59d   :  { %528 = vrot.lane.b32.xlu0 %v507_v51, %s3709_s3 }
 0x59e   :  { %532 = vrot.lane.b32.xlu1 %v526_v57, %s3708_s0 }
 0x60f   :  { %v3999_v45 = vpop.permute.xlu0 %528 }
 0x610   :  { %v4001_v53 = vpop.permute.xlu1 %532 }
 0x611   :  { %v535_v58 = vsel %vm399_vm1, %v3999_v45, %v4001_v53 }
 0x612   :  { %2882 = vmatmul.mubr.msk.f32.vlgmr.msra.gmra.mrb[16].mxu0 %vm264_vm2, %v535_v58 }
 0x613   :  { %3097 = vmatpush1.bf16.msra.mxu0 %v3847_v10  ;;  %873 = vmatprep.mubr.f32.mxu0 %v3707_v0 }
 0x614   :  { %3099 = vmatprep.subr.bf16.mxu0 %v3854_v15 }
 0x617   :  { %3101 = vmatpush1.bf16.msra.mxu0 %v3857_v18 }
 0x618   :  { %3103 = vmatprep.subr.bf16.mxu0 %v3861_v19 }
 0x61b   :  { %3105 = vmatpush1.bf16.msra.mxu0 %v3871_v25 }
 0x61c   :  { %3107 = vmatprep.subr.bf16.mxu0 %v3874_v26 }
 0x61f   :  { %3109 = vmatpush1.bf16.msra.mxu0 %v3884_v30 }
 0x620   :  { %3127 = vmatprep.subr.bf16.mxu0 %v3844_v7 }
 0x6e5   :  { %v605_v60 = vpop.f32.mrb[16].mxu0 }
 0x6e6   :  { %v610_v61 = vadd.f32 %v605_v60, %v3942_v50  ;;  %v607_v2 = vpop.f32.mrb[17].mxu0 }
 0x6e7   :  { %v611_v3 = vadd.f32 %v607_v2, %v3956_v6 }
 0x6e8   :  { %v2883_v5 = vmul.f32 -1.442695, %v610_v61 }
 0x6e9   :  { %v2884_v8 = vmul.f32 -1.442695, %v611_v3 }
 0x6ea   :  { %3413 = vpow2.f32 %v2883_v5 }
 0x6eb   :  { %3415 = vpow2.f32 %v2884_v8 }
 0x6f4   :  { %v3414_v11 = vpop.eup %3413 }
 0x6f5   :  { %v3416_v13 = vpop.eup %3415  ;;  %v618_v16 = vadd.f32 1.0, %v3414_v11 }
 0x6f6   :  { %v619_v17 = vadd.f32 1.0, %v3416_v13 }
 0x6f7   :  { %3417 = vrcp.f32 %v618_v16 }
 0x6f8   :  { %3419 = vrcp.f32 %v619_v17 }
 0x701   :  { %v3418_v20 = vpop.eup %3417 }
 0x702   :  { %v3420_v21 = vpop.eup %3419  ;;  %v624_v22 = vmul.f32 2.0, %v3418_v20  ;;  %v626_v31 = vmul.f32 %v3418_v20, %v501_v39 }
 0x703   :  { %v643_v23 = vmul.f32 2.0, %v3420_v21  ;;  %v645_v12 = vmul.f32 %v3420_v21, %v520_v42 }
 0x704   :  { %v2885_v24 = vadd.f32 -1.0, %v624_v22 }
 0x705   :  { %v2886_v27 = vadd.f32 -1.0, %v643_v23 }
 0x706   :  { %628 = vrot.lane.b32.xlu0 %v2885_v24, %s3708_s0 }
 0x707   :  { %647 = vrot.lane.b32.xlu1 %v2886_v27, %s3708_s0 }
 0x778   :  { %v629_v50 = vpop.permute.xlu0 %628 }
 0x779   :  { %v631_v6 = vmul.f32 %v3418_v20, %v629_v50  ;;  %v648_v28 = vpop.permute.xlu1 %647 }
 0x77a   :  { %v650_v29 = vmul.f32 %v3420_v21, %v648_v28 }
 0x77b   :  { %633 = vrot.lane.b32.xlu0 %v631_v6, %s3709_s3 }
 0x77c   :  { %652 = vrot.lane.b32.xlu1 %v650_v29, %s3709_s3 }
 0x7ed   :  { %v634_v46 = vpop.permute.xlu0 %633 }
 0x7ee   :  { %v636_v32 = vadd.f32 %v634_v46, %v626_v31  ;;  %v653_v33 = vpop.permute.xlu1 %652 }
 0x7ef   :  { %v655_v34 = vadd.f32 %v653_v33, %v645_v12 }
 0x7f0   :  { %3421 = vtanh.f32 %v636_v32 }
 0x7f1   :  { %3423 = vtanh.f32 %v655_v34 }
 0x7fa   :  { %v3422_v35 = vpop.eup %3421 }
 0x7fb   :  { %v3424_v38 = vpop.eup %3423  ;;  %639 = vrot.lane.b32.xlu0 %v3422_v35, %s3708_s0 }
 0x7fc   :  { %658 = vrot.lane.b32.xlu1 %v3424_v38, %s3708_s0 }
 0x86d   :  { %v640_v41 = vpop.permute.xlu0 %639 }
 0x86e   :  { %v642_v44 = vmul.f32 %v3418_v20, %v640_v41  ;;  %v659_v47 = vpop.permute.xlu1 %658 }
 0x86f   :  { %v661_v49 = vmul.f32 %v3420_v21, %v659_v47 }
 0x870   :  { %663 = vrot.lane.b32.xlu0 %v642_v44, %s3709_s3 }
 0x871   :  { %667 = vrot.lane.b32.xlu1 %v661_v49, %s3708_s0 }
 0x8e2   :  { %v4026_v39 = vpop.permute.xlu0 %663 }
 0x8e3   :  { %v4028_v42 = vpop.permute.xlu1 %667 }
 0x8e4   :  { %v670_v51 = vsel %vm399_vm1, %v4026_v39, %v4028_v42 }
 0x8e5   :  { %2887 = vmatmul.mubr.msk.f32.vlgmr.msra.gmra.mrb[4].mxu1 %vm264_vm2, %v670_v51 }
 0x8e6   :  { %3113 = vmatpush1.bf16.msra.mxu1 %v3847_v10  ;;  %1008 = vmatprep.mubr.f32.mxu1 %v3707_v0 }
 0x8e7   :  { %3115 = vmatprep.subr.bf16.mxu1 %v3854_v15 }
 0x8ea   :  { %3117 = vmatpush1.bf16.msra.mxu1 %v3857_v18 }
 0x8eb   :  { %3119 = vmatprep.subr.bf16.mxu1 %v3861_v19 }
 0x8ee   :  { %3121 = vmatpush1.bf16.msra.mxu1 %v3871_v25 }
 0x8ef   :  { %3123 = vmatprep.subr.bf16.mxu1 %v3874_v26 }
 0x8f2   :  { %3125 = vmatpush1.bf16.msra.mxu1 %v3884_v30 }
 0x8f3   :  { %3143 = vmatprep.subr.bf16.mxu1 %v3844_v7 }
 0x9b8   :  { %v740_v55 = vpop.f32.mrb[4].mxu1 }
 0x9b9   :  { %v745_v57 = vadd.f32 %v740_v55, %v3946_v54  ;;  %v742_v58 = vpop.f32.mrb[5].mxu1 }
 0x9ba   :  { %v746_v60 = vadd.f32 %v742_v58, %v3952_v63 }
 0x9bb   :  { %v2888_v61 = vmul.f32 -1.442695, %v745_v57 }
 0x9bc   :  { %v2889_v2 = vmul.f32 -1.442695, %v746_v60 }
 0x9bd   :  { %3425 = vpow2.f32 %v2888_v61 }
 0x9be   :  { %3427 = vpow2.f32 %v2889_v2 }
 0x9c7   :  { %v3426_v3 = vpop.eup %3425 }
 0x9c8   :  { %v3428_v5 = vpop.eup %3427  ;;  %v753_v8 = vadd.f32 1.0, %v3426_v3 }
 0x9c9   :  { %v754_v11 = vadd.f32 1.0, %v3428_v5 }
 0x9ca   :  { %3429 = vrcp.f32 %v753_v8 }
 0x9cb   :  { %3431 = vrcp.f32 %v754_v11 }
 0x9d4   :  { %v3430_v13 = vpop.eup %3429 }
 0x9d5   :  { %v3432_v16 = vpop.eup %3431  ;;  %v759_v17 = vmul.f32 2.0, %v3430_v13  ;;  %v761_v24 = vmul.f32 %v3430_v13, %v636_v32 }
 0x9d6   :  { %v778_v7 = vmul.f32 2.0, %v3432_v16  ;;  %v780_v50 = vmul.f32 %v3432_v16, %v655_v34 }
 0x9d7   :  { %v2890_v20 = vadd.f32 -1.0, %v759_v17 }
 0x9d8   :  { %v2891_v21 = vadd.f32 -1.0, %v778_v7 }
 0x9d9   :  { %763 = vrot.lane.b32.xlu0 %v2890_v20, %s3708_s0 }
 0x9da   :  { %782 = vrot.lane.b32.xlu1 %v2891_v21, %s3708_s0 }
 0xa4b   :  { %v764_v54 = vpop.permute.xlu0 %763 }
 0xa4c   :  { %v766_v63 = vmul.f32 %v3430_v13, %v764_v54  ;;  %v783_v22 = vpop.permute.xlu1 %782 }
 0xa4d   :  { %v785_v23 = vmul.f32 %v3432_v16, %v783_v22 }
 0xa4e   :  { %768 = vrot.lane.b32.xlu0 %v766_v63, %s3709_s3 }
 0xa4f   :  { %787 = vrot.lane.b32.xlu1 %v785_v23, %s3709_s3 }
 0xac0   :  { %v769_v27 = vpop.permute.xlu0 %768 }
 0xac1   :  { %v771_v6 = vadd.f32 %v769_v27, %v761_v24  ;;  %v788_v28 = vpop.permute.xlu1 %787 }
 0xac2   :  { %v790_v29 = vadd.f32 %v788_v28, %v780_v50 }
 0xac3   :  { %3433 = vtanh.f32 %v771_v6 }
 0xac4   :  { %3435 = vtanh.f32 %v790_v29 }
 0xacd   :  { %v3434_v31 = vpop.eup %3433 }
 0xace   :  { %v3436_v46 = vpop.eup %3435  ;;  %774 = vrot.lane.b32.xlu0 %v3434_v31, %s3708_s0 }
 0xacf   :  { %793 = vrot.lane.b32.xlu1 %v3436_v46, %s3708_s0 }
 0xb40   :  { %v775_v12 = vpop.permute.xlu0 %774 }
 0xb41   :  { %v777_v33 = vmul.f32 %v3430_v13, %v775_v12  ;;  %v794_v35 = vpop.permute.xlu1 %793 }
 0xb42   :  { %v796_v38 = vmul.f32 %v3432_v16, %v794_v35 }
 0xb43   :  { %798 = vrot.lane.b32.xlu0 %v777_v33, %s3709_s3 }
 0xb44   :  { %802 = vrot.lane.b32.xlu1 %v796_v38, %s3708_s0 }
 0xbb5   :  { %v4053_v32 = vpop.permute.xlu0 %798 }
 0xbb6   :  { %v4055_v34 = vpop.permute.xlu1 %802 }
 0xbb7   :  { %v805_v41 = vsel %vm399_vm1, %v4053_v32, %v4055_v34 }
 0xbb8   :  { %2892 = vmatmul.mubr.msk.f32.vlgmr.msra.gmra.mrb[18].mxu0 %vm264_vm2, %v805_v41 }
 0xbb9   :  { %3129 = vmatpush1.bf16.msra.mxu0 %v3847_v10  ;;  %1143 = vmatprep.mubr.f32.mxu0 %v3707_v0 }
 0xbba   :  { %3131 = vmatprep.subr.bf16.mxu0 %v3854_v15 }
 0xbbd   :  { %3133 = vmatpush1.bf16.msra.mxu0 %v3857_v18 }
 0xbbe   :  { %3135 = vmatprep.subr.bf16.mxu0 %v3861_v19 }
 0xbc1   :  { %3137 = vmatpush1.bf16.msra.mxu0 %v3871_v25 }
 0xbc2   :  { %3139 = vmatprep.subr.bf16.mxu0 %v3874_v26 }
 0xbc5   :  { %3141 = vmatpush1.bf16.msra.mxu0 %v3884_v30 }
 0xc8b   :  { %v875_v44 = vpop.f32.mrb[18].mxu0 }
 0xc8c   :  { %v880_v47 = vadd.f32 %v875_v44, %v3950_v59  ;;  %v877_v49 = vpop.f32.mrb[19].mxu0 }
 0xc8d   :  { %v881_v51 = vadd.f32 %v877_v49, %v3948_v56 }
 0xc8e   :  { %v2893_v55 = vmul.f32 -1.442695, %v880_v47 }
 0xc8f   :  { %v2894_v57 = vmul.f32 -1.442695, %v881_v51 }
 0xc90   :  { %3437 = vpow2.f32 %v2893_v55 }
 0xc91   :  { %3439 = vpow2.f32 %v2894_v57 }
 0xc9a   :  { %v3438_v58 = vpop.eup %3437 }
 0xc9b   :  { %v3440_v60 = vpop.eup %3439  ;;  %v888_v61 = vadd.f32 1.0, %v3438_v58 }
 0xc9c   :  { %v889_v2 = vadd.f32 1.0, %v3440_v60 }
 0xc9d   :  { %3441 = vrcp.f32 %v888_v61 }
 0xc9e   :  { %3443 = vrcp.f32 %v889_v2 }
 0xca7   :  { %v3442_v3 = vpop.eup %3441 }
 0xca8   :  { %v3444_v5 = vpop.eup %3443  ;;  %v894_v8 = vmul.f32 2.0, %v3442_v3  ;;  %v896_v20 = vmul.f32 %v3442_v3, %v771_v6 }
 0xca9   :  { %v913_v11 = vmul.f32 2.0, %v3444_v5  ;;  %v915_v54 = vmul.f32 %v3444_v5, %v790_v29 }
 0xcaa   :  { %v2895_v13 = vadd.f32 -1.0, %v894_v8 }
 0xcab   :  { %v2896_v16 = vadd.f32 -1.0, %v913_v11 }
 0xcac   :  { %898 = vrot.lane.b32.xlu0 %v2895_v13, %s3708_s0 }
 0xcad   :  { %917 = vrot.lane.b32.xlu1 %v2896_v16, %s3708_s0 }
 0xd1e   :  { %v899_v56 = vpop.permute.xlu0 %898 }
 0xd1f   :  { %v901_v59 = vmul.f32 %v3442_v3, %v899_v56  ;;  %v918_v17 = vpop.permute.xlu1 %917 }
 0xd20   :  { %v920_v7 = vmul.f32 %v3444_v5, %v918_v17 }
 0xd21   :  { %903 = vrot.lane.b32.xlu0 %v901_v59, %s3709_s3 }
 0xd22   :  { %922 = vrot.lane.b32.xlu1 %v920_v7, %s3709_s3 }
 0xd93   :  { %v904_v21 = vpop.permute.xlu0 %903 }
 0xd94   :  { %v906_v63 = vadd.f32 %v904_v21, %v896_v20  ;;  %v923_v22 = vpop.permute.xlu1 %922 }
 0xd95   :  { %v925_v23 = vadd.f32 %v923_v22, %v915_v54 }
 0xd96   :  { %3445 = vtanh.f32 %v906_v63 }
 0xd97   :  { %3447 = vtanh.f32 %v925_v23 }
 0xda0   :  { %v3446_v24 = vpop.eup %3445 }
 0xda1   :  { %v3448_v27 = vpop.eup %3447  ;;  %909 = vrot.lane.b32.xlu0 %v3446_v24, %s3708_s0 }
 0xda2   :  { %928 = vrot.lane.b32.xlu1 %v3448_v27, %s3708_s0 }
 0xe13   :  { %v910_v50 = vpop.permute.xlu0 %909 }
 0xe14   :  { %v912_v28 = vmul.f32 %v3442_v3, %v910_v50  ;;  %v929_v31 = vpop.permute.xlu1 %928 }
 0xe15   :  { %v931_v46 = vmul.f32 %v3444_v5, %v929_v31 }
 0xe16   :  { %933 = vrot.lane.b32.xlu0 %v912_v28, %s3709_s3 }
 0xe17   :  { %937 = vrot.lane.b32.xlu1 %v931_v46, %s3708_s0 }
 0xe88   :  { %v4079_v6 = vpop.permute.xlu0 %933 }
 0xe89   :  { %v4081_v29 = vpop.permute.xlu1 %937 }
 0xe8a   :  { %v940_v12 = vsel %vm399_vm1, %v4079_v6, %v4081_v29 }
 0xe8b   :  { %2897 = vmatmul.mubr.msk.f32.vlgmr.msra.gmra.mrb[6].mxu1 %vm264_vm2, %v940_v12 }
 0xe8c   :  { %3145 = vmatpush1.bf16.msra.mxu1 %v3847_v10  ;;  %1278 = vmatprep.mubr.f32.mxu1 %v3707_v0 }
 0xe8d   :  { %3147 = vmatprep.subr.bf16.mxu1 %v3854_v15 }
 0xe90   :  { %3149 = vmatpush1.bf16.msra.mxu1 %v3857_v18 }
 0xe91   :  { %3151 = vmatprep.subr.bf16.mxu1 %v3861_v19 }
 0xe94   :  { %3153 = vmatpush1.bf16.msra.mxu1 %v3871_v25 }
 0xe95   :  { %3155 = vmatprep.subr.bf16.mxu1 %v3874_v26 }
 0xe98   :  { %3157 = vmatpush1.bf16.msra.mxu1 %v3884_v30 }
 0xf5e   :  { %v1010_v33 = vpop.f32.mrb[6].mxu1 }
 0xf5f   :  { %v1015_v35 = vadd.f32 %v1010_v33, %v3954_v4  ;;  %v1012_v38 = vpop.f32.mrb[7].mxu1 }
 0xf60   :  { %v1016_v10 = vadd.f32 %v1012_v38, %v3944_v52 }
 0xf61   :  { %v2898_v41 = vmul.f32 -1.442695, %v1015_v35 }
 0xf62   :  { %v2899_v44 = vmul.f32 -1.442695, %v1016_v10 }
 0xf63   :  { %3449 = vpow2.f32 %v2898_v41 }
 0xf64   :  { %3451 = vpow2.f32 %v2899_v44 }
 0xf6d   :  { %v3450_v15 = vpop.eup %3449 }
 0xf6e   :  { %v3452_v18 = vpop.eup %3451  ;;  %v1023_v47 = vadd.f32 1.0, %v3450_v15 }
 0xf6f   :  { %v1024_v19 = vadd.f32 1.0, %v3452_v18 }
 0xf70   :  { %3453 = vrcp.f32 %v1023_v47 }
 0xf71   :  { %3455 = vrcp.f32 %v1024_v19 }
 0xf7a   :  { %v3454_v25 = vpop.eup %3453 }
 0xf7b   :  { %v3456_v26 = vpop.eup %3455  ;;  %v1029_v49 = vmul.f32 2.0, %v3454_v25  ;;  %v1031_v60 = vmul.f32 %v3454_v25, %v906_v63 }
 0xf7c   :  { %v1048_v30 = vmul.f32 2.0, %v3456_v26  ;;  %v1050_v2 = vmul.f32 %v3456_v26, %v925_v23 }
 0xf7d   :  { %v2900_v51 = vadd.f32 -1.0, %v1029_v49 }
 0xf7e   :  { %v2901_v55 = vadd.f32 -1.0, %v1048_v30 }
 0xf7f   :  { %1033 = vrot.lane.b32.xlu0 %v2900_v51, %s3708_s0 }
 0xf80   :  { %1052 = vrot.lane.b32.xlu1 %v2901_v55, %s3708_s0 }
 0xff1   :  { %v1034_v52 = vpop.permute.xlu0 %1033 }
 0xff2   :  { %v1036_v4 = vmul.f32 %v3454_v25, %v1034_v52  ;;  %v1053_v57 = vpop.permute.xlu1 %1052 }
 0xff3   :  { %v1055_v58 = vmul.f32 %v3456_v26, %v1053_v57 }
 0xff4   :  { %1038 = vrot.lane.b32.xlu0 %v1036_v4, %s3709_s3 }
 0xff5   :  { %1057 = vrot.lane.b32.xlu1 %v1055_v58, %s3709_s3 }
0x1066   :  { %v1039_v61 = vpop.permute.xlu0 %1038 }
0x1067   :  { %v1041_v3 = vadd.f32 %v1039_v61, %v1031_v60  ;;  %v1058_v5 = vpop.permute.xlu1 %1057 }
0x1068   :  { %v1060_v8 = vadd.f32 %v1058_v5, %v1050_v2 }
0x1069   :  { %3457 = vtanh.f32 %v1041_v3 }
0x106a   :  { %3459 = vtanh.f32 %v1060_v8 }
0x1073   :  { %v3458_v11 = vpop.eup %3457 }
0x1074   :  { %v3460_v13 = vpop.eup %3459  ;;  %1044 = vrot.lane.b32.xlu0 %v3458_v11, %s3708_s0 }
0x1075   :  { %1063 = vrot.lane.b32.xlu1 %v3460_v13, %s3708_s0 }
0x10e6   :  { %v1045_v16 = vpop.permute.xlu0 %1044 }
0x10e7   :  { %v1047_v56 = vmul.f32 %v3454_v25, %v1045_v16  ;;  %v1064_v59 = vpop.permute.xlu1 %1063 }
0x10e8   :  { %v1066_v17 = vmul.f32 %v3456_v26, %v1064_v59 }
0x10e9   :  { %1068 = vrot.lane.b32.xlu0 %v1047_v56, %s3709_s3 }
0x10ea   :  { %1072 = vrot.lane.b32.xlu1 %v1066_v17, %s3708_s0 }
0x115b   :  { %v4105_v7 = vpop.permute.xlu0 %1068 }
0x115c   :  { %v4107_v20 = vpop.permute.xlu1 %1072 }
0x115d   :  { %v1075_v21 = vsel %vm399_vm1, %v4105_v7, %v4107_v20 }
0x115e   :  { %2902 = vmatmul.mubr.msk.f32.vlgmr.msra.gmra.mrb[20].mxu0 %vm264_vm2, %v1075_v21 }
0x115f   :  { %1469 = vmatprep.mubr.f32.mxu0 %v3707_v0 }
0x1231   :  { %v1145_v54 = vpop.f32.mrb[20].mxu0 }
0x1232   :  { %v1150_v63 = vadd.f32 %v1145_v54, %v3958_v9  ;;  %v1147_v22 = vpop.f32.mrb[21].mxu0 }
0x1233   :  { %v1151_v23 = vadd.f32 %v1147_v22, %v3940_v48 }
0x1234   :  { %v2903_v24 = vmul.f32 -1.442695, %v1150_v63 }
0x1235   :  { %v2904_v27 = vmul.f32 -1.442695, %v1151_v23 }
0x1236   :  { %3461 = vpow2.f32 %v2903_v24 }
0x1237   :  { %3463 = vpow2.f32 %v2904_v27 }
0x1240   :  { %v3462_v50 = vpop.eup %3461 }
0x1241   :  { %v3464_v28 = vpop.eup %3463  ;;  %v1158_v31 = vadd.f32 1.0, %v3462_v50 }
0x1242   :  { %v1159_v46 = vadd.f32 1.0, %v3464_v28 }
0x1243   :  { %3465 = vrcp.f32 %v1158_v31 }
0x1244   :  { %3467 = vrcp.f32 %v1159_v46 }
0x124d   :  { %v3466_v12 = vpop.eup %3465 }
0x124e   :  { %v3468_v33 = vpop.eup %3467  ;;  %v1164_v35 = vmul.f32 2.0, %v3466_v12  ;;  %v1166_v18 = vmul.f32 %v3466_v12, %v1041_v3 }
0x124f   :  { %v1183_v38 = vmul.f32 2.0, %v3468_v33  ;;  %v1185_v19 = vmul.f32 %v3468_v33, %v1060_v8 }
0x1250   :  { %v2905_v10 = vadd.f32 -1.0, %v1164_v35 }
0x1251   :  { %v2906_v41 = vadd.f32 -1.0, %v1183_v38  ;;  %v1354_v38 = vld [vmem:[#allocation5 + $0x8] sm:$0xff] }
0x1252   :  { %1168 = vrot.lane.b32.xlu0 %v2905_v10, %s3708_s0  ;;  %v1356_v10 = vld [vmem:[#allocation5 + $0x18] sm:$0xff] }
0x1253   :  { %1187 = vrot.lane.b32.xlu1 %v2906_v41, %s3708_s0  ;;  %v1353_v41 = vld [vmem:[#allocation5] sm:$0xff] }
0x12c4   :  { %v1169_v48 = vpop.permute.xlu0 %1168 }
0x12c5   :  { %v1171_v9 = vmul.f32 %v3466_v12, %v1169_v48  ;;  %v1188_v44 = vpop.permute.xlu1 %1187  ;;  %v3158_v48 = vpack.c.bf16 %v1356_v10, %v1354_v38  ;;  %v1531_v38 = vld [vmem:[#allocation7 + $0x68] sm:$0xff]  ;;  %v1533_v10 = vld [vmem:[#allocation7 + $0x78] sm:$0xff] }
0x12c6   :  { %v1190_v15 = vmul.f32 %v3468_v33, %v1188_v44  ;;  %v1519_v44 = vld [vmem:[#allocation7 + $0x8] sm:$0xff] }
0x12c7   :  { %1173 = vrot.lane.b32.xlu0 %v1171_v9, %s3709_s3  ;;  %v1355_v9 = vld [vmem:[#allocation5 + $0x10] sm:$0xff]  ;;  %3159 = vmatprep.subr.bf16.mxu0 %v3158_v48  ;;  %v1530_v48 = vld [vmem:[#allocation7 + $0x60] sm:$0xff] }
0x12c8   :  { %1192 = vrot.lane.b32.xlu1 %v1190_v15, %s3709_s3  ;;  %v1521_v15 = vld [vmem:[#allocation7 + $0x18] sm:$0xff] }
0x1339   :  { %v1174_v47 = vpop.permute.xlu0 %1173 }
0x133a   :  { %v1176_v25 = vadd.f32 %v1174_v47, %v1166_v18  ;;  %v1193_v26 = vpop.permute.xlu1 %1192  ;;  %v3160_v18 = vpack.c.bf16 %v1355_v9, %v1353_v41  ;;  %v4149_v47 = vpack.c.bf16 %v1521_v15, %v1519_v44  ;;  %v4170_v41 = vpack.c.bf16 %v1533_v10, %v1531_v38  ;;  %v1532_v9 = vld [vmem:[#allocation7 + $0x70] sm:$0xff] }
0x133b   :  { %v1195_v49 = vadd.f32 %v1193_v26, %v1185_v19  ;;  %v1518_v19 = vld [vmem:[#allocation7] sm:$0xff]  ;;  %v1358_v26 = vld [vmem:[#allocation5 + $0x28] sm:$0xff]  ;;  %v4172_v44 = vpack.c.bf16 %v1532_v9, %v1530_v48 }
0x133c   :  { %3469 = vtanh.f32 %v1176_v25  ;;  %3161 = vmatpush1.bf16.msra.mxu0 %v3160_v18  ;;  %3175 = vmatprep.subr.bf16.mxu1 %v4149_v47 }
0x133d   :  { %3471 = vtanh.f32 %v1195_v49 }
0x1346   :  { %v3470_v30 = vpop.eup %3469 }
0x1347   :  { %v3472_v51 = vpop.eup %3471  ;;  %1179 = vrot.lane.b32.xlu0 %v3470_v30, %s3708_s0  ;;  %v1360_v30 = vld [vmem:[#allocation5 + $0x38] sm:$0xff] }
0x1348   :  { %1198 = vrot.lane.b32.xlu1 %v3472_v51, %s3708_s0  ;;  %v1357_v51 = vld [vmem:[#allocation5 + $0x20] sm:$0xff] }
0x13b9   :  { %v1180_v55 = vpop.permute.xlu0 %1179 }
0x13ba   :  { %v1182_v52 = vmul.f32 %v3466_v12, %v1180_v55  ;;  %v1199_v4 = vpop.permute.xlu1 %1198  ;;  %v1359_v55 = vld [vmem:[#allocation5 + $0x30] sm:$0xff] }
0x13bb   :  { %v1201_v57 = vmul.f32 %v3468_v33, %v1199_v4  ;;  %v3164_v4 = vpack.c.bf16 %v1359_v55, %v1357_v51 }
0x13bc   :  { %1203 = vrot.lane.b32.xlu0 %v1182_v52, %s3709_s3  ;;  %v3162_v52 = vpack.c.bf16 %v1360_v30, %v1358_v26 }
0x13bd   :  { %1207 = vrot.lane.b32.xlu1 %v1201_v57, %s3708_s0  ;;  %v1523_v57 = vld [vmem:[#allocation7 + $0x28] sm:$0xff] }
0x13be   :  { %3163 = vmatprep.subr.bf16.mxu0 %v3162_v52 }
0x13bf   :  { %3165 = vmatpush1.bf16.msra.mxu0 %v3164_v4 }
0x142e   :  { %v4124_v58 = vpop.permute.xlu0 %1203 }
0x142f   :  { %v4126_v60 = vpop.permute.xlu1 %1207 }
0x1430   :  { %v1210_v61 = vsel %vm399_vm1, %v4124_v58, %v4126_v60 }
0x1431   :  { %2907 = vmatmul.mubr.msk.f32.vlgmr.msra.gmra.mrb[8].mxu1 %vm264_vm2, %v1210_v61  ;;  %v1525_v61 = vld [vmem:[#allocation7 + $0x38] sm:$0xff] }
0x1432   :  { %1598 = vmatprep.mubr.f32.mxu1 %v3707_v0 }
0x1504   :  { %v1280_v2 = vpop.f32.mrb[8].mxu1 }
0x1505   :  { %v1285_v3 = vadd.f32 %v1280_v2, %v3962_v14  ;;  %v1282_v5 = vpop.f32.mrb[9].mxu1  ;;  %v1522_v2 = vld [vmem:[#allocation7 + $0x20] sm:$0xff] }
0x1506   :  { %v1286_v8 = vadd.f32 %v1282_v5, %v3934_v43  ;;  %v1524_v5 = vld [vmem:[#allocation7 + $0x30] sm:$0xff] }
0x1507   :  { %v2908_v11 = vmul.f32 -1.442695, %v1285_v3  ;;  %v4155_v3 = vpack.c.bf16 %v1525_v61, %v1523_v57 }
0x1508   :  { %v2909_v13 = vmul.f32 -1.442695, %v1286_v8  ;;  %v1362_v8 = vld [vmem:[#allocation5 + $0x48] sm:$0xff] }
0x1509   :  { %3473 = vpow2.f32 %v2908_v11  ;;  %v1364_v11 = vld [vmem:[#allocation5 + $0x58] sm:$0xff] }
0x150a   :  { %3475 = vpow2.f32 %v2909_v13  ;;  %v4157_v13 = vpack.c.bf16 %v1524_v5, %v1522_v2 }
0x1513   :  { %v3474_v16 = vpop.eup %3473 }
0x1514   :  { %v3476_v56 = vpop.eup %3475  ;;  %v1293_v59 = vadd.f32 1.0, %v3474_v16  ;;  %v3166_v16 = vpack.c.bf16 %v1364_v11, %v1362_v8 }
0x1515   :  { %v1294_v17 = vadd.f32 1.0, %v3476_v56  ;;  %v1361_v56 = vld [vmem:[#allocation5 + $0x40] sm:$0xff] }
0x1516   :  { %3477 = vrcp.f32 %v1293_v59  ;;  %v1363_v59 = vld [vmem:[#allocation5 + $0x50] sm:$0xff]  ;;  %3167 = vmatprep.subr.bf16.mxu0 %v3166_v16 }
0x1517   :  { %3479 = vrcp.f32 %v1294_v17  ;;  %v1527_v17 = vld [vmem:[#allocation7 + $0x48] sm:$0xff] }
0x1520   :  { %v4135_v21 = vpop.eup %3477 }
0x1521   :  { %v4137_v54 = vpop.eup %3479  ;;  %v1299_v63 = vmul.f32 2.0, %v4135_v21  ;;  %v1301_v28 = vmul.f32 %v4135_v21, %v1176_v25  ;;  %v1520_v25 = vld [vmem:[#allocation7 + $0x10] sm:$0xff] }
0x1522   :  { %v1318_v14 = vmul.f32 2.0, %v4137_v54  ;;  %v1320_v46 = vmul.f32 %v4137_v54, %v1195_v49  ;;  %v4151_v49 = vpack.c.bf16 %v1520_v25, %v1518_v19 }
0x1523   :  { %v2910_v22 = vadd.f32 -1.0, %v1299_v63  ;;  %v1529_v63 = vld [vmem:[#allocation7 + $0x58] sm:$0xff] }
0x1524   :  { %v2911_v43 = vadd.f32 -1.0, %v1318_v14  ;;  %3177 = vmatpush1.bf16.msra.mxu1 %v4151_v49  ;;  %v1526_v14 = vld [vmem:[#allocation7 + $0x40] sm:$0xff] }
0x1525   :  { %1303 = vrot.lane.b32.xlu1 %v2910_v22, %s3708_s0  ;;  %3179 = vmatprep.subr.bf16.mxu1 %v4155_v3  ;;  %v1528_v22 = vld [vmem:[#allocation7 + $0x50] sm:$0xff] }
0x1526   :  { %1322 = vrot.lane.b32.xlu0 %v2911_v43, %s3708_s0  ;;  %v3168_v43 = vpack.c.bf16 %v1363_v59, %v1361_v56 }
0x1528   :  { %3181 = vmatpush1.bf16.msra.mxu1 %v4157_v13  ;;  %3169 = vmatpush1.bf16.msra.mxu0 %v3168_v43 }
0x1597   :  { %v1304_v23 = vpop.permute.xlu1 %1303 }
0x1598   :  { %v1306_v24 = vmul.f32 %v4135_v21, %v1304_v23  ;;  %v1323_v27 = vpop.permute.xlu0 %1322  ;;  %v4160_v23 = vpack.c.bf16 %v1529_v63, %v1527_v17 }
0x1599   :  { %v1325_v50 = vmul.f32 %v4137_v54, %v1323_v27  ;;  %v1368_v27 = vld [vmem:[#allocation5 + $0x78] sm:$0xff] }
0x159a   :  { %1308 = vrot.lane.b32.xlu1 %v1306_v24, %s3709_s3  ;;  %v1366_v24 = vld [vmem:[#allocation5 + $0x68] sm:$0xff]  ;;  %3183 = vmatprep.subr.bf16.mxu1 %v4160_v23 }
0x159b   :  { %1327 = vrot.lane.b32.xlu0 %v1325_v50, %s3709_s3 }
0x160c   :  { %v1309_v31 = vpop.permute.xlu1 %1308 }
0x160d   :  { %v1311_v12 = vadd.f32 %v1309_v31, %v1301_v28  ;;  %v1328_v33 = vpop.permute.xlu0 %1327  ;;  %v4163_v28 = vpack.c.bf16 %v1528_v22, %v1526_v14  ;;  %v3170_v31 = vpack.c.bf16 %v1368_v27, %v1366_v24 }
0x160e   :  { %v1330_v35 = vadd.f32 %v1328_v33, %v1320_v46  ;;  %v1365_v46 = vld [vmem:[#allocation5 + $0x60] sm:$0xff] }
0x160f   :  { %3481 = vtanh.f32 %v1311_v12  ;;  %v1367_v12 = vld [vmem:[#allocation5 + $0x70] sm:$0xff]  ;;  %3185 = vmatpush1.bf16.msra.mxu1 %v4163_v28  ;;  %3171 = vmatprep.subr.bf16.mxu0 %v3170_v31 }
0x1610   :  { %3483 = vtanh.f32 %v1330_v35  ;;  %v3172_v35 = vpack.c.bf16 %v1367_v12, %v1365_v46  ;;  %3187 = vmatprep.subr.bf16.mxu1 %v4170_v41 }
0x1612   :  { %3173 = vmatpush1.bf16.msra.mxu0 %v3172_v35 }
0x1613   :  { %3207 = vmatprep.subr.bf16.mxu0 %v4149_v47  ;;  %3189 = vmatpush1.bf16.msra.mxu1 %v4172_v44 }
0x1614   :  { %3191 = vmatprep.subr.bf16.mxu1 %v4149_v47 }
0x1616   :  { %1599 = vmatmul.mubr.f32.vlgmr.msra.gmra.mrb[10].mxu1 %v3707_v0 }
0x1617   :  { %3193 = vmatpush1.bf16.msra.mxu1 %v4151_v49  ;;  %1733 = vmatprep.mubr.f32.mxu1 %v3707_v0 }
0x1618   :  { %3195 = vmatprep.subr.bf16.mxu1 %v4155_v3 }
0x1619   :  { %v3482_v50 = vpop.eup %3481 }
0x161a   :  { %v3484_v33 = vpop.eup %3483  ;;  %1314 = vrot.lane.b32.xlu1 %v3482_v50, %s3708_s0 }
0x161b   :  { %1333 = vrot.lane.b32.xlu0 %v3484_v33, %s3708_s0  ;;  %3197 = vmatpush1.bf16.msra.mxu1 %v4157_v13 }
0x161c   :  { %3199 = vmatprep.subr.bf16.mxu1 %v4160_v23 }
0x161f   :  { %3201 = vmatpush1.bf16.msra.mxu1 %v4163_v28 }
0x1620   :  { %3203 = vmatprep.subr.bf16.mxu1 %v4170_v41 }
0x1623   :  { %3205 = vmatpush1.bf16.msra.mxu1 %v4172_v44 }
0x1624   :  { %3223 = vmatprep.subr.bf16.mxu1 %v4149_v47 }
0x168c   :  { %v1315_v15 = vpop.permute.xlu1 %1314 }
0x168d   :  { %v1317_v18 = vmul.f32 %v4135_v21, %v1315_v15  ;;  %v1334_v19 = vpop.permute.xlu0 %1333 }
0x168e   :  { %v1336_v25 = vmul.f32 %v4137_v54, %v1334_v19  ;;  %v1342_v54 = vsel %vm399_vm1, %v3999_v45, %v4126_v60  ;;  %v1344_v45 = vsel %vm399_vm1, %v4053_v32, %v4081_v29  ;;  %v1346_v32 = vsel %vm399_vm1, %v4105_v7, %v4028_v42  ;;  %v1369_v7 = vld [vmem:[%s4506_s6] sm:$0x3]  ;;  %s3710_s6 = smov 96  }
0x168f   :  { %1349 = vrot.lane.b32.xlu1 %v1317_v18, %s3709_s3  ;;  %v1347_v29 = vsel %vm399_vm1, %v4124_v58, %v4001_v53  ;;  %v1374_v53 = vrot.slane %v1369_v7, %v102_v40  ;;  %v1378_v58 = vrot.slane %v1369_v7, %v106_v37 }
0x1690   :  { %1338 = vrot.lane.b32.xlu0 %v1336_v25, %s3708_s0 }
0x16e9   :  { %v1600_v42 = vpop.f32.mrb[10].mxu1 }
0x1702   :  { %v1339_v26 = vpop.permute.xlu0 %1338 }
0x1703   :  { %v1341_v21 = vsel %vm399_vm1, %v3972_v62, %v1339_v26  ;;  %v1343_v62 = vsel %vm399_vm1, %v4026_v39, %v4107_v20  ;;  %v1345_v39 = vsel %vm399_vm1, %v4079_v6, %v4055_v34  ;;  %v1350_v20 = vpop.permute.xlu1 %1349  ;;  %v1602_v6 = vpop.f32.mrb[11].mxu1 }
0x1704   :  { %2912 = vmatmul.mubr.msk.f32.vlgmr.msra.gmra.mrb[22].mxu0 %vm264_vm2, %v1341_v21  ;;  %v1352_v34 = vsel %vm399_vm1, %v1350_v20, %v3974_v1 }
0x1705   :  { %1475 = vmatprep.mubr.f32.mxu0 %v3707_v0  ;;  %3209 = vmatpush1.bf16.msra.mxu0 %v4151_v49 }
0x1706   :  { %3211 = vmatprep.subr.bf16.mxu0 %v4155_v3 }
0x1708   :  { %2913 = vmatmul.mubr.msk.f32.gmra.mrb[24].mxu0 %vm264_vm2, %v1342_v54 }
0x1709   :  { %1481 = vmatprep.mubr.f32.mxu0 %v3707_v0  ;;  %3213 = vmatpush1.bf16.msra.mxu0 %v4157_v13 }
0x170a   :  { %3215 = vmatprep.subr.bf16.mxu0 %v4160_v23 }
0x170c   :  { %2914 = vmatmul.mubr.msk.f32.gmra.mrb[26].mxu0 %vm264_vm2, %v1343_v62 }
0x170d   :  { %1487 = vmatprep.mubr.f32.mxu0 %v3707_v0  ;;  %3217 = vmatpush1.bf16.msra.mxu0 %v4163_v28 }
0x170e   :  { %3219 = vmatprep.subr.bf16.mxu0 %v4170_v41 }
0x1710   :  { %2915 = vmatmul.mubr.msk.f32.gmra.mrb[28].mxu0 %vm264_vm2, %v1344_v45 }
0x1711   :  { %1493 = vmatprep.mubr.f32.mxu0 %v3707_v0  ;;  %3221 = vmatpush1.bf16.msra.mxu0 %v4172_v44 }
0x1712   :  { %3239 = vmatprep.subr.bf16.mxu0 %v4149_v47 }
0x1714   :  { %2916 = vmatmul.mubr.msk.f32.gmra.mrb[30].mxu0 %vm264_vm2, %v1345_v39 }
0x1715   :  { %1499 = vmatprep.mubr.f32.mxu0 %v3707_v0 }
0x1718   :  { %2917 = vmatmul.mubr.msk.f32.gmra.mrb[32].mxu0 %vm264_vm2, %v1346_v32 }
0x1719   :  { %1505 = vmatprep.mubr.f32.mxu0 %v3707_v0 }
0x171c   :  { %2918 = vmatmul.mubr.msk.f32.gmra.mrb[34].mxu0 %vm264_vm2, %v1347_v29 }
0x171d   :  { %1511 = vmatprep.mubr.f32.mxu0 %v3707_v0 }
0x1720   :  { %2919 = vmatmul.mubr.msk.f32.gmra.mrb[36].mxu0 %vm264_vm2, %v1352_v34 }
0x1721   :  { %1868 = vmatprep.mubr.f32.mxu0 %v3707_v0 }
0x17d7   :  { %v1471_v60 = vpop.f32.mrb[22].mxu0 }
0x17d8   :  { %v1472_v30 = vadd.f32 %v1471_v60, %v1374_v53  ;;  %v1473_v51 = vpop.f32.mrb[23].mxu0 }
0x17d9   :  { %v4244_v1 = vadd.f32 %v1473_v51, %v1378_v58 }
0x17da   :  { %v1605_v55 = vadd.f32 %v1600_v42, %v1472_v30 }
0x17db   :  { %v1477_v52 = vpop.f32.mrb[24].mxu0 }
0x17dc   :  { %v2920_v4 = vmul.f32 -1.442695, %v1605_v55  ;;  %v4246_v57 = vadd.f32 %v1477_v52, %v1374_v53  ;;  %v1479_v61 = vpop.f32.mrb[25].mxu0 }
0x17dd   :  { %v4248_v2 = vadd.f32 %v1479_v61, %v1378_v58 }
0x17de   :  { %3485 = vpow2.f32 %v2920_v4 }
0x17df   :  { %v1483_v5 = vpop.f32.mrb[26].mxu0 }
0x17e0   :  { %v4250_v8 = vadd.f32 %v1483_v5, %v1374_v53  ;;  %v1485_v40 = vpop.f32.mrb[27].mxu0 }
0x17e1   :  { %v4252_v36 = vadd.f32 %v1485_v40, %v1378_v58 }
0x17e3   :  { %v1489_v37 = vpop.f32.mrb[28].mxu0 }
0x17e4   :  { %v4254_v11 = vadd.f32 %v1489_v37, %v1374_v53  ;;  %v1491_v16 = vpop.f32.mrb[29].mxu0 }
0x17e5   :  { %v4256_v56 = vadd.f32 %v1491_v16, %v1378_v58 }
0x17e7   :  { %v1495_v59 = vpop.f32.mrb[30].mxu0 }
0x17e8   :  { %v3486_v17 = vpop.eup %3485  ;;  %v4258_v63 = vadd.f32 %v1495_v59, %v1374_v53  ;;  %v1497_v14 = vpop.f32.mrb[31].mxu0 }
0x17e9   :  { %v1613_v22 = vadd.f32 1.0, %v3486_v17  ;;  %v4260_v43 = vadd.f32 %v1497_v14, %v1378_v58 }
0x17eb   :  { %3487 = vrcp.f32 %v1613_v22  ;;  %v1501_v24 = vpop.f32.mrb[32].mxu0 }
0x17ec   :  { %v4262_v27 = vadd.f32 %v1501_v24, %v1374_v53  ;;  %v1503_v50 = vpop.f32.mrb[33].mxu0 }
0x17ed   :  { %v4264_v31 = vadd.f32 %v1503_v50, %v1378_v58 }
0x17ef   :  { %v1507_v46 = vpop.f32.mrb[34].mxu0 }
0x17f0   :  { %v4266_v12 = vadd.f32 %v1507_v46, %v1374_v53  ;;  %v1509_v33 = vpop.f32.mrb[35].mxu0 }
0x17f1   :  { %v1510_v35 = vadd.f32 %v1509_v33, %v1378_v58 }
0x17f3   :  { %v1513_v38 = vpop.f32.mrb[36].mxu0 }
0x17f4   :  { %v4268_v10 = vadd.f32 %v1513_v38, %v1374_v53  ;;  %v1515_v48 = vpop.f32.mrb[37].mxu0 }
0x17f5   :  { %v3488_v9 = vpop.eup %3487  ;;  %v1516_v15 = vadd.f32 %v1515_v48, %v1378_v58 }
0x17f6   :  { %v1619_v18 = vmul.f32 2.0, %v3488_v9  ;;  %v1621_v42 = vmul.f32 0.0, %v3488_v9 }
0x17f7   :  { %v1606_v19 = vadd.f32 %v1602_v6, %v1516_v15 }
0x17f8   :  { %v2922_v25 = vadd.f32 -1.0, %v1619_v18 }
0x17f9   :  { %v2921_v26 = vmul.f32 -1.442695, %v1606_v19 }
0x17fa   :  { %1623 = vrot.lane.b32.xlu0 %v2922_v25, %s3708_s0 }
0x17fb   :  { %3489 = vpow2.f32 %v2921_v26 }
0x1805   :  { %v3490_v21 = vpop.eup %3489 }
0x1806   :  { %v1614_v54 = vadd.f32 1.0, %v3490_v21 }
0x1808   :  { %3491 = vrcp.f32 %v1614_v54 }
0x1812   :  { %v3492_v62 = vpop.eup %3491 }
0x1813   :  { %v1638_v45 = vmul.f32 2.0, %v3492_v62  ;;  %v1640_v58 = vmul.f32 0.0, %v3492_v62 }
0x1815   :  { %v2923_v39 = vadd.f32 -1.0, %v1638_v45 }
0x1817   :  { %1642 = vrot.lane.b32.xlu1 %v2923_v39, %s3708_s0 }
0x186c   :  { %v1624_v32 = vpop.permute.xlu0 %1623 }
0x186d   :  { %v1626_v29 = vmul.f32 %v3488_v9, %v1624_v32 }
0x186f   :  { %1628 = vrot.lane.b32.xlu0 %v1626_v29, %s3709_s3 }
0x1889   :  { %v1643_v20 = vpop.permute.xlu1 %1642 }
0x188a   :  { %v1645_v34 = vmul.f32 %v3492_v62, %v1643_v20 }
0x188c   :  { %1647 = vrot.lane.b32.xlu1 %v1645_v34, %s3709_s3 }
0x18e1   :  { %v1629_v6 = vpop.permute.xlu0 %1628 }
0x18e2   :  { %v1631_v7 = vadd.f32 %v1629_v6, %v1621_v42 }
0x18e4   :  { %3493 = vtanh.f32 %v1631_v7 }
0x18ee   :  { %v3494_v53 = vpop.eup %3493 }
0x18ef   :  { %1634 = vrot.lane.b32.xlu0 %v3494_v53, %s3708_s0 }
0x18fe   :  { %v1648_v60 = vpop.permute.xlu1 %1647 }
0x18ff   :  { %v1650_v30 = vadd.f32 %v1648_v60, %v1640_v58 }
0x1901   :  { %3495 = vtanh.f32 %v1650_v30 }
0x190b   :  { %v3496_v51 = vpop.eup %3495 }
0x190c   :  { %1653 = vrot.lane.b32.xlu1 %v3496_v51, %s3708_s0 }
0x1961   :  { %v1635_v55 = vpop.permute.xlu0 %1634 }
0x1962   :  { %v1637_v52 = vmul.f32 %v3488_v9, %v1635_v55 }
0x1964   :  { %1658 = vrot.lane.b32.xlu0 %v1637_v52, %s3709_s3 }
0x197e   :  { %v1654_v4 = vpop.permute.xlu1 %1653 }
0x197f   :  { %v4277_v61 = vmul.f32 %v3492_v62, %v1654_v4 }
0x1981   :  { %1662 = vrot.lane.b32.xlu1 %v4277_v61, %s3708_s0 }
0x19d6   :  { %v4281_v5 = vpop.permute.xlu0 %1658 }
0x19f3   :  { %v1663_v40 = vpop.permute.xlu1 %1662 }
0x19f4   :  { %v1665_v37 = vsel %vm399_vm1, %v4281_v5, %v1663_v40 }
0x19f5   :  { %2924 = vmatmul.mubr.msk.f32.vlgmr.msra.gmra.mrb[12].mxu1 %vm264_vm2, %v1665_v37 }
0x19f6   :  { %3225 = vmatpush1.bf16.msra.mxu1 %v4151_v49  ;;  %2003 = vmatprep.mubr.f32.mxu1 %v3707_v0 }
0x19f7   :  { %3227 = vmatprep.subr.bf16.mxu1 %v4155_v3 }
0x19fa   :  { %3229 = vmatpush1.bf16.msra.mxu1 %v4157_v13 }
0x19fb   :  { %3231 = vmatprep.subr.bf16.mxu1 %v4160_v23 }
0x19fe   :  { %3233 = vmatpush1.bf16.msra.mxu1 %v4163_v28 }
0x19ff   :  { %3235 = vmatprep.subr.bf16.mxu1 %v4170_v41 }
0x1a02   :  { %3237 = vmatpush1.bf16.msra.mxu1 %v4172_v44 }
0x1a03   :  { %3255 = vmatprep.subr.bf16.mxu1 %v4149_v47 }
0x1ac8   :  { %v1735_v16 = vpop.f32.mrb[12].mxu1 }
0x1ac9   :  { %v1740_v59 = vadd.f32 %v1735_v16, %v4246_v57  ;;  %v1737_v17 = vpop.f32.mrb[13].mxu1 }
0x1aca   :  { %v1741_v14 = vadd.f32 %v1737_v17, %v1510_v35 }
0x1acb   :  { %v2925_v22 = vmul.f32 -1.442695, %v1740_v59 }
0x1acc   :  { %v2926_v24 = vmul.f32 -1.442695, %v1741_v14 }
0x1acd   :  { %3497 = vpow2.f32 %v2925_v22 }
0x1ace   :  { %3499 = vpow2.f32 %v2926_v24 }
0x1ad7   :  { %v3498_v50 = vpop.eup %3497 }
0x1ad8   :  { %v3500_v46 = vpop.eup %3499  ;;  %v1748_v33 = vadd.f32 1.0, %v3498_v50 }
0x1ad9   :  { %v1749_v38 = vadd.f32 1.0, %v3500_v46 }
0x1ada   :  { %3501 = vrcp.f32 %v1748_v33 }
0x1adb   :  { %3503 = vrcp.f32 %v1749_v38 }
0x1ae4   :  { %v3502_v48 = vpop.eup %3501 }
0x1ae5   :  { %v3504_v9 = vpop.eup %3503  ;;  %v1754_v15 = vmul.f32 2.0, %v3502_v48  ;;  %v1756_v54 = vmul.f32 %v3502_v48, %v1631_v7 }
0x1ae6   :  { %v1773_v18 = vmul.f32 2.0, %v3504_v9  ;;  %v1775_v45 = vmul.f32 %v3504_v9, %v1650_v30 }
0x1ae7   :  { %v2927_v19 = vadd.f32 -1.0, %v1754_v15 }
0x1ae8   :  { %v2928_v25 = vadd.f32 -1.0, %v1773_v18 }
0x1ae9   :  { %1758 = vrot.lane.b32.xlu0 %v2927_v19, %s3708_s0 }
0x1aea   :  { %1777 = vrot.lane.b32.xlu1 %v2928_v25, %s3708_s0 }
0x1b5b   :  { %v1759_v57 = vpop.permute.xlu0 %1758 }
0x1b5c   :  { %v1761_v35 = vmul.f32 %v3502_v48, %v1759_v57  ;;  %v1778_v26 = vpop.permute.xlu1 %1777 }
0x1b5d   :  { %v1780_v21 = vmul.f32 %v3504_v9, %v1778_v26 }
0x1b5e   :  { %1763 = vrot.lane.b32.xlu0 %v1761_v35, %s3709_s3 }
0x1b5f   :  { %1782 = vrot.lane.b32.xlu1 %v1780_v21, %s3709_s3 }
0x1bd0   :  { %v1764_v62 = vpop.permute.xlu0 %1763 }
0x1bd1   :  { %v1766_v39 = vadd.f32 %v1764_v62, %v1756_v54  ;;  %v1783_v32 = vpop.permute.xlu1 %1782 }
0x1bd2   :  { %v1785_v29 = vadd.f32 %v1783_v32, %v1775_v45 }
0x1bd3   :  { %3505 = vtanh.f32 %v1766_v39 }
0x1bd4   :  { %3507 = vtanh.f32 %v1785_v29 }
0x1bdd   :  { %v3506_v20 = vpop.eup %3505 }
0x1bde   :  { %v3508_v34 = vpop.eup %3507  ;;  %1769 = vrot.lane.b32.xlu0 %v3506_v20, %s3708_s0 }
0x1bdf   :  { %1788 = vrot.lane.b32.xlu1 %v3508_v34, %s3708_s0 }
0x1c50   :  { %v1770_v42 = vpop.permute.xlu0 %1769 }
0x1c51   :  { %v4302_v6 = vmul.f32 %v3502_v48, %v1770_v42  ;;  %v1789_v53 = vpop.permute.xlu1 %1788 }
0x1c52   :  { %v1791_v58 = vmul.f32 %v3504_v9, %v1789_v53 }
0x1c53   :  { %1793 = vrot.lane.b32.xlu0 %v4302_v6, %s3709_s3 }
0x1c54   :  { %1797 = vrot.lane.b32.xlu1 %v1791_v58, %s3708_s0 }
0x1cc5   :  { %v1794_v7 = vpop.permute.xlu0 %1793 }
0x1cc6   :  { %v4307_v60 = vpop.permute.xlu1 %1797 }
0x1cc7   :  { %v1800_v30 = vsel %vm399_vm1, %v1794_v7, %v4307_v60 }
0x1cc8   :  { %2929 = vmatmul.mubr.msk.f32.vlgmr.msra.gmra.mrb[38].mxu0 %vm264_vm2, %v1800_v30 }
0x1cc9   :  { %3241 = vmatpush1.bf16.msra.mxu0 %v4151_v49  ;;  %2138 = vmatprep.mubr.f32.mxu0 %v3707_v0 }
0x1cca   :  { %3243 = vmatprep.subr.bf16.mxu0 %v4155_v3 }
0x1ccd   :  { %3245 = vmatpush1.bf16.msra.mxu0 %v4157_v13 }
0x1cce   :  { %3247 = vmatprep.subr.bf16.mxu0 %v4160_v23 }
0x1cd1   :  { %3249 = vmatpush1.bf16.msra.mxu0 %v4163_v28 }
0x1cd2   :  { %3251 = vmatprep.subr.bf16.mxu0 %v4170_v41 }
0x1cd5   :  { %3253 = vmatpush1.bf16.msra.mxu0 %v4172_v44 }
0x1cd6   :  { %3271 = vmatprep.subr.bf16.mxu0 %v4149_v47 }
0x1d9b   :  { %v1870_v51 = vpop.f32.mrb[38].mxu0 }
0x1d9c   :  { %v1875_v55 = vadd.f32 %v1870_v51, %v4250_v8  ;;  %v1872_v52 = vpop.f32.mrb[39].mxu0 }
0x1d9d   :  { %v1876_v4 = vadd.f32 %v1872_v52, %v4264_v31 }
0x1d9e   :  { %v2930_v40 = vmul.f32 -1.442695, %v1875_v55 }
0x1d9f   :  { %v2931_v37 = vmul.f32 -1.442695, %v1876_v4 }
0x1da0   :  { %3509 = vpow2.f32 %v2930_v40 }
0x1da1   :  { %3511 = vpow2.f32 %v2931_v37 }
0x1daa   :  { %v3510_v16 = vpop.eup %3509 }
0x1dab   :  { %v3512_v59 = vpop.eup %3511  ;;  %v1883_v17 = vadd.f32 1.0, %v3510_v16 }
0x1dac   :  { %v1884_v14 = vadd.f32 1.0, %v3512_v59 }
0x1dad   :  { %3513 = vrcp.f32 %v1883_v17 }
0x1dae   :  { %3515 = vrcp.f32 %v1884_v14 }
0x1db7   :  { %v3514_v22 = vpop.eup %3513 }
0x1db8   :  { %v3516_v24 = vpop.eup %3515  ;;  %v1889_v50 = vmul.f32 2.0, %v3514_v22  ;;  %v1891_v15 = vmul.f32 %v3514_v22, %v1766_v39 }
0x1db9   :  { %v1908_v46 = vmul.f32 2.0, %v3516_v24  ;;  %v1910_v19 = vmul.f32 %v3516_v24, %v1785_v29 }
0x1dba   :  { %v2932_v33 = vadd.f32 -1.0, %v1889_v50 }
0x1dbb   :  { %v2933_v38 = vadd.f32 -1.0, %v1908_v46 }
0x1dbc   :  { %1893 = vrot.lane.b32.xlu0 %v2932_v33, %s3708_s0 }
0x1dbd   :  { %1912 = vrot.lane.b32.xlu1 %v2933_v38, %s3708_s0 }
0x1e2e   :  { %v1894_v8 = vpop.permute.xlu0 %1893 }
0x1e2f   :  { %v1896_v31 = vmul.f32 %v3514_v22, %v1894_v8  ;;  %v1913_v48 = vpop.permute.xlu1 %1912 }
0x1e30   :  { %v1915_v9 = vmul.f32 %v3516_v24, %v1913_v48 }
0x1e31   :  { %1898 = vrot.lane.b32.xlu0 %v1896_v31, %s3709_s3 }
0x1e32   :  { %1917 = vrot.lane.b32.xlu1 %v1915_v9, %s3709_s3 }
0x1ea3   :  { %v1899_v18 = vpop.permute.xlu0 %1898 }
0x1ea4   :  { %v1901_v25 = vadd.f32 %v1899_v18, %v1891_v15  ;;  %v1918_v57 = vpop.permute.xlu1 %1917 }
0x1ea5   :  { %v1920_v35 = vadd.f32 %v1918_v57, %v1910_v19 }
0x1ea6   :  { %3517 = vtanh.f32 %v1901_v25 }
0x1ea7   :  { %3519 = vtanh.f32 %v1920_v35 }
0x1eb0   :  { %v3518_v26 = vpop.eup %3517 }
0x1eb1   :  { %v3520_v21 = vpop.eup %3519  ;;  %1904 = vrot.lane.b32.xlu0 %v3518_v26, %s3708_s0 }
0x1eb2   :  { %1923 = vrot.lane.b32.xlu1 %v3520_v21, %s3708_s0 }
0x1f23   :  { %v1905_v54 = vpop.permute.xlu0 %1904 }
0x1f24   :  { %v1907_v62 = vmul.f32 %v3514_v22, %v1905_v54  ;;  %v1924_v45 = vpop.permute.xlu1 %1923 }
0x1f25   :  { %v4329_v32 = vmul.f32 %v3516_v24, %v1924_v45 }
0x1f26   :  { %1928 = vrot.lane.b32.xlu0 %v1907_v62, %s3709_s3 }
0x1f27   :  { %1932 = vrot.lane.b32.xlu1 %v4329_v32, %s3708_s0 }
0x1f98   :  { %v4334_v39 = vpop.permute.xlu0 %1928 }
0x1f99   :  { %v1933_v29 = vpop.permute.xlu1 %1932 }
0x1f9a   :  { %v1935_v20 = vsel %vm399_vm1, %v4334_v39, %v1933_v29 }
0x1f9b   :  { %2934 = vmatmul.mubr.msk.f32.vlgmr.msra.gmra.mrb[14].mxu1 %vm264_vm2, %v1935_v20 }
0x1f9c   :  { %3257 = vmatpush1.bf16.msra.mxu1 %v4151_v49  ;;  %2273 = vmatprep.mubr.f32.mxu1 %v3707_v0 }
0x1f9d   :  { %3259 = vmatprep.subr.bf16.mxu1 %v4155_v3 }
0x1fa0   :  { %3261 = vmatpush1.bf16.msra.mxu1 %v4157_v13 }
0x1fa1   :  { %3263 = vmatprep.subr.bf16.mxu1 %v4160_v23 }
0x1fa4   :  { %3265 = vmatpush1.bf16.msra.mxu1 %v4163_v28 }
0x1fa5   :  { %3267 = vmatprep.subr.bf16.mxu1 %v4170_v41 }
0x1fa8   :  { %3269 = vmatpush1.bf16.msra.mxu1 %v4172_v44 }
0x1fa9   :  { %3287 = vmatprep.subr.bf16.mxu1 %v4149_v47 }
0x206e   :  { %v2005_v34 = vpop.f32.mrb[14].mxu1 }
0x206f   :  { %v2010_v42 = vadd.f32 %v2005_v34, %v4254_v11  ;;  %v2007_v53 = vpop.f32.mrb[15].mxu1 }
0x2070   :  { %v2011_v58 = vadd.f32 %v2007_v53, %v4260_v43 }
0x2071   :  { %v2935_v7 = vmul.f32 -1.442695, %v2010_v42 }
0x2072   :  { %v2936_v30 = vmul.f32 -1.442695, %v2011_v58 }
0x2073   :  { %3521 = vpow2.f32 %v2935_v7 }
0x2074   :  { %3523 = vpow2.f32 %v2936_v30 }
0x207d   :  { %v3522_v51 = vpop.eup %3521 }
0x207e   :  { %v3524_v55 = vpop.eup %3523  ;;  %v2018_v52 = vadd.f32 1.0, %v3522_v51 }
0x207f   :  { %v2019_v4 = vadd.f32 1.0, %v3524_v55 }
0x2080   :  { %3525 = vrcp.f32 %v2018_v52 }
0x2081   :  { %3527 = vrcp.f32 %v2019_v4 }
0x208a   :  { %v3526_v40 = vpop.eup %3525 }
0x208b   :  { %v3528_v37 = vpop.eup %3527  ;;  %v2024_v16 = vmul.f32 2.0, %v3526_v40  ;;  %v2026_v24 = vmul.f32 %v3526_v40, %v1901_v25 }
0x208c   :  { %v2043_v47 = vmul.f32 2.0, %v3528_v37  ;;  %v2045_v46 = vmul.f32 %v3528_v37, %v1920_v35 }
0x208d   :  { %v2937_v59 = vadd.f32 -1.0, %v2024_v16 }
0x208e   :  { %v2938_v17 = vadd.f32 -1.0, %v2043_v47 }
0x208f   :  { %2028 = vrot.lane.b32.xlu0 %v2937_v59, %s3708_s0 }
0x2090   :  { %2047 = vrot.lane.b32.xlu1 %v2938_v17, %s3708_s0 }
0x2101   :  { %v2029_v11 = vpop.permute.xlu0 %2028 }
0x2102   :  { %v2031_v43 = vmul.f32 %v3526_v40, %v2029_v11  ;;  %v2048_v14 = vpop.permute.xlu1 %2047 }
0x2103   :  { %v2050_v22 = vmul.f32 %v3528_v37, %v2048_v14 }
0x2104   :  { %2033 = vrot.lane.b32.xlu0 %v2031_v43, %s3709_s3 }
0x2105   :  { %2052 = vrot.lane.b32.xlu1 %v2050_v22, %s3709_s3 }
0x2176   :  { %v2034_v50 = vpop.permute.xlu0 %2033 }
0x2177   :  { %v2036_v33 = vadd.f32 %v2034_v50, %v2026_v24  ;;  %v2053_v38 = vpop.permute.xlu1 %2052 }
0x2178   :  { %v2055_v8 = vadd.f32 %v2053_v38, %v2045_v46 }
0x2179   :  { %3529 = vtanh.f32 %v2036_v33 }
0x217a   :  { %3531 = vtanh.f32 %v2055_v8 }
0x2183   :  { %v3530_v31 = vpop.eup %3529 }
0x2184   :  { %v3532_v48 = vpop.eup %3531  ;;  %2039 = vrot.lane.b32.xlu0 %v3530_v31, %s3708_s0 }
0x2185   :  { %2058 = vrot.lane.b32.xlu1 %v3532_v48, %s3708_s0 }
0x21f6   :  { %v2040_v9 = vpop.permute.xlu0 %2039 }
0x21f7   :  { %v4356_v15 = vmul.f32 %v3526_v40, %v2040_v9  ;;  %v2059_v18 = vpop.permute.xlu1 %2058 }
0x21f8   :  { %v2061_v19 = vmul.f32 %v3528_v37, %v2059_v18 }
0x21f9   :  { %2063 = vrot.lane.b32.xlu0 %v4356_v15, %s3709_s3 }
0x21fa   :  { %2067 = vrot.lane.b32.xlu1 %v2061_v19, %s3708_s0 }
0x226b   :  { %v2064_v25 = vpop.permute.xlu0 %2063 }
0x226c   :  { %v4361_v57 = vpop.permute.xlu1 %2067 }
0x226d   :  { %v2070_v35 = vsel %vm399_vm1, %v2064_v25, %v4361_v57 }
0x226e   :  { %2939 = vmatmul.mubr.msk.f32.vlgmr.msra.gmra.mrb[40].mxu0 %vm264_vm2, %v2070_v35 }
0x226f   :  { %3273 = vmatpush1.bf16.msra.mxu0 %v4151_v49  ;;  %2408 = vmatprep.mubr.f32.mxu0 %v3707_v0 }
0x2270   :  { %3275 = vmatprep.subr.bf16.mxu0 %v4155_v3 }
0x2273   :  { %3277 = vmatpush1.bf16.msra.mxu0 %v4157_v13 }
0x2274   :  { %3279 = vmatprep.subr.bf16.mxu0 %v4160_v23 }
0x2277   :  { %3281 = vmatpush1.bf16.msra.mxu0 %v4163_v28 }
0x2278   :  { %3283 = vmatprep.subr.bf16.mxu0 %v4170_v41 }
0x227b   :  { %3285 = vmatpush1.bf16.msra.mxu0 %v4172_v44 }
0x2341   :  { %v2140_v26 = vpop.f32.mrb[40].mxu0 }
0x2342   :  { %v2145_v21 = vadd.f32 %v2140_v26, %v4258_v63  ;;  %v2142_v54 = vpop.f32.mrb[41].mxu0 }
0x2343   :  { %v2146_v62 = vadd.f32 %v2142_v54, %v4256_v56 }
0x2344   :  { %v2940_v45 = vmul.f32 -1.442695, %v2145_v21 }
0x2345   :  { %v2941_v29 = vmul.f32 -1.442695, %v2146_v62 }
0x2346   :  { %3533 = vpow2.f32 %v2940_v45 }
0x2347   :  { %3535 = vpow2.f32 %v2941_v29 }
0x2350   :  { %v3534_v20 = vpop.eup %3533 }
0x2351   :  { %v3536_v34 = vpop.eup %3535  ;;  %v2153_v42 = vadd.f32 1.0, %v3534_v20 }
0x2352   :  { %v2154_v53 = vadd.f32 1.0, %v3536_v34 }
0x2353   :  { %3537 = vrcp.f32 %v2153_v42 }
0x2354   :  { %3539 = vrcp.f32 %v2154_v53 }
0x235d   :  { %v3538_v58 = vpop.eup %3537 }
0x235e   :  { %v3540_v7 = vpop.eup %3539  ;;  %v2159_v30 = vmul.f32 2.0, %v3538_v58  ;;  %v2161_v37 = vmul.f32 %v3538_v58, %v2036_v33 }
0x235f   :  { %v2178_v51 = vmul.f32 2.0, %v3540_v7  ;;  %v2180_v47 = vmul.f32 %v3540_v7, %v2055_v8 }
0x2360   :  { %v2942_v55 = vadd.f32 -1.0, %v2159_v30 }
0x2361   :  { %v2943_v52 = vadd.f32 -1.0, %v2178_v51 }
0x2362   :  { %2163 = vrot.lane.b32.xlu0 %v2942_v55, %s3708_s0 }
0x2363   :  { %2182 = vrot.lane.b32.xlu1 %v2943_v52, %s3708_s0 }
0x23d4   :  { %v2164_v56 = vpop.permute.xlu0 %2163 }
0x23d5   :  { %v2166_v63 = vmul.f32 %v3538_v58, %v2164_v56  ;;  %v2183_v4 = vpop.permute.xlu1 %2182 }
0x23d6   :  { %v2185_v40 = vmul.f32 %v3540_v7, %v2183_v4 }
0x23d7   :  { %2168 = vrot.lane.b32.xlu0 %v2166_v63, %s3709_s3 }
0x23d8   :  { %2187 = vrot.lane.b32.xlu1 %v2185_v40, %s3709_s3 }
0x2449   :  { %v2169_v16 = vpop.permute.xlu0 %2168 }
0x244a   :  { %v2171_v59 = vadd.f32 %v2169_v16, %v2161_v37  ;;  %v2188_v17 = vpop.permute.xlu1 %2187 }
0x244b   :  { %v2190_v11 = vadd.f32 %v2188_v17, %v2180_v47 }
0x244c   :  { %3541 = vtanh.f32 %v2171_v59 }
0x244d   :  { %3543 = vtanh.f32 %v2190_v11 }
0x2456   :  { %v3542_v43 = vpop.eup %3541 }
0x2457   :  { %v3544_v14 = vpop.eup %3543  ;;  %2174 = vrot.lane.b32.xlu0 %v3542_v43, %s3708_s0 }
0x2458   :  { %2193 = vrot.lane.b32.xlu1 %v3544_v14, %s3708_s0 }
0x24c9   :  { %v2175_v22 = vpop.permute.xlu0 %2174 }
0x24ca   :  { %v2177_v24 = vmul.f32 %v3538_v58, %v2175_v22  ;;  %v2194_v50 = vpop.permute.xlu1 %2193 }
0x24cb   :  { %v4382_v46 = vmul.f32 %v3540_v7, %v2194_v50 }
0x24cc   :  { %2198 = vrot.lane.b32.xlu0 %v2177_v24, %s3709_s3 }
0x24cd   :  { %2202 = vrot.lane.b32.xlu1 %v4382_v46, %s3708_s0 }
0x253e   :  { %v4387_v33 = vpop.permute.xlu0 %2198 }
0x253f   :  { %v2203_v38 = vpop.permute.xlu1 %2202 }
0x2540   :  { %v2205_v8 = vsel %vm399_vm1, %v4387_v33, %v2203_v38 }
0x2541   :  { %2944 = vmatmul.mubr.msk.f32.vlgmr.msra.gmra.mrb[16].mxu1 %vm264_vm2, %v2205_v8 }
0x2542   :  { %3289 = vmatpush1.bf16.msra.mxu1 %v4151_v49  ;;  %2543 = vmatprep.mubr.f32.mxu1 %v3707_v0 }
0x2543   :  { %3291 = vmatprep.subr.bf16.mxu1 %v4155_v3 }
0x2546   :  { %3293 = vmatpush1.bf16.msra.mxu1 %v4157_v13 }
0x2547   :  { %3295 = vmatprep.subr.bf16.mxu1 %v4160_v23 }
0x254a   :  { %3297 = vmatpush1.bf16.msra.mxu1 %v4163_v28 }
0x254b   :  { %3299 = vmatprep.subr.bf16.mxu1 %v4170_v41 }
0x254e   :  { %3301 = vmatpush1.bf16.msra.mxu1 %v4172_v44 }
0x2614   :  { %v2275_v31 = vpop.f32.mrb[16].mxu1 }
0x2615   :  { %v2280_v48 = vadd.f32 %v2275_v31, %v4262_v27  ;;  %v2277_v9 = vpop.f32.mrb[17].mxu1 }
0x2616   :  { %v2281_v49 = vadd.f32 %v2277_v9, %v4252_v36 }
0x2617   :  { %v2945_v18 = vmul.f32 -1.442695, %v2280_v48 }
0x2618   :  { %v2946_v0 = vmul.f32 -1.442695, %v2281_v49 }
0x2619   :  { %3545 = vpow2.f32 %v2945_v18 }
0x261a   :  { %3547 = vpow2.f32 %v2946_v0 }
0x2623   :  { %v3546_v3 = vpop.eup %3545 }
0x2624   :  { %v3548_v13 = vpop.eup %3547  ;;  %v2288_v19 = vadd.f32 1.0, %v3546_v3 }
0x2625   :  { %v2289_v23 = vadd.f32 1.0, %v3548_v13 }
0x2626   :  { %3549 = vrcp.f32 %v2288_v19 }
0x2627   :  { %3551 = vrcp.f32 %v2289_v23 }
0x2630   :  { %v3550_v28 = vpop.eup %3549 }
0x2631   :  { %v3552_v41 = vpop.eup %3551  ;;  %v2294_v25 = vmul.f32 2.0, %v3550_v28  ;;  %v2296_v62 = vmul.f32 %v3550_v28, %v2171_v59 }
0x2632   :  { %v2313_v44 = vmul.f32 2.0, %v3552_v41  ;;  %v2315_v29 = vmul.f32 %v3552_v41, %v2190_v11 }
0x2633   :  { %v2947_v35 = vadd.f32 -1.0, %v2294_v25 }
0x2634   :  { %v2948_v26 = vadd.f32 -1.0, %v2313_v44 }
0x2635   :  { %2298 = vrot.lane.b32.xlu0 %v2947_v35, %s3708_s0 }
0x2636   :  { %2317 = vrot.lane.b32.xlu1 %v2948_v26, %s3708_s0 }
0x26a7   :  { %v2299_v36 = vpop.permute.xlu0 %2298 }
0x26a8   :  { %v2301_v27 = vmul.f32 %v3550_v28, %v2299_v36  ;;  %v2318_v21 = vpop.permute.xlu1 %2317 }
0x26a9   :  { %v2320_v54 = vmul.f32 %v3552_v41, %v2318_v21 }
0x26aa   :  { %2303 = vrot.lane.b32.xlu0 %v2301_v27, %s3709_s3 }
0x26ab   :  { %2322 = vrot.lane.b32.xlu1 %v2320_v54, %s3709_s3 }
0x271c   :  { %v2304_v45 = vpop.permute.xlu0 %2303 }
0x271d   :  { %v2306_v20 = vadd.f32 %v2304_v45, %v2296_v62  ;;  %v2323_v34 = vpop.permute.xlu1 %2322 }
0x271e   :  { %v2325_v42 = vadd.f32 %v2323_v34, %v2315_v29 }
0x271f   :  { %3553 = vtanh.f32 %v2306_v20 }
0x2720   :  { %3555 = vtanh.f32 %v2325_v42 }
0x2729   :  { %v3554_v53 = vpop.eup %3553 }
0x272a   :  { %v3556_v58 = vpop.eup %3555  ;;  %2309 = vrot.lane.b32.xlu0 %v3554_v53, %s3708_s0 }
0x272b   :  { %2328 = vrot.lane.b32.xlu1 %v3556_v58, %s3708_s0 }
0x279c   :  { %v2310_v7 = vpop.permute.xlu0 %2309 }
0x279d   :  { %v4408_v30 = vmul.f32 %v3550_v28, %v2310_v7  ;;  %v2329_v51 = vpop.permute.xlu1 %2328 }
0x279e   :  { %v2331_v55 = vmul.f32 %v3552_v41, %v2329_v51 }
0x279f   :  { %2333 = vrot.lane.b32.xlu0 %v4408_v30, %s3709_s3 }
0x27a0   :  { %2337 = vrot.lane.b32.xlu1 %v2331_v55, %s3708_s0 }
0x2811   :  { %v2334_v52 = vpop.permute.xlu0 %2333 }
0x2812   :  { %v4413_v56 = vpop.permute.xlu1 %2337 }
0x2813   :  { %v2340_v63 = vsel %vm399_vm1, %v2334_v52, %v4413_v56 }
0x2814   :  { %2949 = vmatmul.mubr.msk.f32.vlgmr.msra.gmra.mrb[42].mxu0 %vm264_vm2, %v2340_v63 }
0x28e7   :  { %v2410_v4 = vpop.f32.mrb[42].mxu0 }
0x28e8   :  { %v2415_v40 = vadd.f32 %v2410_v4, %v4266_v12  ;;  %v2412_v37 = vpop.f32.mrb[43].mxu0 }
0x28e9   :  { %v2416_v16 = vadd.f32 %v2412_v37, %v4248_v2 }
0x28ea   :  { %v2950_v47 = vmul.f32 -1.442695, %v2415_v40 }
0x28eb   :  { %v2951_v59 = vmul.f32 -1.442695, %v2416_v16 }
0x28ec   :  { %3557 = vpow2.f32 %v2950_v47 }
0x28ed   :  { %3559 = vpow2.f32 %v2951_v59 }
0x28f6   :  { %v3558_v17 = vpop.eup %3557 }
0x28f7   :  { %v3560_v11 = vpop.eup %3559  ;;  %v2423_v43 = vadd.f32 1.0, %v3558_v17 }
0x28f8   :  { %v2424_v14 = vadd.f32 1.0, %v3560_v11 }
0x28f9   :  { %3561 = vrcp.f32 %v2423_v43 }
0x28fa   :  { %3563 = vrcp.f32 %v2424_v14  ;;  %v2652_v14 = vld [vmem:[#allocation8 + $0x80] sm:$0xff] }
0x2903   :  { %v3562_v22 = vpop.eup %3561 }
0x2904   :  { %v3564_v24 = vpop.eup %3563  ;;  %v2429_v50 = vmul.f32 2.0, %v3562_v22  ;;  %v2431_v49 = vmul.f32 %v3562_v22, %v2306_v20 }
0x2905   :  { %v2448_v38 = vmul.f32 2.0, %v3564_v24  ;;  %v2450_v0 = vmul.f32 %v3564_v24, %v2325_v42 }
0x2906   :  { %v2952_v8 = vadd.f32 -1.0, %v2429_v50 }
0x2907   :  { %v2953_v31 = vadd.f32 -1.0, %v2448_v38  ;;  %v2637_v38 = vld [vmem:[#allocation8 + $0x8] sm:$0xff] }
0x2908   :  { %2433 = vrot.lane.b32.xlu0 %v2952_v8, %s3708_s0  ;;  %v2654_v8 = vld [vmem:[#allocation8 + $0x90] sm:$0xff] }
0x2909   :  { %2452 = vrot.lane.b32.xlu1 %v2953_v31, %s3708_s0  ;;  %v2655_v31 = vld [vmem:[#allocation8 + $0x98] sm:$0xff] }
0x297a   :  { %v2434_v2 = vpop.permute.xlu0 %2433 }
0x297b   :  { %v2436_v12 = vmul.f32 %v3562_v22, %v2434_v2  ;;  %v2453_v48 = vpop.permute.xlu1 %2452 }
0x297c   :  { %v2455_v9 = vmul.f32 %v3564_v24, %v2453_v48  ;;  %v3306_v48 = vpack.c.bf16 %v2655_v31, %v2654_v8  ;;  %v2692_v8 = vld [vmem:[#allocation8 + $0x1c0] sm:$0xff]  ;;  %v2693_v31 = vld [vmem:[#allocation8 + $0x1c8] sm:$0xff] }
0x297d   :  { %2438 = vrot.lane.b32.xlu0 %v2436_v12, %s3709_s3 }
0x297e   :  { %2457 = vrot.lane.b32.xlu1 %v2455_v9, %s3709_s3  ;;  %v2638_v9 = vld [vmem:[#allocation8 + $0x10] sm:$0xff] }
0x29ef   :  { %v2439_v18 = vpop.permute.xlu0 %2438 }
0x29f0   :  { %v2441_v3 = vadd.f32 %v2439_v18, %v2431_v49  ;;  %v2458_v13 = vpop.permute.xlu1 %2457  ;;  %v2639_v49 = vld [vmem:[#allocation8 + $0x18] sm:$0xff]  ;;  %v2684_v18 = vld [vmem:[#allocation8 + $0x180] sm:$0xff] }
0x29f1   :  { %v2460_v19 = vadd.f32 %v2458_v13, %v2450_v0  ;;  %v2668_v13 = vld [vmem:[#allocation8 + $0x100] sm:$0xff] }
0x29f2   :  { %3565 = vtanh.f32 %v2441_v3 }
0x29f3   :  { %3567 = vtanh.f32 %v2460_v19 }
0x29fc   :  { %v3566_v23 = vpop.eup %3565 }
0x29fd   :  { %v3568_v28 = vpop.eup %3567  ;;  %2444 = vrot.lane.b32.xlu0 %v3566_v23, %s3708_s0  ;;  %v3308_v23 = vpack.c.bf16 %v2639_v49, %v2638_v9  ;;  %v2646_v49 = vld [vmem:[#allocation8 + $0x50] sm:$0xff] }
0x29fe   :  { %2463 = vrot.lane.b32.xlu1 %v3568_v28, %s3708_s0 }
0x2a6f   :  { %v2445_v41 = vpop.permute.xlu0 %2444 }
0x2a70   :  { %v2447_v25 = vmul.f32 %v3562_v22, %v2445_v41  ;;  %v2464_v44 = vpop.permute.xlu1 %2463  ;;  %v2653_v22 = vld [vmem:[#allocation8 + $0x88] sm:$0xff] }
0x2a71   :  { %v4426_v35 = vmul.f32 %v3564_v24, %v2464_v44  ;;  %v2636_v24 = vld [vmem:[#allocation8] sm:$0xff]  ;;  %v3302_v50 = vpack.c.bf16 %v2653_v22, %v2652_v14  ;;  %v2657_v44 = vld [vmem:[#allocation8 + $0xa8] sm:$0xff]  ;;  %v2674_v22 = vld [vmem:[#allocation8 + $0x130] sm:$0xff] }
0x2a72   :  { %2468 = vrot.lane.b32.xlu0 %v2447_v25, %s3709_s3  ;;  %v3304_v12 = vpack.c.bf16 %v2637_v38, %v2636_v24  ;;  %v2656_v25 = vld [vmem:[#allocation8 + $0xa0] sm:$0xff]  ;;  %v2675_v24 = vld [vmem:[#allocation8 + $0x138] sm:$0xff]  ;;  %v2645_v38 = vld [vmem:[#allocation8 + $0x48] sm:$0xff] }
0x2a73   :  { %2472 = vrot.lane.b32.xlu1 %v4426_v35, %s3708_s0  ;;  %3303 = vmatprep.subr.bf16.mxu0 %v3302_v50 }
0x2a74   :  { %3305 = vmatpush3.bf16.msra.mxu0 %v3304_v12  ;;  %v2663_v12 = vld [vmem:[#allocation8 + $0xd8] sm:$0xff] }
0x2a75   :  { %3307 = vmatprep.subr.bf16.mxu0 %v3306_v48  ;;  %v3348_v48 = vpack.c.bf16 %v2675_v24, %v2674_v22 }
0x2a78   :  { %3309 = vmatpush3.bf16.msra.mxu0 %v3308_v23  ;;  %v2694_v23 = vld [vmem:[#allocation8 + $0x1d0] sm:$0xff] }
0x2ae4   :  { %v4431_v26 = vpop.permute.xlu0 %2468 }
0x2ae5   :  { %v2473_v36 = vpop.permute.xlu1 %2472 }
0x2ae6   :  { %v2475_v27 = vsel %vm399_vm1, %v4431_v26, %v2473_v36  ;;  %v2640_v36 = vld [vmem:[#allocation8 + $0x20] sm:$0xff] }
0x2ae7   :  { %2954 = vmatmul.mubr.msk.f32.vlgmr.msra.gmra.mrb[18].mxu1 %vm264_vm2, %v2475_v27  ;;  %v3379_v27 = vpack.i.bf16 %v4302_v6, %v4356_v15  ;;  %v2688_v6 = vld [vmem:[#allocation8 + $0x1a0] sm:$0xff]  ;;  %v2689_v15 = vld [vmem:[#allocation8 + $0x1a8] sm:$0xff] }
0x2bba   :  { %v2545_v21 = vpop.f32.mrb[18].mxu1 }
0x2bbb   :  { %v2550_v54 = vadd.f32 %v2545_v21, %v4268_v10  ;;  %v2547_v62 = vpop.f32.mrb[19].mxu1  ;;  %v3310_v21 = vpack.c.bf16 %v2657_v44, %v2656_v25  ;;  %v2665_v25 = vld [vmem:[#allocation8 + $0xe8] sm:$0xff] }
0x2bbc   :  { %v2551_v45 = vadd.f32 %v2547_v62, %v4244_v1  ;;  %v2686_v62 = vld [vmem:[#allocation8 + $0x190] sm:$0xff] }
0x2bbd   :  { %v2955_v29 = vmul.f32 -1.442695, %v2550_v54  ;;  %v2641_v54 = vld [vmem:[#allocation8 + $0x28] sm:$0xff]  ;;  %3311 = vmatprep.subr.bf16.mxu0 %v3310_v21 }
0x2bbe   :  { %v2956_v20 = vmul.f32 -1.442695, %v2551_v45  ;;  %v2687_v45 = vld [vmem:[#allocation8 + $0x198] sm:$0xff] }
0x2bbf   :  { %3569 = vpow2.f32 %v2955_v29  ;;  %v3338_v29 = vpack.c.bf16 %v2687_v45, %v2686_v62  ;;  %v2649_v62 = vld [vmem:[#allocation8 + $0x68] sm:$0xff] }
0x2bc0   :  { %3571 = vpow2.f32 %v2956_v20  ;;  %v2670_v20 = vld [vmem:[#allocation8 + $0x110] sm:$0xff] }
0x2bc9   :  { %v3570_v34 = vpop.eup %3569 }
0x2bca   :  { %v3572_v42 = vpop.eup %3571  ;;  %v2558_v53 = vadd.f32 1.0, %v3570_v34  ;;  %v2671_v34 = vld [vmem:[#allocation8 + $0x118] sm:$0xff] }
0x2bcb   :  { %v2559_v58 = vadd.f32 1.0, %v3572_v42  ;;  %v2658_v42 = vld [vmem:[#allocation8 + $0xb0] sm:$0xff] }
0x2bcc   :  { %3573 = vrcp.f32 %v2558_v53  ;;  %v3340_v53 = vpack.c.bf16 %v2671_v34, %v2670_v20  ;;  %v2679_v20 = vld [vmem:[#allocation8 + $0x158] sm:$0xff] }
0x2bcd   :  { %3575 = vrcp.f32 %v2559_v58  ;;  %v2659_v58 = vld [vmem:[#allocation8 + $0xb8] sm:$0xff] }
0x2bd6   :  { %v4438_v7 = vpop.eup %3573 }
0x2bd7   :  { %v4440_v51 = vpop.eup %3575  ;;  %v2564_v55 = vmul.f32 2.0, %v4438_v7  ;;  %v2566_v16 = vmul.f32 %v4438_v7, %v2441_v3  ;;  %v2685_v3 = vld [vmem:[#allocation8 + $0x188] sm:$0xff] }
0x2bd8   :  { %v2583_v10 = vmul.f32 2.0, %v4440_v51  ;;  %v2585_v59 = vmul.f32 %v4440_v51, %v2460_v19  ;;  %v2669_v19 = vld [vmem:[#allocation8 + $0x108] sm:$0xff]  ;;  %v3334_v28 = vpack.c.bf16 %v2685_v3, %v2684_v18  ;;  %v3350_v18 = vpack.c.bf16 %v2693_v31, %v2692_v8 }
0x2bd9   :  { %v2957_v52 = vadd.f32 -1.0, %v2564_v55  ;;  %v3336_v41 = vpack.c.bf16 %v2669_v19, %v2668_v13  ;;  %v3312_v55 = vpack.c.bf16 %v2641_v54, %v2640_v36  ;;  %v2677_v3 = vld [vmem:[#allocation8 + $0x148] sm:$0xff]  ;;  %v2647_v19 = vld [vmem:[#allocation8 + $0x58] sm:$0xff]  ;;  %v2648_v54 = vld [vmem:[#allocation8 + $0x60] sm:$0xff]  ;;  %v2623_v8 = vsel %vm399_vm1, %v4334_v39, %v4413_v56 }
0x2bda   :  { %v2958_v1 = vadd.f32 -1.0, %v2583_v10  ;;  %3335 = vmatprep.subr.bf16.mxu1 %v3334_v28  ;;  %v2672_v10 = vld [vmem:[#allocation8 + $0x120] sm:$0xff]  ;;  %v2695_v28 = vld [vmem:[#allocation8 + $0x1d8] sm:$0xff]  ;;  %v3324_v36 = vpack.c.bf16 %v2647_v19, %v2646_v49  ;;  %v3328_v45 = vpack.c.bf16 %v2649_v62, %v2648_v54 }
0x2bdb   :  { %2568 = vrot.lane.b32.xlu1 %v2957_v52, %s3708_s0  ;;  %3337 = vmatpush3.bf16.msra.mxu1 %v3336_v41  ;;  %v3314_v52 = vpack.c.bf16 %v2659_v58, %v2658_v42  ;;  %v2664_v41 = vld [vmem:[#allocation8 + $0xe0] sm:$0xff]  ;;  %v2666_v42 = vld [vmem:[#allocation8 + $0xf0] sm:$0xff] }
0x2bdc   :  { %2587 = vrot.lane.b32.xlu0 %v2958_v1, %s3708_s0  ;;  %3339 = vmatprep.subr.bf16.mxu1 %v3338_v29  ;;  %v2642_v1 = vld [vmem:[#allocation8 + $0x30] sm:$0xff]  ;;  %v3326_v21 = vpack.c.bf16 %v2665_v25, %v2664_v41 }
0x2bdd   :  { %3313 = vmatpush3.bf16.msra.mxu0 %v3312_v55  ;;  %v2678_v29 = vld [vmem:[#allocation8 + $0x150] sm:$0xff] }
0x2bde   :  { %3315 = vmatprep.subr.bf16.mxu0 %v3314_v52  ;;  %v3356_v34 = vpack.c.bf16 %v2679_v20, %v2678_v29  ;;  %v2650_v55 = vld [vmem:[#allocation8 + $0x70] sm:$0xff]  ;;  %v2697_v52 = vld [vmem:[#allocation8 + $0x1e8] sm:$0xff] }
0x2bdf   :  { %3341 = vmatpush3.bf16.msra.mxu1 %v3340_v53  ;;  %v2667_v53 = vld [vmem:[#allocation8 + $0xf8] sm:$0xff] }
0x2be0   :  { %v3330_v58 = vpack.c.bf16 %v2667_v53, %v2666_v42 }
0x2c4d   :  { %v2569_v63 = vpop.permute.xlu1 %2568 }
0x2c4e   :  { %v2571_v4 = vmul.f32 %v4438_v7, %v2569_v63  ;;  %v2588_v40 = vpop.permute.xlu0 %2587  ;;  %v2643_v63 = vld [vmem:[#allocation8 + $0x38] sm:$0xff] }
0x2c4f   :  { %v2590_v37 = vmul.f32 %v4440_v51, %v2588_v40  ;;  %v2673_v40 = vld [vmem:[#allocation8 + $0x128] sm:$0xff] }
0x2c50   :  { %2573 = vrot.lane.b32.xlu1 %v2571_v4, %s3709_s3  ;;  %v3342_v4 = vpack.c.bf16 %v2689_v15, %v2688_v6  ;;  %v2651_v6 = vld [vmem:[#allocation8 + $0x78] sm:$0xff] }
0x2c51   :  { %2592 = vrot.lane.b32.xlu0 %v2590_v37, %s3709_s3  ;;  %v2660_v37 = vld [vmem:[#allocation8 + $0xc0] sm:$0xff]  ;;  %v3332_v15 = vpack.c.bf16 %v2651_v6, %v2650_v55 }
0x2c52   :  { %3343 = vmatprep.subr.bf16.mxu1 %v3342_v4  ;;  %v2681_v4 = vld [vmem:[#allocation8 + $0x168] sm:$0xff] }
0x2cc2   :  { %v2574_v47 = vpop.permute.xlu1 %2573 }
0x2cc3   :  { %v2576_v17 = vadd.f32 %v2574_v47, %v2566_v16  ;;  %v2593_v11 = vpop.permute.xlu0 %2592  ;;  %v2661_v16 = vld [vmem:[#allocation8 + $0xc8] sm:$0xff]  ;;  %v2690_v47 = vld [vmem:[#allocation8 + $0x1b0] sm:$0xff] }
0x2cc4   :  { %v2595_v43 = vadd.f32 %v2593_v11, %v2585_v59  ;;  %v3344_v59 = vpack.c.bf16 %v2673_v40, %v2672_v10  ;;  %v3316_v11 = vpack.c.bf16 %v2643_v63, %v2642_v1  ;;  %v3318_v50 = vpack.c.bf16 %v2661_v16, %v2660_v37  ;;  %v2696_v10 = vld [vmem:[#allocation8 + $0x1e0] sm:$0xff]  ;;  %v2698_v37 = vld [vmem:[#allocation8 + $0x1f0] sm:$0xff]  ;;  %v2699_v16 = vld [vmem:[#allocation8 + $0x1f8] sm:$0xff] }
0x2cc5   :  { %3577 = vtanh.f32 %v2576_v17  ;;  %v2691_v17 = vld [vmem:[#allocation8 + $0x1b8] sm:$0xff]  ;;  %v3358_v1 = vpack.c.bf16 %v2697_v52, %v2696_v10  ;;  %v2680_v63 = vld [vmem:[#allocation8 + $0x160] sm:$0xff] }
0x2cc6   :  { %3579 = vtanh.f32 %v2595_v43  ;;  %v2644_v43 = vld [vmem:[#allocation8 + $0x40] sm:$0xff]  ;;  %v3346_v14 = vpack.c.bf16 %v2691_v17, %v2690_v47  ;;  %3345 = vmatpush3.bf16.msra.mxu1 %v3344_v59  ;;  %3317 = vmatpush3.bf16.msra.mxu0 %v3316_v11  ;;  %v3360_v40 = vpack.c.bf16 %v2681_v4, %v2680_v63  ;;  %v3362_v47 = vpack.c.bf16 %v2699_v16, %v2698_v37  ;;  %v2682_v59 = vld [vmem:[#allocation8 + $0x170] sm:$0xff]  ;;  %v2683_v17 = vld [vmem:[#allocation8 + $0x178] sm:$0xff] }
0x2cc7   :  { %v3320_v9 = vpack.c.bf16 %v2645_v38, %v2644_v43  ;;  %3319 = vmatprep.subr.bf16.mxu0 %v3318_v50  ;;  %v3364_v11 = vpack.c.bf16 %v2683_v17, %v2682_v59 }
0x2cc8   :  { %3347 = vmatprep.subr.bf16.mxu1 %v3346_v14 }
0x2cca   :  { %3349 = vmatpush3.bf16.msra.mxu1 %v3348_v48  ;;  %3321 = vmatpush3.bf16.msra.mxu0 %v3320_v9 }
0x2ccb   :  { %3351 = vmatprep.subr.bf16.mxu1 %v3350_v18 }
0x2ccf   :  { %v3578_v2 = vpop.eup %3577 }
0x2cd0   :  { %v3580_v0 = vpop.eup %3579  ;;  %2579 = vrot.lane.b32.xlu1 %v3578_v2, %s3708_s0  ;;  %v2662_v2 = vld [vmem:[#allocation8 + $0xd0] sm:$0xff] }
0x2cd1   :  { %2598 = vrot.lane.b32.xlu0 %v3580_v0, %s3708_s0  ;;  %v2676_v0 = vld [vmem:[#allocation8 + $0x140] sm:$0xff]  ;;  %v3322_v13 = vpack.c.bf16 %v2663_v12, %v2662_v2 }
0x2cd2   :  { %v3352_v44 = vpack.c.bf16 %v2677_v3, %v2676_v0  ;;  %v2629_v3 = vsel %vm399_vm1, %v4431_v26, %v4307_v60  ;;  %v2959_v60 = vld [vmem:[%s4508_s8] ss:$0 sm:$0xff] }
0x2cd3   :  { %3323 = vmatprep.subr.bf16.mxu0 %v3322_v13 }
0x2cd4   :  { %3380 = vrot.lane.b32.xlu1 %v3379_v27, %s3710_s6  ;;  %v3354_v27 = vpack.c.bf16 %v2695_v28, %v2694_v23  ;;  %3353 = vmatpush3.bf16.msra.mxu1 %v3352_v44 }
0x2cd5   :  { %3325 = vmatpush3.bf16.msra.mxu0 %v3324_v36 }
0x2cd6   :  { %3355 = vmatprep.subr.bf16.mxu1 %v3354_v27  ;;  %3327 = vmatprep.subr.bf16.mxu0 %v3326_v21 }
0x2cd8   :  { %3357 = vmatpush3.bf16.msra.mxu1 %v3356_v34 }
0x2cd9   :  { %3329 = vmatpush3.bf16.msra.mxu0 %v3328_v45  ;;  %3359 = vmatprep.subr.bf16.mxu1 %v3358_v1 }
0x2cda   :  { %3331 = vmatprep.subr.bf16.mxu0 %v3330_v58 }
0x2cdc   :  { %3361 = vmatpush3.bf16.msra.mxu1 %v3360_v40 }
0x2cdd   :  { %3333 = vmatpush3.bf16.msra.mxu0 %v3332_v15  ;;  %3363 = vmatprep.subr.bf16.mxu1 %v3362_v47 }
0x2ce0   :  { %3365 = vmatpush3.bf16.msra.mxu1 %v3364_v11 }
0x2d42   :  { %v2580_v43 = vpop.permute.xlu1 %2579 }
0x2d43   :  { %v2599_v14 = vpop.permute.xlu0 %2598  ;;  %v2582_v22 = vmul.f32 %v4438_v7, %v2580_v43 }
0x2d44   :  { %v2601_v24 = vmul.f32 %v4440_v51, %v2599_v14 }
0x2d45   :  { %v3384_v31 = vpack.i.bf16 %v4408_v30, %v2582_v22 }
0x2d46   :  { %v3381_v50 = vpop.permute.xlu1 %3380  ;;  %2603 = vrot.lane.b32.xlu0 %v2601_v24, %s3708_s0 }
0x2d47   :  { %v3382_v38 = vunpack.i.l.bf16 %v3381_v50  ;;  %v3383_v51 = vunpack.i.h.bf16 %v3381_v50 }
0x2d49   :  { %v2624_v2 = vsel %vm264_vm2, %v2623_v8, %v3382_v38 }
0x2d4a   :  { %3385 = vrot.lane.b32.xlu0 %v3384_v31, %s3710_s6  ;;  %v2625_v7 = vsel %vm2621_vm3, %v2624_v2, %v4382_v46  ;;  %v2626_v46 = vsel %vm399_vm1, %v4387_v33, %v4361_v57 }
0x2d4b   :  { %v2633_v12 = vmax.f32 %v2625_v7, 0.0 }
0x2d4d   :  { %2771 = vmatprep.mubr.f32.mxu0 %v2633_v12 }
0x2db8   :  { %v2604_v48 = vpop.permute.xlu0 %2603 }
0x2db9   :  { %v2619_v9 = vsel %vm399_vm1, %v4281_v5, %v2604_v48 }
0x2dba   :  { %v2620_v49 = vsel %vm264_vm2, %v2619_v9, %v3383_v51 }
0x2dbb   :  { %v2622_v39 = vsel %vm2621_vm3, %v2620_v49, %v4426_v35 }
0x2dbc   :  { %v2632_v30 = vmax.f32 %v2622_v39, 0.0  ;;  %v3386_v56 = vpop.permute.xlu0 %3385 }
0x2dbd   :  { %v3388_v18 = vunpack.i.h.bf16 %v3386_v56  ;;  %v3387_v0 = vunpack.i.l.bf16 %v3386_v56 }
0x2dbe   :  { %2772 = vmatmul.mubr.f32.vlgmr.msra.gmra.mrb[44].mxu0 %v2632_v30 }
0x2dbf   :  { %v2627_v5 = vsel %vm264_vm2, %v2626_v46, %v3388_v18  ;;  %v2630_v13 = vsel %vm264_vm2, %v2629_v3, %v3387_v0 }
0x2dc0   :  { %v2628_v35 = vsel %vm2621_vm3, %v2627_v5, %v4329_v32  ;;  %v2631_v19 = vsel %vm2621_vm3, %v2630_v13, %v4277_v61 }
0x2dc1   :  { %v2635_v23 = vmax.f32 %v2631_v19, 0.0  ;;  %v2634_v28 = vmax.f32 %v2628_v35, 0.0 }
0x2dc3   :  { %2841 = vmatprep.mubr.f32.mxu1 %v2635_v23 }
0x2dc4   :  { %2842 = vmatmul.mubr.f32.vlgmr.msra.gmra.mrb[20].mxu1 %v2634_v28 }
0x2e91   :  { %v2992_v57 = vpop.f32.mrb[44].mxu0 }
0x2e92   :  { %v2993_v33 = vpop.f32.mrb[45].mxu0 }
0x2e93   :  { %v2994_v41 = vadd.f32 %v2993_v33, %v2992_v57 }
0x2e95   :  { %v2774_v44 = vadd.f32 %v2994_v41, %v2959_v60 }
0x2e97   :  { %v3027_v26 = vpop.f32.mrb[20].mxu1 }
0x2e98   :  { %v3028_v25 = vpop.f32.mrb[21].mxu1 }
0x2e99   :  { %v3029_v32 = vadd.f32 %v3028_v25, %v3027_v26 }
0x2e9b   :  { %v2844_v36 = vadd.f32 %v3029_v32, %v2774_v44 }
0x2e9d   :  { %2847 = vst [vmem:[#allocation10] sm:$0xff] %v2844_v36 }
0x2e9e   :  { %3680 = shalt.err (!%p3677_p8)
}
0x2e9f   :  { %s3681_s8 = scalar_lea.hbm %s4509_s9, 128 }
0x2ea0   :  { %p3682_p9 = scmp.ne.s32.totalorder %s4509_s9, %s3681_s8  ;;  %p3685_p10 = scmp.lt.u32.totalorder %s3681_s8, %s4509_s9 }
0x2ea2   :  { %p3687_p11 = pnand %p3685_p10, %p3682_p9 }
0x2ea4   :  { %3690 = shalt.err (!%p3687_p11)
}
0x2ea5   :  { %2857 = dma.vmem_to_hbm [thread:$0]  %s2855_s18, 128, %s4509_s9, [#allocation4]  }
0x2ea6   :  { %3697 = dma.done.wait [#allocation4], 128  }
0x2ea7   :  { %3698 = vsyncadd [#allocation4], 4294967168 }
0x2ea8   :  { %2861 = vsyncpa [#allocation3], 1 }
0x2ea9   :  { %2862 = vsyncpa [#allocation6], 1 }
0x2eaa   :  { %2863 = vsyncpa [#allocation9], 1 }
0x2eab   :  { %2864 = vsyncpa [#allocation4], 1 }

</bundles_post_ra>
